<compile_context>
chip_gen: v7x
topology: tpu7x:2x2x1
jax: 0.10.0
libtpu: 0.0.40
codegen_flags: <defaults>
</compile_context>

<pallas_src>
import jax
import jax.numpy as jnp
from jax.experimental import pallas as pl
from jax.experimental.pallas import tpu as pltpu


def _reverse(x, axis):
    """Exact reversal of `x` along `axis` (length must be a power of two).

    Built as log2(L) block-swap stages using pltpu.roll + select.  Each stage
    verifies the roll direction with a rolled iota probe (cheap: the probe is
    broadcast over the leading batch dim), so the result does not depend on the
    roll sign convention and is bit-exact (pure data movement + selects).
    """
    axis = axis % x.ndim
    length = x.shape[axis]
    if length & (length - 1):
        raise NotImplementedError("reversal length must be a power of two")
    if length == 1:
        return x

    probe_shape = (1,) + tuple(x.shape[1:])          # broadcast over the batch dim
    idx = jax.lax.broadcasted_iota(jnp.int32, probe_shape, axis)

    k = 1
    while k < length:
        want = jnp.bitwise_xor(idx, k)               # needed source index: j ^ k
        cand_a = pltpu.roll(x, k, axis)
        cand_b = pltpu.roll(x, length - k, axis)     # roll by -k (positive shift)
        src_a = pltpu.roll(idx, k, axis)             # where cand_a[j] actually came from
        x = jnp.where(src_a == want, cand_a, cand_b)
        k *= 2
    return x


def _rotate_kernel(x_ref, xt_ref, o_ref):
    # x_ref : (B, H, W) block of x          (flattened over N*C)
    # xt_ref: (B, H, W) block of x^T        (spatial transpose, H == W)
    # o_ref : (B, H, W) block of the output slab; which rotation it holds is
    #         selected by the innermost grid axis r.
    r = pl.program_id(1)

    @pl.when(r == 0)
    def _():                                        # identity
        o_ref[...] = x_ref[...]

    @pl.when(r == 1)
    def _():                                        # x90 = flip_cols(x^T)
        o_ref[...] = _reverse(xt_ref[...], axis=2)

    @pl.when(r == 2)
    def _():                                        # x180 = flip_rows(flip_cols(x))
        o_ref[...] = _reverse(_reverse(x_ref[...], axis=2), axis=1)

    @pl.when(r == 3)
    def _():                                        # x270 = flip_rows(x^T)
        o_ref[...] = _reverse(xt_ref[...], axis=1)


def _round_up(v, m):
    return (v + m - 1) // m * m


def rotate(x: jax.Array, *, vmem_budget_bytes: int = 12 << 20) -> jax.Array:
    """Equivalent of the PyTorch `rotate` module forward pass (NCHW, H == W)."""
    N, C, H, W = x.shape
    if H != W:
        raise ValueError("rotate requires square spatial dims (torch.cat would fail otherwise)")
    if H & (H - 1):
        # TODO(synk): support non power-of-two spatial sizes (needs a general in-kernel reversal).
        raise NotImplementedError("spatial size must be a power of two")

    nc = N * C
    itemsize = jnp.dtype(x.dtype).itemsize

    # Padded VMEM footprint of one (H, W) spatial slice: sublanes pad to
    # 8 * (32 / bit-width), lanes pad to 128.  Budget 3 arrays (x, x^T, out)
    # x 2 (double buffering) below the default scoped-VMEM limit on all chips.
    sub_mult = 8 * max(1, 4 // itemsize)
    padded_slice_bytes = _round_up(H, sub_mult) * _round_up(W, 128) * itemsize
    per_buffer_budget = max(padded_slice_bytes, vmem_budget_bytes // 6)
    b_nc_cap = max(1, per_buffer_budget // padded_slice_bytes)

    # Largest divisor of N*C within the cap (divisibility keeps the r*nb + b
    # output-block mapping exact; per-step overhead ~0.35us is negligible here).
    b_nc = min(nc, b_nc_cap)
    while nc % b_nc:
        b_nc -= 1
    nb = nc // b_nc

    x_flat = x.reshape(nc, H, W)
    xt_flat = jnp.swapaxes(x, 2, 3).reshape(nc, H, W)   # wrapper-side layout plumbing (W == H)

    out_flat = pl.pallas_call(
        _rotate_kernel,
        out_shape=jax.ShapeDtypeStruct((4 * nc, H, W), x.dtype),
        grid_spec=pltpu.PrefetchScalarGridSpec(
            num_scalar_prefetch=0,
            grid=(nb, 4),                         # r innermost: input block reused 4x, fetched once
            in_specs=[
                pl.BlockSpec((b_nc, H, W), lambda b, r: (b, 0, 0)),
                pl.BlockSpec((b_nc, H, W), lambda b, r: (b, 0, 0)),
            ],
            out_specs=pl.BlockSpec((b_nc, H, W), lambda b, r: (r * nb + b, 0, 0)),
        ),
        compiler_params=pltpu.CompilerParams(
            dimension_semantics=("parallel", "arbitrary"),
        ),
    )(x_flat, xt_flat)

    # (4*N*C, H, W) -> (4N, C, H, W): pure view, matches torch.cat(dim=0) ordering.
    return out_flat.reshape(4 * N, C, H, W)


if __name__ == "__main__":
    key = jax.random.PRNGKey(0)
    N, C, H, W = 2, 4, 16, 16
    x = jax.random.normal(key, (N, C, H, W), dtype=jnp.float32)

    out = jax.block_until_ready(jax.jit(rotate)(x))

    # Pure-JAX reference with identical semantics to the PyTorch module.
    x90 = jnp.flip(jnp.swapaxes(x, 2, 3), axis=3)
    x180 = jnp.flip(jnp.flip(x, axis=2), axis=3)
    x270 = jnp.flip(jnp.swapaxes(x, 2, 3), axis=2)
    ref = jnp.concatenate([x, x90, x180, x270], axis=0)

    assert out.shape == (4 * N, C, H, W), out.shape
    assert bool(jnp.array_equal(out, ref)), "mismatch vs reference rotate"

    print("KERNEL_OK")
</pallas_src>

<mosaic_0001>
module attributes {stable_mosaic.version = 11 : i64} {
  func.func @_rotate_kernel(%arg0: i32, %arg1: i32, %arg2: memref<8x16x16xf32, #tpu.memory_space<vmem>>, %arg3: memref<8x16x16xf32, #tpu.memory_space<vmem>>, %arg4: memref<8x16x16xf32, #tpu.memory_space<vmem>>) attributes {dimension_semantics = [#tpu.dimension_semantics<parallel>, #tpu.dimension_semantics<arbitrary>], iteration_bounds = array<i64: 1, 4>, scalar_prefetch = 0 : i64, scratch_operands = 0 : i64, tpu.core_type = #tpu.core_type<tc>, window_params = [{transform_indices = @transform_0, window_bounds = array<i64: 8, 16, 16>}, {transform_indices = @transform_1, window_bounds = array<i64: 8, 16, 16>}, {transform_indices = @transform_2, window_bounds = array<i64: 8, 16, 16>}]} {
    %c0_i32 = arith.constant 0 : i32
    %0 = arith.cmpi eq, %arg1, %c0_i32 : i32
    %1 = arith.extui %0 : i1 to i32
    %c0_i32_0 = arith.constant 0 : i32
    %2 = arith.cmpi ne, %1, %c0_i32_0 : i32
    scf.if %2 {
      %c0 = arith.constant 0 : index
      %c0_4 = arith.constant 0 : index
      %c0_5 = arith.constant 0 : index
      %12 = vector.load %arg2[%c0, %c0_4, %c0_5] : memref<8x16x16xf32, #tpu.memory_space<vmem>>, vector<8x16x16xf32>
      %c0_6 = arith.constant 0 : index
      %c0_7 = arith.constant 0 : index
      %c0_8 = arith.constant 0 : index
      %13 = vector.load %arg4[%c0_6, %c0_7, %c0_8] : memref<8x16x16xf32, #tpu.memory_space<vmem>>, vector<8x16x16xf32>
      tpu.vector_store %arg4[%c0_6, %c0_7, %c0_8], %12 {strides = array<i32>} : memref<8x16x16xf32, #tpu.memory_space<vmem>>, vector<8x16x16xf32>,
    } else {
    }
    %c1_i32 = arith.constant 1 : i32
    %3 = arith.cmpi eq, %arg1, %c1_i32 : i32
    %4 = arith.extui %3 : i1 to i32
    %c0_i32_1 = arith.constant 0 : i32
    %5 = arith.cmpi ne, %4, %c0_i32_1 : i32
    scf.if %5 {
      %c0 = arith.constant 0 : index
      %c0_4 = arith.constant 0 : index
      %c0_5 = arith.constant 0 : index
      %12 = vector.load %arg3[%c0, %c0_4, %c0_5] : memref<8x16x16xf32, #tpu.memory_space<vmem>>, vector<8x16x16xf32>
      %13 = tpu.iota {dimensions = array<i32: 2>} : vector<1x16x16xi32>
      %c1_i32_6 = arith.constant 1 : i32
      %14 = vector.broadcast %c1_i32_6 : i32 to vector<1x16x16xi32>
      %15 = arith.xori %13, %14 : vector<1x16x16xi32>
      %c1_i32_7 = arith.constant 1 : i32
      %16 = tpu.dynamic_rotate %12 by %c1_i32_7 dim 2 : vector<8x16x16xf32>, i32 -> vector<8x16x16xf32>
      %c15_i32 = arith.constant 15 : i32
      %17 = tpu.dynamic_rotate %12 by %c15_i32 dim 2 : vector<8x16x16xf32>, i32 -> vector<8x16x16xf32>
      %c1_i32_8 = arith.constant 1 : i32
      %18 = tpu.dynamic_rotate %13 by %c1_i32_8 dim 2 : vector<1x16x16xi32>, i32 -> vector<1x16x16xi32>
      %19 = arith.cmpi eq, %18, %15 : vector<1x16x16xi32>
      %20 = vector.shape_cast %19 : vector<1x16x16xi1> to vector<1x16x16xi1>
      %21 = vector.broadcast %20 : vector<1x16x16xi1> to vector<8x16x16xi1>
      %22 = arith.select %21, %16, %17 : vector<8x16x16xi1>, vector<8x16x16xf32>
      %c2_i32_9 = arith.constant 2 : i32
      %23 = vector.broadcast %c2_i32_9 : i32 to vector<1x16x16xi32>
      %24 = arith.xori %13, %23 : vector<1x16x16xi32>
      %c2_i32_10 = arith.constant 2 : i32
      %25 = tpu.dynamic_rotate %22 by %c2_i32_10 dim 2 : vector<8x16x16xf32>, i32 -> vector<8x16x16xf32>
      %c14_i32 = arith.constant 14 : i32
      %26 = tpu.dynamic_rotate %22 by %c14_i32 dim 2 : vector<8x16x16xf32>, i32 -> vector<8x16x16xf32>
      %c2_i32_11 = arith.constant 2 : i32
      %27 = tpu.dynamic_rotate %13 by %c2_i32_11 dim 2 : vector<1x16x16xi32>, i32 -> vector<1x16x16xi32>
      %28 = arith.cmpi eq, %27, %24 : vector<1x16x16xi32>
      %29 = vector.shape_cast %28 : vector<1x16x16xi1> to vector<1x16x16xi1>
      %30 = vector.broadcast %29 : vector<1x16x16xi1> to vector<8x16x16xi1>
      %31 = arith.select %30, %25, %26 : vector<8x16x16xi1>, vector<8x16x16xf32>
      %c4_i32 = arith.constant 4 : i32
      %32 = vector.broadcast %c4_i32 : i32 to vector<1x16x16xi32>
      %33 = arith.xori %13, %32 : vector<1x16x16xi32>
      %c4_i32_12 = arith.constant 4 : i32
      %34 = tpu.dynamic_rotate %31 by %c4_i32_12 dim 2 : vector<8x16x16xf32>, i32 -> vector<8x16x16xf32>
      %c12_i32 = arith.constant 12 : i32
      %35 = tpu.dynamic_rotate %31 by %c12_i32 dim 2 : vector<8x16x16xf32>, i32 -> vector<8x16x16xf32>
      %c4_i32_13 = arith.constant 4 : i32
      %36 = tpu.dynamic_rotate %13 by %c4_i32_13 dim 2 : vector<1x16x16xi32>, i32 -> vector<1x16x16xi32>
      %37 = arith.cmpi eq, %36, %33 : vector<1x16x16xi32>
      %38 = vector.shape_cast %37 : vector<1x16x16xi1> to vector<1x16x16xi1>
      %39 = vector.broadcast %38 : vector<1x16x16xi1> to vector<8x16x16xi1>
      %40 = arith.select %39, %34, %35 : vector<8x16x16xi1>, vector<8x16x16xf32>
      %c8_i32 = arith.constant 8 : i32
      %41 = vector.broadcast %c8_i32 : i32 to vector<1x16x16xi32>
      %42 = arith.xori %13, %41 : vector<1x16x16xi32>
      %c8_i32_14 = arith.constant 8 : i32
      %43 = tpu.dynamic_rotate %40 by %c8_i32_14 dim 2 : vector<8x16x16xf32>, i32 -> vector<8x16x16xf32>
      %c8_i32_15 = arith.constant 8 : i32
      %44 = tpu.dynamic_rotate %40 by %c8_i32_15 dim 2 : vector<8x16x16xf32>, i32 -> vector<8x16x16xf32>
      %c8_i32_16 = arith.constant 8 : i32
      %45 = tpu.dynamic_rotate %13 by %c8_i32_16 dim 2 : vector<1x16x16xi32>, i32 -> vector<1x16x16xi32>
      %46 = arith.cmpi eq, %45, %42 : vector<1x16x16xi32>
      %47 = vector.shape_cast %46 : vector<1x16x16xi1> to vector<1x16x16xi1>
      %48 = vector.broadcast %47 : vector<1x16x16xi1> to vector<8x16x16xi1>
      %49 = arith.select %48, %43, %44 : vector<8x16x16xi1>, vector<8x16x16xf32>
      %c0_17 = arith.constant 0 : index
      %c0_18 = arith.constant 0 : index
      %c0_19 = arith.constant 0 : index
      %50 = vector.load %arg4[%c0_17, %c0_18, %c0_19] : memref<8x16x16xf32, #tpu.memory_space<vmem>>, vector<8x16x16xf32>
      tpu.vector_store %arg4[%c0_17, %c0_18, %c0_19], %49 {strides = array<i32>} : memref<8x16x16xf32, #tpu.memory_space<vmem>>, vector<8x16x16xf32>,
    } else {
    }
    %c2_i32 = arith.constant 2 : i32
    %6 = arith.cmpi eq, %arg1, %c2_i32 : i32
    %7 = arith.extui %6 : i1 to i32
    %c0_i32_2 = arith.constant 0 : i32
    %8 = arith.cmpi ne, %7, %c0_i32_2 : i32
    scf.if %8 {
      %c0 = arith.constant 0 : index
      %c0_4 = arith.constant 0 : index
      %c0_5 = arith.constant 0 : index
      %12 = vector.load %arg2[%c0, %c0_4, %c0_5] : memref<8x16x16xf32, #tpu.memory_space<vmem>>, vector<8x16x16xf32>
      %13 = tpu.iota {dimensions = array<i32: 2>} : vector<1x16x16xi32>
      %c1_i32_6 = arith.constant 1 : i32
      %14 = vector.broadcast %c1_i32_6 : i32 to vector<1x16x16xi32>
      %15 = arith.xori %13, %14 : vector<1x16x16xi32>
      %c1_i32_7 = arith.constant 1 : i32
      %16 = tpu.dynamic_rotate %12 by %c1_i32_7 dim 2 : vector<8x16x16xf32>, i32 -> vector<8x16x16xf32>
      %c15_i32 = arith.constant 15 : i32
      %17 = tpu.dynamic_rotate %12 by %c15_i32 dim 2 : vector<8x16x16xf32>, i32 -> vector<8x16x16xf32>
      %c1_i32_8 = arith.constant 1 : i32
      %18 = tpu.dynamic_rotate %13 by %c1_i32_8 dim 2 : vector<1x16x16xi32>, i32 -> vector<1x16x16xi32>
      %19 = arith.cmpi eq, %18, %15 : vector<1x16x16xi32>
      %20 = vector.shape_cast %19 : vector<1x16x16xi1> to vector<1x16x16xi1>
      %21 = vector.broadcast %20 : vector<1x16x16xi1> to vector<8x16x16xi1>
      %22 = arith.select %21, %16, %17 : vector<8x16x16xi1>, vector<8x16x16xf32>
      %c2_i32_9 = arith.constant 2 : i32
      %23 = vector.broadcast %c2_i32_9 : i32 to vector<1x16x16xi32>
      %24 = arith.xori %13, %23 : vector<1x16x16xi32>
      %c2_i32_10 = arith.constant 2 : i32
      %25 = tpu.dynamic_rotate %22 by %c2_i32_10 dim 2 : vector<8x16x16xf32>, i32 -> vector<8x16x16xf32>
      %c14_i32 = arith.constant 14 : i32
      %26 = tpu.dynamic_rotate %22 by %c14_i32 dim 2 : vector<8x16x16xf32>, i32 -> vector<8x16x16xf32>
      %c2_i32_11 = arith.constant 2 : i32
      %27 = tpu.dynamic_rotate %13 by %c2_i32_11 dim 2 : vector<1x16x16xi32>, i32 -> vector<1x16x16xi32>
      %28 = arith.cmpi eq, %27, %24 : vector<1x16x16xi32>
      %29 = vector.shape_cast %28 : vector<1x16x16xi1> to vector<1x16x16xi1>
      %30 = vector.broadcast %29 : vector<1x16x16xi1> to vector<8x16x16xi1>
      %31 = arith.select %30, %25, %26 : vector<8x16x16xi1>, vector<8x16x16xf32>
      %c4_i32 = arith.constant 4 : i32
      %32 = vector.broadcast %c4_i32 : i32 to vector<1x16x16xi32>
      %33 = arith.xori %13, %32 : vector<1x16x16xi32>
      %c4_i32_12 = arith.constant 4 : i32
      %34 = tpu.dynamic_rotate %31 by %c4_i32_12 dim 2 : vector<8x16x16xf32>, i32 -> vector<8x16x16xf32>
      %c12_i32 = arith.constant 12 : i32
      %35 = tpu.dynamic_rotate %31 by %c12_i32 dim 2 : vector<8x16x16xf32>, i32 -> vector<8x16x16xf32>
      %c4_i32_13 = arith.constant 4 : i32
      %36 = tpu.dynamic_rotate %13 by %c4_i32_13 dim 2 : vector<1x16x16xi32>, i32 -> vector<1x16x16xi32>
      %37 = arith.cmpi eq, %36, %33 : vector<1x16x16xi32>
      %38 = vector.shape_cast %37 : vector<1x16x16xi1> to vector<1x16x16xi1>
      %39 = vector.broadcast %38 : vector<1x16x16xi1> to vector<8x16x16xi1>
      %40 = arith.select %39, %34, %35 : vector<8x16x16xi1>, vector<8x16x16xf32>
      %c8_i32 = arith.constant 8 : i32
      %41 = vector.broadcast %c8_i32 : i32 to vector<1x16x16xi32>
      %42 = arith.xori %13, %41 : vector<1x16x16xi32>
      %c8_i32_14 = arith.constant 8 : i32
      %43 = tpu.dynamic_rotate %40 by %c8_i32_14 dim 2 : vector<8x16x16xf32>, i32 -> vector<8x16x16xf32>
      %c8_i32_15 = arith.constant 8 : i32
      %44 = tpu.dynamic_rotate %40 by %c8_i32_15 dim 2 : vector<8x16x16xf32>, i32 -> vector<8x16x16xf32>
      %c8_i32_16 = arith.constant 8 : i32
      %45 = tpu.dynamic_rotate %13 by %c8_i32_16 dim 2 : vector<1x16x16xi32>, i32 -> vector<1x16x16xi32>
      %46 = arith.cmpi eq, %45, %42 : vector<1x16x16xi32>
      %47 = vector.shape_cast %46 : vector<1x16x16xi1> to vector<1x16x16xi1>
      %48 = vector.broadcast %47 : vector<1x16x16xi1> to vector<8x16x16xi1>
      %49 = arith.select %48, %43, %44 : vector<8x16x16xi1>, vector<8x16x16xf32>
      %50 = tpu.iota {dimensions = array<i32: 1>} : vector<1x16x16xi32>
      %c1_i32_17 = arith.constant 1 : i32
      %51 = vector.broadcast %c1_i32_17 : i32 to vector<1x16x16xi32>
      %52 = arith.xori %50, %51 : vector<1x16x16xi32>
      %c1_i32_18 = arith.constant 1 : i32
      %53 = tpu.dynamic_rotate %49 by %c1_i32_18 dim 1 : vector<8x16x16xf32>, i32 -> vector<8x16x16xf32>
      %c15_i32_19 = arith.constant 15 : i32
      %54 = tpu.dynamic_rotate %49 by %c15_i32_19 dim 1 : vector<8x16x16xf32>, i32 -> vector<8x16x16xf32>
      %c1_i32_20 = arith.constant 1 : i32
      %55 = tpu.dynamic_rotate %50 by %c1_i32_20 dim 1 : vector<1x16x16xi32>, i32 -> vector<1x16x16xi32>
      %56 = arith.cmpi eq, %55, %52 : vector<1x16x16xi32>
      %57 = vector.shape_cast %56 : vector<1x16x16xi1> to vector<1x16x16xi1>
      %58 = vector.broadcast %57 : vector<1x16x16xi1> to vector<8x16x16xi1>
      %59 = arith.select %58, %53, %54 : vector<8x16x16xi1>, vector<8x16x16xf32>
      %c2_i32_21 = arith.constant 2 : i32
      %60 = vector.broadcast %c2_i32_21 : i32 to vector<1x16x16xi32>
      %61 = arith.xori %50, %60 : vector<1x16x16xi32>
      %c2_i32_22 = arith.constant 2 : i32
      %62 = tpu.dynamic_rotate %59 by %c2_i32_22 dim 1 : vector<8x16x16xf32>, i32 -> vector<8x16x16xf32>
      %c14_i32_23 = arith.constant 14 : i32
      %63 = tpu.dynamic_rotate %59 by %c14_i32_23 dim 1 : vector<8x16x16xf32>, i32 -> vector<8x16x16xf32>
      %c2_i32_24 = arith.constant 2 : i32
      %64 = tpu.dynamic_rotate %50 by %c2_i32_24 dim 1 : vector<1x16x16xi32>, i32 -> vector<1x16x16xi32>
      %65 = arith.cmpi eq, %64, %61 : vector<1x16x16xi32>
      %66 = vector.shape_cast %65 : vector<1x16x16xi1> to vector<1x16x16xi1>
      %67 = vector.broadcast %66 : vector<1x16x16xi1> to vector<8x16x16xi1>
      %68 = arith.select %67, %62, %63 : vector<8x16x16xi1>, vector<8x16x16xf32>
      %c4_i32_25 = arith.constant 4 : i32
      %69 = vector.broadcast %c4_i32_25 : i32 to vector<1x16x16xi32>
      %70 = arith.xori %50, %69 : vector<1x16x16xi32>
      %c4_i32_26 = arith.constant 4 : i32
      %71 = tpu.dynamic_rotate %68 by %c4_i32_26 dim 1 : vector<8x16x16xf32>, i32 -> vector<8x16x16xf32>
      %c12_i32_27 = arith.constant 12 : i32
      %72 = tpu.dynamic_rotate %68 by %c12_i32_27 dim 1 : vector<8x16x16xf32>, i32 -> vector<8x16x16xf32>
      %c4_i32_28 = arith.constant 4 : i32
      %73 = tpu.dynamic_rotate %50 by %c4_i32_28 dim 1 : vector<1x16x16xi32>, i32 -> vector<1x16x16xi32>
      %74 = arith.cmpi eq, %73, %70 : vector<1x16x16xi32>
      %75 = vector.shape_cast %74 : vector<1x16x16xi1> to vector<1x16x16xi1>
      %76 = vector.broadcast %75 : vector<1x16x16xi1> to vector<8x16x16xi1>
      %77 = arith.select %76, %71, %72 : vector<8x16x16xi1>, vector<8x16x16xf32>
      %c8_i32_29 = arith.constant 8 : i32
      %78 = vector.broadcast %c8_i32_29 : i32 to vector<1x16x16xi32>
      %79 = arith.xori %50, %78 : vector<1x16x16xi32>
      %c8_i32_30 = arith.constant 8 : i32
      %80 = tpu.dynamic_rotate %77 by %c8_i32_30 dim 1 : vector<8x16x16xf32>, i32 -> vector<8x16x16xf32>
      %c8_i32_31 = arith.constant 8 : i32
      %81 = tpu.dynamic_rotate %77 by %c8_i32_31 dim 1 : vector<8x16x16xf32>, i32 -> vector<8x16x16xf32>
      %c8_i32_32 = arith.constant 8 : i32
      %82 = tpu.dynamic_rotate %50 by %c8_i32_32 dim 1 : vector<1x16x16xi32>, i32 -> vector<1x16x16xi32>
      %83 = arith.cmpi eq, %82, %79 : vector<1x16x16xi32>
      %84 = vector.shape_cast %83 : vector<1x16x16xi1> to vector<1x16x16xi1>
      %85 = vector.broadcast %84 : vector<1x16x16xi1> to vector<8x16x16xi1>
      %86 = arith.select %85, %80, %81 : vector<8x16x16xi1>, vector<8x16x16xf32>
      %c0_33 = arith.constant 0 : index
      %c0_34 = arith.constant 0 : index
      %c0_35 = arith.constant 0 : index
      %87 = vector.load %arg4[%c0_33, %c0_34, %c0_35] : memref<8x16x16xf32, #tpu.memory_space<vmem>>, vector<8x16x16xf32>
      tpu.vector_store %arg4[%c0_33, %c0_34, %c0_35], %86 {strides = array<i32>} : memref<8x16x16xf32, #tpu.memory_space<vmem>>, vector<8x16x16xf32>,
    } else {
    }
    %c3_i32 = arith.constant 3 : i32
    %9 = arith.cmpi eq, %arg1, %c3_i32 : i32
    %10 = arith.extui %9 : i1 to i32
    %c0_i32_3 = arith.constant 0 : i32
    %11 = arith.cmpi ne, %10, %c0_i32_3 : i32
    scf.if %11 {
      %c0 = arith.constant 0 : index
      %c0_4 = arith.constant 0 : index
      %c0_5 = arith.constant 0 : index
      %12 = vector.load %arg3[%c0, %c0_4, %c0_5] : memref<8x16x16xf32, #tpu.memory_space<vmem>>, vector<8x16x16xf32>
      %13 = tpu.iota {dimensions = array<i32: 1>} : vector<1x16x16xi32>
      %c1_i32_6 = arith.constant 1 : i32
      %14 = vector.broadcast %c1_i32_6 : i32 to vector<1x16x16xi32>
      %15 = arith.xori %13, %14 : vector<1x16x16xi32>
      %c1_i32_7 = arith.constant 1 : i32
      %16 = tpu.dynamic_rotate %12 by %c1_i32_7 dim 1 : vector<8x16x16xf32>, i32 -> vector<8x16x16xf32>
      %c15_i32 = arith.constant 15 : i32
      %17 = tpu.dynamic_rotate %12 by %c15_i32 dim 1 : vector<8x16x16xf32>, i32 -> vector<8x16x16xf32>
      %c1_i32_8 = arith.constant 1 : i32
      %18 = tpu.dynamic_rotate %13 by %c1_i32_8 dim 1 : vector<1x16x16xi32>, i32 -> vector<1x16x16xi32>
      %19 = arith.cmpi eq, %18, %15 : vector<1x16x16xi32>
      %20 = vector.shape_cast %19 : vector<1x16x16xi1> to vector<1x16x16xi1>
      %21 = vector.broadcast %20 : vector<1x16x16xi1> to vector<8x16x16xi1>
      %22 = arith.select %21, %16, %17 : vector<8x16x16xi1>, vector<8x16x16xf32>
      %c2_i32_9 = arith.constant 2 : i32
      %23 = vector.broadcast %c2_i32_9 : i32 to vector<1x16x16xi32>
      %24 = arith.xori %13, %23 : vector<1x16x16xi32>
      %c2_i32_10 = arith.constant 2 : i32
      %25 = tpu.dynamic_rotate %22 by %c2_i32_10 dim 1 : vector<8x16x16xf32>, i32 -> vector<8x16x16xf32>
      %c14_i32 = arith.constant 14 : i32
      %26 = tpu.dynamic_rotate %22 by %c14_i32 dim 1 : vector<8x16x16xf32>, i32 -> vector<8x16x16xf32>
      %c2_i32_11 = arith.constant 2 : i32
      %27 = tpu.dynamic_rotate %13 by %c2_i32_11 dim 1 : vector<1x16x16xi32>, i32 -> vector<1x16x16xi32>
      %28 = arith.cmpi eq, %27, %24 : vector<1x16x16xi32>
      %29 = vector.shape_cast %28 : vector<1x16x16xi1> to vector<1x16x16xi1>
      %30 = vector.broadcast %29 : vector<1x16x16xi1> to vector<8x16x16xi1>
      %31 = arith.select %30, %25, %26 : vector<8x16x16xi1>, vector<8x16x16xf32>
      %c4_i32 = arith.constant 4 : i32
      %32 = vector.broadcast %c4_i32 : i32 to vector<1x16x16xi32>
      %33 = arith.xori %13, %32 : vector<1x16x16xi32>
      %c4_i32_12 = arith.constant 4 : i32
      %34 = tpu.dynamic_rotate %31 by %c4_i32_12 dim 1 : vector<8x16x16xf32>, i32 -> vector<8x16x16xf32>
      %c12_i32 = arith.constant 12 : i32
      %35 = tpu.dynamic_rotate %31 by %c12_i32 dim 1 : vector<8x16x16xf32>, i32 -> vector<8x16x16xf32>
      %c4_i32_13 = arith.constant 4 : i32
      %36 = tpu.dynamic_rotate %13 by %c4_i32_13 dim 1 : vector<1x16x16xi32>, i32 -> vector<1x16x16xi32>
      %37 = arith.cmpi eq, %36, %33 : vector<1x16x16xi32>
      %38 = vector.shape_cast %37 : vector<1x16x16xi1> to vector<1x16x16xi1>
      %39 = vector.broadcast %38 : vector<1x16x16xi1> to vector<8x16x16xi1>
      %40 = arith.select %39, %34, %35 : vector<8x16x16xi1>, vector<8x16x16xf32>
      %c8_i32 = arith.constant 8 : i32
      %41 = vector.broadcast %c8_i32 : i32 to vector<1x16x16xi32>
      %42 = arith.xori %13, %41 : vector<1x16x16xi32>
      %c8_i32_14 = arith.constant 8 : i32
      %43 = tpu.dynamic_rotate %40 by %c8_i32_14 dim 1 : vector<8x16x16xf32>, i32 -> vector<8x16x16xf32>
      %c8_i32_15 = arith.constant 8 : i32
      %44 = tpu.dynamic_rotate %40 by %c8_i32_15 dim 1 : vector<8x16x16xf32>, i32 -> vector<8x16x16xf32>
      %c8_i32_16 = arith.constant 8 : i32
      %45 = tpu.dynamic_rotate %13 by %c8_i32_16 dim 1 : vector<1x16x16xi32>, i32 -> vector<1x16x16xi32>
      %46 = arith.cmpi eq, %45, %42 : vector<1x16x16xi32>
      %47 = vector.shape_cast %46 : vector<1x16x16xi1> to vector<1x16x16xi1>
      %48 = vector.broadcast %47 : vector<1x16x16xi1> to vector<8x16x16xi1>
      %49 = arith.select %48, %43, %44 : vector<8x16x16xi1>, vector<8x16x16xf32>
      %c0_17 = arith.constant 0 : index
      %c0_18 = arith.constant 0 : index
      %c0_19 = arith.constant 0 : index
      %50 = vector.load %arg4[%c0_17, %c0_18, %c0_19] : memref<8x16x16xf32, #tpu.memory_space<vmem>>, vector<8x16x16xf32>
      tpu.vector_store %arg4[%c0_17, %c0_18, %c0_19], %49 {strides = array<i32>} : memref<8x16x16xf32, #tpu.memory_space<vmem>>, vector<8x16x16xf32>,
    } else {
    }
    return
  }
  func.func @transform_0(%arg0: i32, %arg1: i32) -> (i32, i32, i32) {
    %c0_i32 = arith.constant 0 : i32
    %c0_i32_0 = arith.constant 0 : i32
    %c0_i32_1 = arith.constant 0 : i32
    return %arg0, %c0_i32, %c0_i32_0 : i32, i32, i32
  }
  func.func @transform_1(%arg0: i32, %arg1: i32) -> (i32, i32, i32) {
    %c0_i32 = arith.constant 0 : i32
    %c0_i32_0 = arith.constant 0 : i32
    %c0_i32_1 = arith.constant 0 : i32
    return %arg0, %c0_i32, %c0_i32_0 : i32, i32, i32
  }
  func.func @transform_2(%arg0: i32, %arg1: i32) -> (i32, i32, i32) {
    %c1_i32 = arith.constant 1 : i32
    %0 = arith.muli %arg1, %c1_i32 : i32
    %1 = arith.addi %0, %arg0 : i32
    %c0_i32 = arith.constant 0 : i32
    %c0_i32_0 = arith.constant 0 : i32
    %c0_i32_1 = arith.constant 0 : i32
    return %1, %c0_i32, %c0_i32_0 : i32, i32, i32
  }
}

</mosaic_0001>

<bundles_post_ra>
// kernel: rotate.1
= control target key start
LH: loop header
LB: loop body
LE: loop exit
PB: predicated region body
PF: predicated region fallthrough
CT: control target
= control target key end

     0   :  { %7 = vsyncpa [#allocation3], 0  ;;  %s5710_s0 = inlined_call_operand.vmem [shape: f32[8,16,16], index: 0, kind: input, shape index: {}]   ;;  %s5711_s1 = inlined_call_operand.vmem [shape: f32[8,16,16], index: 1, kind: input, shape index: {}]   ;;  %s5712_s2 = inlined_call_operand.hbm [shape: f32[32,16,16], index: 2, kind: output, shape index: {}]  }
   0x1   :  { %9 = vsyncpa [#allocation3 + $0x1], 0  ;;  %s2969_s9 = smov 0   ;;  %s2971_s10 = smov 0  }
   0x2   :  { %s2973_s11 = smov 0   ;;  %s2975_s12 = smov 0  }
   0x3   :  { %s2977_s13 = smov 0   ;;  %s2979_s14 = smov 0  }
   0x4 LB: > { %s2759_s15 = sadd.s32 4294967295, %s2931_s14   ;;  %s2760_s16 = sadd.s32 4294967294, %s2931_s14   ;;  %s2931_s14 = sphi %s2979_s14, %s15_s14   ;;  %s2927_s13 = sphi %s2977_s13, %s5755_s13   ;;  %s2923_s12 = sphi %s2975_s12, %s5754_s12   ;;  %s2919_s11 = sphi %s2973_s11, %s5753_s11   ;;  %s2915_s10 = sphi %s2971_s10, %s5752_s10   ;;  %s2911_s9 = sphi %s2969_s9, %s5751_s9  }
   0x5   : > { %s24_s17 = sadd.s32 1, %s2927_s13  ;;  %s88_s18 = sadd.s32 1, %s2919_s11 }
   0x6   : > { %p25_p0 = scmp.ge.s32.totalorder %s24_s17, 4  ;;  %p98_p1 = scmp.ne.s32.totalorder %s2919_s11, %s2915_s10 }
   0x7   : > { %p99_p2 = scmp.eq.s32.totalorder %s2759_s15, 3  ;;  %p104_p3 = scmp.ne.s32.totalorder %s2915_s10, %s2911_s9 }
   0x8   : > { %s5757_s17 = smov (%p25_p0, %s24_s17), 0  ;;  %p105_p5 = scmp.eq.s32.totalorder %s2760_s16, 3 }
   0x9   : > { %p3009_p4 = por %p99_p2, %p98_p1  ;;  %s85_s20 = ssub.s32 %s2927_s13, %s5757_s17 }
   0xa   : > { %p2764_p6 = scmp.ge.s32.totalorder %s2931_s14, 1  ;;  %p86_p7 = scmp.eq.s32.totalorder %s85_s20, 0 }
   0xb   : > { %p3016_p8 = por %p105_p5, %p104_p3  ;;  %p143_p9 = scmp.lt.s32.totalorder %s2931_s14, 5 }
   0xc   : > { %s3022_s22 = scalar_select %p86_p7, %s2919_s11, %s88_s18  }
   0xd   : > { %p144_p10 = pnand %p2764_p6, %p143_p9 }
   0xe   : > { %s169_s23 = sand.u32 (!%p144_p10), 1, %s2915_s10   ;;  %p2766_p11 = scmp.ne.s32.totalorder (!%p144_p10), %s2923_s12, 0 }
   0xf   : > { %147 = sbr.rel (%p144_p10) target bundleno = 3695 (0xe6f), region = 28  ;;  %s2765_s24 = sshll.u32 (!%p144_p10), %s169_s23, 7 }
  0x10   : > { %s3027_s25 = scalar_lea.vmem (!%p144_p10), [#allocation2], %s2765_s24 }
  0x16   : > { %191 = sbr.rel (%p2766_p11) target bundleno = 31 (0x1f), region = 32  ;;  %v192_v0 = vld [vmem:[%s5710_s0] sm:$0xff] (!%p2766_p11)  ;;  %vm208_vm0 = vcmask (!%p2766_p11), 130048   ;;  %v193_v1 = vld [vmem:[%s5710_s0 + $0x8] sm:$0xff] (!%p2766_p11)  ;;  %v194_v2 = vld [vmem:[%s5710_s0 + $0x10] sm:$0xff] (!%p2766_p11) }
  0x17   : > { %209 = vst.msk [vmem:[%s3027_s25] sm:$0xff] (!%p2766_p11), %vm208_vm0, %v192_v0  ;;  %210 = vst.msk [vmem:[%s3027_s25 + $0x8] sm:$0xff] (!%p2766_p11), %vm208_vm0, %v193_v1  ;;  %v195_v3 = vld [vmem:[%s5710_s0 + $0x18] sm:$0xff] (!%p2766_p11)  ;;  %v196_v4 = vld [vmem:[%s5710_s0 + $0x20] sm:$0xff] (!%p2766_p11) }
  0x18   : > { %211 = vst.msk [vmem:[%s3027_s25 + $0x10] sm:$0xff] (!%p2766_p11), %vm208_vm0, %v194_v2  ;;  %v197_v5 = vld [vmem:[%s5710_s0 + $0x28] sm:$0xff] (!%p2766_p11)  ;;  %212 = vst.msk [vmem:[%s3027_s25 + $0x18] sm:$0xff] (!%p2766_p11), %vm208_vm0, %v195_v3  ;;  %v198_v6 = vld [vmem:[%s5710_s0 + $0x30] sm:$0xff] (!%p2766_p11) }
  0x19   : > { %213 = vst.msk [vmem:[%s3027_s25 + $0x20] sm:$0xff] (!%p2766_p11), %vm208_vm0, %v196_v4  ;;  %214 = vst.msk [vmem:[%s3027_s25 + $0x28] sm:$0xff] (!%p2766_p11), %vm208_vm0, %v197_v5  ;;  %v199_v7 = vld [vmem:[%s5710_s0 + $0x38] sm:$0xff] (!%p2766_p11)  ;;  %v200_v8 = vld [vmem:[%s5710_s0 + $0x40] sm:$0xff] (!%p2766_p11) }
  0x1a   : > { %215 = vst.msk [vmem:[%s3027_s25 + $0x30] sm:$0xff] (!%p2766_p11), %vm208_vm0, %v198_v6  ;;  %216 = vst.msk [vmem:[%s3027_s25 + $0x38] sm:$0xff] (!%p2766_p11), %vm208_vm0, %v199_v7  ;;  %v201_v9 = vld [vmem:[%s5710_s0 + $0x48] sm:$0xff] (!%p2766_p11)  ;;  %v202_v10 = vld [vmem:[%s5710_s0 + $0x50] sm:$0xff] (!%p2766_p11) }
  0x1b   : > { %217 = vst.msk [vmem:[%s3027_s25 + $0x40] sm:$0xff] (!%p2766_p11), %vm208_vm0, %v200_v8  ;;  %v203_v11 = vld [vmem:[%s5710_s0 + $0x58] sm:$0xff] (!%p2766_p11)  ;;  %218 = vst.msk [vmem:[%s3027_s25 + $0x48] sm:$0xff] (!%p2766_p11), %vm208_vm0, %v201_v9  ;;  %v204_v12 = vld [vmem:[%s5710_s0 + $0x60] sm:$0xff] (!%p2766_p11) }
  0x1c   : > { %219 = vst.msk [vmem:[%s3027_s25 + $0x50] sm:$0xff] (!%p2766_p11), %vm208_vm0, %v202_v10  ;;  %220 = vst.msk [vmem:[%s3027_s25 + $0x58] sm:$0xff] (!%p2766_p11), %vm208_vm0, %v203_v11  ;;  %v205_v13 = vld [vmem:[%s5710_s0 + $0x68] sm:$0xff] (!%p2766_p11)  ;;  %v206_v14 = vld [vmem:[%s5710_s0 + $0x70] sm:$0xff] (!%p2766_p11) }
  0x1d   : > { %221 = vst.msk [vmem:[%s3027_s25 + $0x60] sm:$0xff] %vm208_vm0, %v204_v12  ;;  %222 = vst.msk [vmem:[%s3027_s25 + $0x68] sm:$0xff] %vm208_vm0, %v205_v13  ;;  %v207_v15 = vld [vmem:[%s5710_s0 + $0x78] sm:$0xff] }
  0x1e   : > { %223 = vst.msk [vmem:[%s3027_s25 + $0x70] sm:$0xff] %vm208_vm0, %v206_v14  ;;  %224 = vst.msk [vmem:[%s3027_s25 + $0x78] sm:$0xff] %vm208_vm0, %v207_v15 }
  0x1f PF: > { %p2767_p12 = scmp.ne.s32.totalorder %s2923_s12, 1 }
  0x20   : > { %v3114_v16 = vld [vmem:[%s5711_s1] sm:$0xff] (!%p2767_p12)  ;;  %v3119_v17 = vld [vmem:[%s5711_s1 + $0x10] sm:$0xff] (!%p2767_p12)  ;;  %s2933_s30 = smov (!%p2767_p12), 16   ;;  %v3128_v18 = vld [vmem:[%s5711_s1 + $0x8] sm:$0xff] (!%p2767_p12)  ;;  %v245_v30 = vlaneseq (!%p2767_p12)  ;;  %vm248_vm1 = vcmask (!%p2767_p12), 1047680   ;;  %s2934_s28 = smov (!%p2767_p12), 15  }
  0x21   : > { %228 = sbr.rel (%p2767_p12) target bundleno = 1802 (0x70a), region = 36  ;;  %249 = vrot.lane.b32.xlu0 (!%p2767_p12), %v3114_v16, %s2933_s30  ;;  %255 = vrot.lane.b32.xlu1 (!%p2767_p12), %v3119_v17, %s2933_s30  ;;  %v3133_v19 = vld [vmem:[%s5711_s1 + $0x18] sm:$0xff] (!%p2767_p12)  ;;  %v3142_v20 = vld [vmem:[%s5711_s1 + $0x20] sm:$0xff] (!%p2767_p12)  ;;  %s2935_s29 = smov (!%p2767_p12), 14   ;;  %vm1152_vm5 = vcmask (!%p2767_p12), 130048  }
  0x22   : > { %v3147_v21 = vld [vmem:[%s5711_s1 + $0x28] sm:$0xff] (!%p2767_p12)  ;;  %v3156_v22 = vld [vmem:[%s5711_s1 + $0x30] sm:$0xff] (!%p2767_p12)  ;;  %v3161_v23 = vld [vmem:[%s5711_s1 + $0x38] sm:$0xff] (!%p2767_p12)  ;;  %v3223_v33 = vand.u32 (!%p2767_p12), 127, %v245_v30  ;;  %s2936_s3 = smov (!%p2767_p12), 113   ;;  %s2937_s4 = smov (!%p2767_p12), 12  }
  0x23   : > { %v3170_v24 = vld [vmem:[%s5711_s1 + $0x40] sm:$0xff] (!%p2767_p12)  ;;  %v3175_v25 = vld [vmem:[%s5711_s1 + $0x48] sm:$0xff] (!%p2767_p12)  ;;  %v3184_v26 = vld [vmem:[%s5711_s1 + $0x50] sm:$0xff] (!%p2767_p12)  ;;  %s2938_s5 = smov (!%p2767_p12), 114   ;;  %s2939_s6 = smov (!%p2767_p12), 8  }
  0x24   : > { %v3189_v27 = vld [vmem:[%s5711_s1 + $0x58] sm:$0xff] (!%p2767_p12)  ;;  %v3198_v28 = vld [vmem:[%s5711_s1 + $0x60] sm:$0xff] (!%p2767_p12)  ;;  %v3203_v29 = vld [vmem:[%s5711_s1 + $0x68] sm:$0xff] (!%p2767_p12)  ;;  %v247_v4 = vxor.u32 (!%p2767_p12), 1, %v3223_v33  ;;  %s2940_s7 = smov (!%p2767_p12), 116   ;;  %s2941_s8 = smov (!%p2767_p12), 120  }
  0x25   : > { %252 = vrot.lane.b32.xlu0 (!%p2767_p12), %v3128_v18, %s2933_s30  ;;  %258 = vrot.lane.b32.xlu1 (!%p2767_p12), %v3133_v19, %s2933_s30  ;;  %v3212_v31 = vld [vmem:[%s5711_s1 + $0x70] sm:$0xff] (!%p2767_p12)  ;;  %v3217_v32 = vld [vmem:[%s5711_s1 + $0x78] sm:$0xff] (!%p2767_p12) }
  0x29   : > { %261 = vrot.lane.b32.xlu0 %v3142_v20, %s2933_s30  ;;  %264 = vrot.lane.b32.xlu1 %v3147_v21, %s2933_s30 }
  0x2d   : > { %267 = vrot.lane.b32.xlu0 %v3156_v22, %s2933_s30  ;;  %270 = vrot.lane.b32.xlu1 %v3161_v23, %s2933_s30 }
  0x31   : > { %273 = vrot.lane.b32.xlu0 %v3170_v24, %s2933_s30  ;;  %276 = vrot.lane.b32.xlu1 %v3175_v25, %s2933_s30 }
  0x35   : > { %279 = vrot.lane.b32.xlu0 %v3184_v26, %s2933_s30  ;;  %282 = vrot.lane.b32.xlu1 %v3189_v27, %s2933_s30 }
  0x39   : > { %285 = vrot.lane.b32.xlu0 %v3198_v28, %s2933_s30  ;;  %288 = vrot.lane.b32.xlu1 %v3203_v29, %s2933_s30 }
  0x3d   : > { %291 = vrot.lane.b32.xlu0 %v3212_v31, %s2933_s30  ;;  %294 = vrot.lane.b32.xlu1 %v3217_v32, %s2933_s30 }
  0x41   : > { %345 = vrot.lane.b32.xlu0 %v3223_v33, %s2933_s30 }
  0x93   : > { %v250_v34 = vpop.permute.xlu0 %249  ;;  %v256_v35 = vpop.permute.xlu1 %255 }
  0x94   : > { %v251_v36 = vsel %vm248_vm1, %v250_v34, %v3114_v16  ;;  %v257_v37 = vsel %vm248_vm1, %v256_v35, %v3119_v17 }
  0x95   : > { %297 = vrot.lane.b32.xlu1 %v251_v36, %s2933_s30 }
  0x97   : > { %v253_v38 = vpop.permute.xlu0 %252  ;;  %v259_v39 = vpop.permute.xlu1 %258 }
  0x98   : > { %v254_v40 = vsel %vm248_vm1, %v253_v38, %v3128_v18  ;;  %v260_v41 = vsel %vm248_vm1, %v259_v39, %v3133_v19 }
  0x99   : > { %301 = vrot.lane.b32.xlu1 %v257_v37, %s2933_s30  ;;  %299 = vrot.lane.b32.xlu0 %v254_v40, %s2933_s30 }
  0x9b   : > { %v262_v42 = vpop.permute.xlu0 %261  ;;  %v265_v43 = vpop.permute.xlu1 %264 }
  0x9c   : > { %v263_v44 = vsel %vm248_vm1, %v262_v42, %v3142_v20  ;;  %v266_v45 = vsel %vm248_vm1, %v265_v43, %v3147_v21 }
  0x9d   : > { %303 = vrot.lane.b32.xlu0 %v260_v41, %s2933_s30  ;;  %305 = vrot.lane.b32.xlu1 %v263_v44, %s2933_s30 }
  0x9f   : > { %v268_v46 = vpop.permute.xlu0 %267  ;;  %v271_v47 = vpop.permute.xlu1 %270 }
  0xa0   : > { %v269_v48 = vsel %vm248_vm1, %v268_v46, %v3156_v22  ;;  %v272_v49 = vsel %vm248_vm1, %v271_v47, %v3161_v23 }
  0xa1   : > { %307 = vrot.lane.b32.xlu0 %v266_v45, %s2933_s30  ;;  %309 = vrot.lane.b32.xlu1 %v269_v48, %s2933_s30 }
  0xa3   : > { %v274_v50 = vpop.permute.xlu0 %273  ;;  %v277_v51 = vpop.permute.xlu1 %276 }
  0xa4   : > { %v275_v52 = vsel %vm248_vm1, %v274_v50, %v3170_v24  ;;  %v278_v53 = vsel %vm248_vm1, %v277_v51, %v3175_v25 }
  0xa5   : > { %311 = vrot.lane.b32.xlu0 %v272_v49, %s2933_s30  ;;  %313 = vrot.lane.b32.xlu1 %v275_v52, %s2933_s30 }
  0xa7   : > { %v280_v54 = vpop.permute.xlu0 %279  ;;  %v283_v55 = vpop.permute.xlu1 %282 }
  0xa8   : > { %v281_v56 = vsel %vm248_vm1, %v280_v54, %v3184_v26  ;;  %v284_v57 = vsel %vm248_vm1, %v283_v55, %v3189_v27 }
  0xa9   : > { %315 = vrot.lane.b32.xlu0 %v278_v53, %s2933_s30  ;;  %317 = vrot.lane.b32.xlu1 %v281_v56, %s2933_s30 }
  0xab   : > { %v286_v58 = vpop.permute.xlu0 %285  ;;  %v289_v59 = vpop.permute.xlu1 %288 }
  0xac   : > { %v287_v60 = vsel %vm248_vm1, %v286_v58, %v3198_v28  ;;  %v290_v61 = vsel %vm248_vm1, %v289_v59, %v3203_v29 }
  0xad   : > { %319 = vrot.lane.b32.xlu0 %v284_v57, %s2933_s30  ;;  %321 = vrot.lane.b32.xlu1 %v287_v60, %s2933_s30 }
  0xaf   : > { %v292_v62 = vpop.permute.xlu0 %291  ;;  %v295_v63 = vpop.permute.xlu1 %294 }
  0xb0   : > { %v293_v0 = vsel %vm248_vm1, %v292_v62, %v3212_v31  ;;  %v296_v1 = vsel %vm248_vm1, %v295_v63, %v3217_v32 }
  0xb1   : > { %323 = vrot.lane.b32.xlu0 %v290_v61, %s2933_s30  ;;  %325 = vrot.lane.b32.xlu1 %v293_v0, %s2933_s30 }
  0xb3   : > { %v346_v2 = vpop.permute.xlu0 %345 }
  0xb4   : > { %v347_v3 = vsel %vm248_vm1, %v346_v2, %v3223_v33 }
  0xb5   : > { %327 = vrot.lane.b32.xlu0 %v296_v1, %s2933_s30  ;;  %348 = vrot.lane.b32.xlu1 %v347_v3, %s2933_s30 }
  0xb9   : > { %351 = vrot.lane.b32.xlu0 %v247_v4, %s2934_s28 }
 0x107   : > { %v298_v5 = vpop.permute.xlu1 %297 }
 0x108   : > { %v329_v6 = vsel %vm248_vm1, %v298_v5, %v3114_v16 }
 0x109   : > { %372 = vrot.lane.b32.xlu1 %v329_v6, %s2935_s29 }
 0x10b   : > { %v302_v7 = vpop.permute.xlu1 %301  ;;  %v300_v8 = vpop.permute.xlu0 %299 }
 0x10c   : > { %v331_v9 = vsel %vm248_vm1, %v302_v7, %v3119_v17  ;;  %v330_v10 = vsel %vm248_vm1, %v300_v8, %v3128_v18 }
 0x10d   : > { %376 = vrot.lane.b32.xlu1 %v331_v9, %s2935_s29  ;;  %374 = vrot.lane.b32.xlu0 %v330_v10, %s2935_s29 }
 0x10f   : > { %v306_v11 = vpop.permute.xlu1 %305  ;;  %v304_v12 = vpop.permute.xlu0 %303 }
 0x110   : > { %v333_v13 = vsel %vm248_vm1, %v306_v11, %v3142_v20  ;;  %v332_v14 = vsel %vm248_vm1, %v304_v12, %v3133_v19 }
 0x111   : > { %380 = vrot.lane.b32.xlu1 %v333_v13, %s2935_s29  ;;  %378 = vrot.lane.b32.xlu0 %v332_v14, %s2935_s29 }
 0x113   : > { %v310_v15 = vpop.permute.xlu1 %309  ;;  %v308_v16 = vpop.permute.xlu0 %307 }
 0x114   : > { %v335_v17 = vsel %vm248_vm1, %v310_v15, %v3156_v22  ;;  %v334_v18 = vsel %vm248_vm1, %v308_v16, %v3147_v21 }
 0x115   : > { %384 = vrot.lane.b32.xlu1 %v335_v17, %s2935_s29  ;;  %382 = vrot.lane.b32.xlu0 %v334_v18, %s2935_s29 }
 0x117   : > { %v314_v20 = vpop.permute.xlu1 %313  ;;  %v312_v30 = vpop.permute.xlu0 %311 }
 0x118   : > { %v337_v19 = vsel %vm248_vm1, %v314_v20, %v3170_v24  ;;  %v336_v34 = vsel %vm248_vm1, %v312_v30, %v3161_v23 }
 0x119   : > { %388 = vrot.lane.b32.xlu1 %v337_v19, %s2935_s29  ;;  %386 = vrot.lane.b32.xlu0 %v336_v34, %s2935_s29 }
 0x11b   : > { %v318_v22 = vpop.permute.xlu1 %317  ;;  %v316_v35 = vpop.permute.xlu0 %315 }
 0x11c   : > { %v339_v21 = vsel %vm248_vm1, %v318_v22, %v3184_v26  ;;  %v338_v36 = vsel %vm248_vm1, %v316_v35, %v3175_v25 }
 0x11d   : > { %392 = vrot.lane.b32.xlu1 %v339_v21, %s2935_s29  ;;  %390 = vrot.lane.b32.xlu0 %v338_v36, %s2935_s29 }
 0x11f   : > { %v322_v24 = vpop.permute.xlu1 %321  ;;  %v320_v37 = vpop.permute.xlu0 %319 }
 0x120   : > { %v341_v23 = vsel %vm248_vm1, %v322_v24, %v3198_v28  ;;  %v340_v38 = vsel %vm248_vm1, %v320_v37, %v3189_v27 }
 0x121   : > { %396 = vrot.lane.b32.xlu1 %v341_v23, %s2935_s29  ;;  %394 = vrot.lane.b32.xlu0 %v340_v38, %s2935_s29 }
 0x123   : > { %v326_v26 = vpop.permute.xlu1 %325  ;;  %v324_v39 = vpop.permute.xlu0 %323 }
 0x124   : > { %v343_v25 = vsel %vm248_vm1, %v326_v26, %v3212_v31  ;;  %v342_v40 = vsel %vm248_vm1, %v324_v39, %v3203_v29 }
 0x125   : > { %400 = vrot.lane.b32.xlu1 %v343_v25, %s2935_s29  ;;  %398 = vrot.lane.b32.xlu0 %v342_v40, %s2935_s29 }
 0x127   : > { %v328_v28 = vpop.permute.xlu0 %327  ;;  %v349_v41 = vpop.permute.xlu1 %348 }
 0x128   : > { %v344_v27 = vsel %vm248_vm1, %v328_v28, %v3217_v32  ;;  %v3329_v42 = vsel %vm248_vm1, %v349_v41, %v3223_v33 }
 0x129   : > { %402 = vrot.lane.b32.xlu0 %v344_v27, %s2935_s29 }
 0x12b   : > { %v352_v43 = vpop.permute.xlu0 %351 }
 0x12c   : > { %vm3332_vm2 = vcmp.eq.s32.totalorder %v3329_v42, %v352_v43 }
 0x17b   : > { %v373_v29 = vpop.permute.xlu1 %372 }
 0x17c   : > { %v420_v44 = vsel %vm3332_vm2, %v329_v6, %v373_v29 }
 0x17d   : > { %453 = vrot.lane.b32.xlu1 %v420_v44, %s2936_s3 }
 0x17f   : > { %v377_v32 = vpop.permute.xlu1 %376  ;;  %v375_v45 = vpop.permute.xlu0 %374 }
 0x180   : > { %v422_v46 = vsel %vm3332_vm2, %v331_v9, %v377_v32  ;;  %v421_v47 = vsel %vm3332_vm2, %v330_v10, %v375_v45 }
 0x181   : > { %457 = vrot.lane.b32.xlu1 %v422_v46, %s2936_s3  ;;  %455 = vrot.lane.b32.xlu0 %v421_v47, %s2936_s3 }
 0x183   : > { %v381_v48 = vpop.permute.xlu1 %380  ;;  %v379_v49 = vpop.permute.xlu0 %378 }
 0x184   : > { %v424_v50 = vsel %vm3332_vm2, %v333_v13, %v381_v48  ;;  %v423_v51 = vsel %vm3332_vm2, %v332_v14, %v379_v49 }
 0x185   : > { %461 = vrot.lane.b32.xlu1 %v424_v50, %s2936_s3  ;;  %459 = vrot.lane.b32.xlu0 %v423_v51, %s2936_s3 }
 0x187   : > { %v385_v52 = vpop.permute.xlu1 %384  ;;  %v383_v53 = vpop.permute.xlu0 %382 }
 0x188   : > { %v426_v54 = vsel %vm3332_vm2, %v335_v17, %v385_v52  ;;  %v425_v55 = vsel %vm3332_vm2, %v334_v18, %v383_v53 }
 0x189   : > { %465 = vrot.lane.b32.xlu1 %v426_v54, %s2936_s3  ;;  %463 = vrot.lane.b32.xlu0 %v425_v55, %s2936_s3 }
 0x18b   : > { %v389_v56 = vpop.permute.xlu1 %388  ;;  %v387_v57 = vpop.permute.xlu0 %386 }
 0x18c   : > { %v428_v58 = vsel %vm3332_vm2, %v337_v19, %v389_v56  ;;  %v427_v59 = vsel %vm3332_vm2, %v336_v34, %v387_v57 }
 0x18d   : > { %469 = vrot.lane.b32.xlu1 %v428_v58, %s2936_s3  ;;  %467 = vrot.lane.b32.xlu0 %v427_v59, %s2936_s3  ;;  %v436_v58 = vxor.u32 2, %v3223_v33 }
 0x18f   : > { %v393_v60 = vpop.permute.xlu1 %392  ;;  %v391_v61 = vpop.permute.xlu0 %390 }
 0x190   : > { %v430_v62 = vsel %vm3332_vm2, %v339_v21, %v393_v60  ;;  %v429_v63 = vsel %vm3332_vm2, %v338_v36, %v391_v61 }
 0x191   : > { %473 = vrot.lane.b32.xlu1 %v430_v62, %s2936_s3  ;;  %471 = vrot.lane.b32.xlu0 %v429_v63, %s2936_s3 }
 0x193   : > { %v397_v0 = vpop.permute.xlu1 %396  ;;  %v395_v1 = vpop.permute.xlu0 %394 }
 0x194   : > { %v432_v2 = vsel %vm3332_vm2, %v341_v23, %v397_v0  ;;  %v431_v3 = vsel %vm3332_vm2, %v340_v38, %v395_v1 }
 0x195   : > { %477 = vrot.lane.b32.xlu1 %v432_v2, %s2936_s3  ;;  %475 = vrot.lane.b32.xlu0 %v431_v3, %s2936_s3 }
 0x197   : > { %v401_v4 = vpop.permute.xlu1 %400  ;;  %v399_v5 = vpop.permute.xlu0 %398 }
 0x198   : > { %v434_v6 = vsel %vm3332_vm2, %v343_v25, %v401_v4  ;;  %v433_v7 = vsel %vm3332_vm2, %v342_v40, %v399_v5 }
 0x199   : > { %481 = vrot.lane.b32.xlu1 %v434_v6, %s2936_s3  ;;  %479 = vrot.lane.b32.xlu0 %v433_v7, %s2936_s3 }
 0x19b   : > { %v403_v8 = vpop.permute.xlu0 %402 }
 0x19c   : > { %v435_v9 = vsel %vm3332_vm2, %v344_v27, %v403_v8 }
 0x19d   : > { %483 = vrot.lane.b32.xlu0 %v435_v9, %s2936_s3 }
 0x1ef   : > { %v3384_v10 = vpop.permute.xlu1 %453 }
 0x1f0   : > { %501 = vrot.lane.b32.xlu1 %v3384_v10, %s2933_s30 }
 0x1f3   : > { %v3388_v11 = vpop.permute.xlu1 %457  ;;  %v3390_v12 = vpop.permute.xlu0 %455 }
 0x1f4   : > { %507 = vrot.lane.b32.xlu1 %v3388_v11, %s2933_s30  ;;  %504 = vrot.lane.b32.xlu0 %v3390_v12, %s2933_s30 }
 0x1f7   : > { %v3396_v13 = vpop.permute.xlu1 %461  ;;  %v3398_v14 = vpop.permute.xlu0 %459 }
 0x1f8   : > { %513 = vrot.lane.b32.xlu1 %v3396_v13, %s2933_s30  ;;  %510 = vrot.lane.b32.xlu0 %v3398_v14, %s2933_s30 }
 0x1fb   : > { %v3404_v15 = vpop.permute.xlu1 %465  ;;  %v3406_v16 = vpop.permute.xlu0 %463 }
 0x1fc   : > { %519 = vrot.lane.b32.xlu1 %v3404_v15, %s2933_s30  ;;  %516 = vrot.lane.b32.xlu0 %v3406_v16, %s2933_s30 }
 0x1ff   : > { %v3412_v17 = vpop.permute.xlu1 %469  ;;  %v3414_v18 = vpop.permute.xlu0 %467 }
 0x200   : > { %525 = vrot.lane.b32.xlu1 %v3412_v17, %s2933_s30  ;;  %522 = vrot.lane.b32.xlu0 %v3414_v18, %s2933_s30 }
 0x203   : > { %v3420_v20 = vpop.permute.xlu1 %473  ;;  %v3422_v30 = vpop.permute.xlu0 %471 }
 0x204   : > { %531 = vrot.lane.b32.xlu1 %v3420_v20, %s2933_s30  ;;  %528 = vrot.lane.b32.xlu0 %v3422_v30, %s2933_s30 }
 0x207   : > { %v3428_v19 = vpop.permute.xlu1 %477  ;;  %v3430_v34 = vpop.permute.xlu0 %475 }
 0x208   : > { %537 = vrot.lane.b32.xlu1 %v3428_v19, %s2933_s30  ;;  %534 = vrot.lane.b32.xlu0 %v3430_v34, %s2933_s30 }
 0x20b   : > { %v3436_v22 = vpop.permute.xlu1 %481  ;;  %v3438_v35 = vpop.permute.xlu0 %479 }
 0x20c   : > { %543 = vrot.lane.b32.xlu1 %v3436_v22, %s2933_s30  ;;  %540 = vrot.lane.b32.xlu0 %v3438_v35, %s2933_s30 }
 0x20f   : > { %v3444_v21 = vpop.permute.xlu0 %483 }
 0x210   : > { %546 = vrot.lane.b32.xlu0 %v3444_v21, %s2933_s30 }
 0x262   : > { %v502_v36 = vpop.permute.xlu1 %501 }
 0x263   : > { %v503_v24 = vsel %vm248_vm1, %v502_v36, %v3384_v10 }
 0x264   : > { %549 = vrot.lane.b32.xlu1 %v503_v24, %s2933_s30 }
 0x266   : > { %v508_v37 = vpop.permute.xlu1 %507  ;;  %v505_v23 = vpop.permute.xlu0 %504 }
 0x267   : > { %v509_v38 = vsel %vm248_vm1, %v508_v37, %v3388_v11  ;;  %v506_v26 = vsel %vm248_vm1, %v505_v23, %v3390_v12 }
 0x268   : > { %553 = vrot.lane.b32.xlu1 %v509_v38, %s2933_s30  ;;  %551 = vrot.lane.b32.xlu0 %v506_v26, %s2933_s30 }
 0x26a   : > { %v514_v39 = vpop.permute.xlu1 %513  ;;  %v511_v25 = vpop.permute.xlu0 %510 }
 0x26b   : > { %v515_v40 = vsel %vm248_vm1, %v514_v39, %v3396_v13  ;;  %v512_v28 = vsel %vm248_vm1, %v511_v25, %v3398_v14 }
 0x26c   : > { %557 = vrot.lane.b32.xlu1 %v515_v40, %s2933_s30  ;;  %555 = vrot.lane.b32.xlu0 %v512_v28, %s2933_s30 }
 0x26e   : > { %v520_v27 = vpop.permute.xlu1 %519  ;;  %v517_v41 = vpop.permute.xlu0 %516 }
 0x26f   : > { %v521_v43 = vsel %vm248_vm1, %v520_v27, %v3404_v15  ;;  %v518_v31 = vsel %vm248_vm1, %v517_v41, %v3406_v16 }
 0x270   : > { %561 = vrot.lane.b32.xlu1 %v521_v43, %s2933_s30  ;;  %559 = vrot.lane.b32.xlu0 %v518_v31, %s2933_s30 }
 0x272   : > { %v526_v29 = vpop.permute.xlu1 %525  ;;  %v523_v44 = vpop.permute.xlu0 %522 }
 0x273   : > { %v527_v32 = vsel %vm248_vm1, %v526_v29, %v3412_v17  ;;  %v524_v45 = vsel %vm248_vm1, %v523_v44, %v3414_v18 }
 0x274   : > { %565 = vrot.lane.b32.xlu1 %v527_v32, %s2933_s30  ;;  %563 = vrot.lane.b32.xlu0 %v524_v45, %s2933_s30 }
 0x276   : > { %v532_v46 = vpop.permute.xlu1 %531  ;;  %v529_v47 = vpop.permute.xlu0 %528 }
 0x277   : > { %v533_v48 = vsel %vm248_vm1, %v532_v46, %v3420_v20  ;;  %v530_v49 = vsel %vm248_vm1, %v529_v47, %v3422_v30 }
 0x278   : > { %569 = vrot.lane.b32.xlu1 %v533_v48, %s2933_s30  ;;  %567 = vrot.lane.b32.xlu0 %v530_v49, %s2933_s30 }
 0x27a   : > { %v538_v50 = vpop.permute.xlu1 %537  ;;  %v535_v51 = vpop.permute.xlu0 %534 }
 0x27b   : > { %v539_v52 = vsel %vm248_vm1, %v538_v50, %v3428_v19  ;;  %v536_v53 = vsel %vm248_vm1, %v535_v51, %v3430_v34 }
 0x27c   : > { %573 = vrot.lane.b32.xlu1 %v539_v52, %s2933_s30  ;;  %571 = vrot.lane.b32.xlu0 %v536_v53, %s2933_s30 }
 0x27e   : > { %v544_v54 = vpop.permute.xlu1 %543  ;;  %v541_v55 = vpop.permute.xlu0 %540 }
 0x27f   : > { %v545_v56 = vsel %vm248_vm1, %v544_v54, %v3436_v22  ;;  %v542_v57 = vsel %vm248_vm1, %v541_v55, %v3438_v35 }
 0x280   : > { %577 = vrot.lane.b32.xlu1 %v545_v56, %s2933_s30  ;;  %575 = vrot.lane.b32.xlu0 %v542_v57, %s2933_s30 }
 0x282   : > { %v547_v59 = vpop.permute.xlu0 %546 }
 0x283   : > { %v548_v60 = vsel %vm248_vm1, %v547_v59, %v3444_v21 }
 0x284   : > { %597 = vrot.lane.b32.xlu1 %v436_v58, %s2935_s29  ;;  %579 = vrot.lane.b32.xlu0 %v548_v60, %s2933_s30 }
 0x2d6   : > { %v550_v61 = vpop.permute.xlu1 %549 }
 0x2d7   : > { %v581_v62 = vsel %vm248_vm1, %v550_v61, %v3384_v10 }
 0x2d8   : > { %618 = vrot.lane.b32.xlu0 %v581_v62, %s2937_s4 }
 0x2da   : > { %v554_v63 = vpop.permute.xlu1 %553  ;;  %v552_v0 = vpop.permute.xlu0 %551 }
 0x2db   : > { %v583_v1 = vsel %vm248_vm1, %v554_v63, %v3388_v11  ;;  %v582_v2 = vsel %vm248_vm1, %v552_v0, %v3390_v12 }
 0x2dc   : > { %622 = vrot.lane.b32.xlu0 %v583_v1, %s2937_s4  ;;  %620 = vrot.lane.b32.xlu1 %v582_v2, %s2937_s4 }
 0x2de   : > { %v558_v3 = vpop.permute.xlu1 %557  ;;  %v556_v4 = vpop.permute.xlu0 %555 }
 0x2df   : > { %v585_v5 = vsel %vm248_vm1, %v558_v3, %v3396_v13  ;;  %v584_v6 = vsel %vm248_vm1, %v556_v4, %v3398_v14 }
 0x2e0   : > { %626 = vrot.lane.b32.xlu0 %v585_v5, %s2937_s4  ;;  %624 = vrot.lane.b32.xlu1 %v584_v6, %s2937_s4 }
 0x2e2   : > { %v562_v7 = vpop.permute.xlu1 %561  ;;  %v560_v8 = vpop.permute.xlu0 %559 }
 0x2e3   : > { %v587_v9 = vsel %vm248_vm1, %v562_v7, %v3404_v15  ;;  %v586_v10 = vsel %vm248_vm1, %v560_v8, %v3406_v16 }
 0x2e4   : > { %630 = vrot.lane.b32.xlu0 %v587_v9, %s2937_s4  ;;  %628 = vrot.lane.b32.xlu1 %v586_v10, %s2937_s4 }
 0x2e6   : > { %v566_v11 = vpop.permute.xlu1 %565  ;;  %v564_v12 = vpop.permute.xlu0 %563 }
 0x2e7   : > { %v589_v13 = vsel %vm248_vm1, %v566_v11, %v3412_v17  ;;  %v588_v14 = vsel %vm248_vm1, %v564_v12, %v3414_v18 }
 0x2e8   : > { %634 = vrot.lane.b32.xlu0 %v589_v13, %s2937_s4  ;;  %632 = vrot.lane.b32.xlu1 %v588_v14, %s2937_s4 }
 0x2ea   : > { %v570_v15 = vpop.permute.xlu1 %569  ;;  %v568_v36 = vpop.permute.xlu0 %567 }
 0x2eb   : > { %v591_v16 = vsel %vm248_vm1, %v570_v15, %v3420_v20  ;;  %v590_v24 = vsel %vm248_vm1, %v568_v36, %v3422_v30 }
 0x2ec   : > { %638 = vrot.lane.b32.xlu0 %v591_v16, %s2937_s4  ;;  %636 = vrot.lane.b32.xlu1 %v590_v24, %s2937_s4 }
 0x2ee   : > { %v574_v17 = vpop.permute.xlu1 %573  ;;  %v572_v37 = vpop.permute.xlu0 %571 }
 0x2ef   : > { %v593_v18 = vsel %vm248_vm1, %v574_v17, %v3428_v19  ;;  %v592_v23 = vsel %vm248_vm1, %v572_v37, %v3430_v34 }
 0x2f0   : > { %642 = vrot.lane.b32.xlu0 %v593_v18, %s2937_s4  ;;  %640 = vrot.lane.b32.xlu1 %v592_v23, %s2937_s4 }
 0x2f2   : > { %v578_v20 = vpop.permute.xlu1 %577  ;;  %v576_v38 = vpop.permute.xlu0 %575 }
 0x2f3   : > { %v595_v30 = vsel %vm248_vm1, %v578_v20, %v3436_v22  ;;  %v594_v26 = vsel %vm248_vm1, %v576_v38, %v3438_v35 }
 0x2f4   : > { %646 = vrot.lane.b32.xlu0 %v595_v30, %s2937_s4  ;;  %644 = vrot.lane.b32.xlu1 %v594_v26, %s2937_s4 }
 0x2f6   : > { %v580_v19 = vpop.permute.xlu0 %579  ;;  %v598_v39 = vpop.permute.xlu1 %597 }
 0x2f7   : > { %v596_v34 = vsel %vm248_vm1, %v580_v19, %v3444_v21  ;;  %vm3547_vm3 = vcmp.eq.s32.totalorder %v3329_v42, %v598_v39 }
 0x2f8   : > { %648 = vrot.lane.b32.xlu1 %v596_v34, %s2937_s4 }
 0x34a   : > { %v619_v22 = vpop.permute.xlu0 %618 }
 0x34b   : > { %v666_v35 = vsel %vm3547_vm3, %v581_v62, %v619_v22 }
 0x34c   : > { %699 = vrot.lane.b32.xlu0 %v666_v35, %s2938_s5 }
 0x34e   : > { %v621_v40 = vpop.permute.xlu1 %620  ;;  %v623_v28 = vpop.permute.xlu0 %622 }
 0x34f   : > { %v667_v21 = vsel %vm3547_vm3, %v582_v2, %v621_v40  ;;  %v668_v27 = vsel %vm3547_vm3, %v583_v1, %v623_v28 }
 0x350   : > { %701 = vrot.lane.b32.xlu1 %v667_v21, %s2938_s5  ;;  %703 = vrot.lane.b32.xlu0 %v668_v27, %s2938_s5 }
 0x352   : > { %v625_v41 = vpop.permute.xlu1 %624  ;;  %v627_v43 = vpop.permute.xlu0 %626 }
 0x353   : > { %v669_v31 = vsel %vm3547_vm3, %v584_v6, %v625_v41  ;;  %v670_v29 = vsel %vm3547_vm3, %v585_v5, %v627_v43 }
 0x354   : > { %705 = vrot.lane.b32.xlu1 %v669_v31, %s2938_s5  ;;  %707 = vrot.lane.b32.xlu0 %v670_v29, %s2938_s5 }
 0x356   : > { %v629_v44 = vpop.permute.xlu1 %628  ;;  %v631_v32 = vpop.permute.xlu0 %630 }
 0x357   : > { %v671_v45 = vsel %vm3547_vm3, %v586_v10, %v629_v44  ;;  %v672_v46 = vsel %vm3547_vm3, %v587_v9, %v631_v32 }
 0x358   : > { %709 = vrot.lane.b32.xlu1 %v671_v45, %s2938_s5  ;;  %711 = vrot.lane.b32.xlu0 %v672_v46, %s2938_s5 }
 0x35a   : > { %v633_v47 = vpop.permute.xlu1 %632  ;;  %v635_v48 = vpop.permute.xlu0 %634 }
 0x35b   : > { %v673_v49 = vsel %vm3547_vm3, %v588_v14, %v633_v47  ;;  %v674_v50 = vsel %vm3547_vm3, %v589_v13, %v635_v48 }
 0x35c   : > { %713 = vrot.lane.b32.xlu1 %v673_v49, %s2938_s5  ;;  %715 = vrot.lane.b32.xlu0 %v674_v50, %s2938_s5  ;;  %v682_v49 = vxor.u32 4, %v3223_v33 }
 0x35e   : > { %v637_v51 = vpop.permute.xlu1 %636  ;;  %v639_v52 = vpop.permute.xlu0 %638 }
 0x35f   : > { %v675_v53 = vsel %vm3547_vm3, %v590_v24, %v637_v51  ;;  %v676_v54 = vsel %vm3547_vm3, %v591_v16, %v639_v52 }
 0x360   : > { %717 = vrot.lane.b32.xlu1 %v675_v53, %s2938_s5  ;;  %719 = vrot.lane.b32.xlu0 %v676_v54, %s2938_s5 }
 0x362   : > { %v641_v55 = vpop.permute.xlu1 %640  ;;  %v643_v56 = vpop.permute.xlu0 %642 }
 0x363   : > { %v677_v57 = vsel %vm3547_vm3, %v592_v23, %v641_v55  ;;  %v678_v58 = vsel %vm3547_vm3, %v593_v18, %v643_v56 }
 0x364   : > { %721 = vrot.lane.b32.xlu1 %v677_v57, %s2938_s5  ;;  %723 = vrot.lane.b32.xlu0 %v678_v58, %s2938_s5 }
 0x366   : > { %v645_v59 = vpop.permute.xlu1 %644  ;;  %v647_v60 = vpop.permute.xlu0 %646 }
 0x367   : > { %v679_v61 = vsel %vm3547_vm3, %v594_v26, %v645_v59  ;;  %v680_v62 = vsel %vm3547_vm3, %v595_v30, %v647_v60 }
 0x368   : > { %725 = vrot.lane.b32.xlu1 %v679_v61, %s2938_s5  ;;  %727 = vrot.lane.b32.xlu0 %v680_v62, %s2938_s5 }
 0x36a   : > { %v649_v63 = vpop.permute.xlu1 %648 }
 0x36b   : > { %v681_v0 = vsel %vm3547_vm3, %v596_v34, %v649_v63 }
 0x36c   : > { %729 = vrot.lane.b32.xlu1 %v681_v0, %s2938_s5 }
 0x3be   : > { %v3599_v1 = vpop.permute.xlu0 %699 }
 0x3bf   : > { %747 = vrot.lane.b32.xlu0 %v3599_v1, %s2933_s30 }
 0x3c2   : > { %v3603_v2 = vpop.permute.xlu1 %701  ;;  %v3605_v3 = vpop.permute.xlu0 %703 }
 0x3c3   : > { %750 = vrot.lane.b32.xlu1 %v3603_v2, %s2933_s30  ;;  %753 = vrot.lane.b32.xlu0 %v3605_v3, %s2933_s30 }
 0x3c6   : > { %v3611_v4 = vpop.permute.xlu1 %705  ;;  %v3613_v5 = vpop.permute.xlu0 %707 }
 0x3c7   : > { %756 = vrot.lane.b32.xlu1 %v3611_v4, %s2933_s30  ;;  %759 = vrot.lane.b32.xlu0 %v3613_v5, %s2933_s30 }
 0x3ca   : > { %v3619_v6 = vpop.permute.xlu1 %709  ;;  %v3621_v7 = vpop.permute.xlu0 %711 }
 0x3cb   : > { %762 = vrot.lane.b32.xlu1 %v3619_v6, %s2933_s30  ;;  %765 = vrot.lane.b32.xlu0 %v3621_v7, %s2933_s30 }
 0x3ce   : > { %v3627_v8 = vpop.permute.xlu1 %713  ;;  %v3629_v9 = vpop.permute.xlu0 %715 }
 0x3cf   : > { %768 = vrot.lane.b32.xlu1 %v3627_v8, %s2933_s30  ;;  %771 = vrot.lane.b32.xlu0 %v3629_v9, %s2933_s30 }
 0x3d2   : > { %v3635_v10 = vpop.permute.xlu1 %717  ;;  %v3637_v11 = vpop.permute.xlu0 %719 }
 0x3d3   : > { %774 = vrot.lane.b32.xlu1 %v3635_v10, %s2933_s30  ;;  %777 = vrot.lane.b32.xlu0 %v3637_v11, %s2933_s30 }
 0x3d6   : > { %v3643_v12 = vpop.permute.xlu1 %721  ;;  %v3645_v13 = vpop.permute.xlu0 %723 }
 0x3d7   : > { %780 = vrot.lane.b32.xlu1 %v3643_v12, %s2933_s30  ;;  %783 = vrot.lane.b32.xlu0 %v3645_v13, %s2933_s30 }
 0x3da   : > { %v3651_v14 = vpop.permute.xlu1 %725  ;;  %v3653_v15 = vpop.permute.xlu0 %727 }
 0x3db   : > { %786 = vrot.lane.b32.xlu1 %v3651_v14, %s2933_s30  ;;  %789 = vrot.lane.b32.xlu0 %v3653_v15, %s2933_s30 }
 0x3de   : > { %v3659_v36 = vpop.permute.xlu1 %729 }
 0x3df   : > { %792 = vrot.lane.b32.xlu1 %v3659_v36, %s2933_s30 }
 0x431   : > { %v748_v16 = vpop.permute.xlu0 %747 }
 0x432   : > { %v749_v24 = vsel %vm248_vm1, %v748_v16, %v3599_v1 }
 0x433   : > { %795 = vrot.lane.b32.xlu0 %v749_v24, %s2933_s30 }
 0x435   : > { %v751_v17 = vpop.permute.xlu1 %750  ;;  %v754_v37 = vpop.permute.xlu0 %753 }
 0x436   : > { %v752_v18 = vsel %vm248_vm1, %v751_v17, %v3603_v2  ;;  %v755_v23 = vsel %vm248_vm1, %v754_v37, %v3605_v3 }
 0x437   : > { %797 = vrot.lane.b32.xlu1 %v752_v18, %s2933_s30  ;;  %799 = vrot.lane.b32.xlu0 %v755_v23, %s2933_s30 }
 0x439   : > { %v757_v20 = vpop.permute.xlu1 %756  ;;  %v760_v38 = vpop.permute.xlu0 %759 }
 0x43a   : > { %v758_v30 = vsel %vm248_vm1, %v757_v20, %v3611_v4  ;;  %v761_v26 = vsel %vm248_vm1, %v760_v38, %v3613_v5 }
 0x43b   : > { %801 = vrot.lane.b32.xlu1 %v758_v30, %s2933_s30  ;;  %803 = vrot.lane.b32.xlu0 %v761_v26, %s2933_s30 }
 0x43d   : > { %v763_v19 = vpop.permute.xlu1 %762  ;;  %v766_v34 = vpop.permute.xlu0 %765 }
 0x43e   : > { %v764_v39 = vsel %vm248_vm1, %v763_v19, %v3619_v6  ;;  %v767_v25 = vsel %vm248_vm1, %v766_v34, %v3621_v7 }
 0x43f   : > { %805 = vrot.lane.b32.xlu1 %v764_v39, %s2933_s30  ;;  %807 = vrot.lane.b32.xlu0 %v767_v25, %s2933_s30 }
 0x441   : > { %v769_v22 = vpop.permute.xlu1 %768  ;;  %v772_v35 = vpop.permute.xlu0 %771 }
 0x442   : > { %v770_v40 = vsel %vm248_vm1, %v769_v22, %v3627_v8  ;;  %v773_v28 = vsel %vm248_vm1, %v772_v35, %v3629_v9 }
 0x443   : > { %809 = vrot.lane.b32.xlu1 %v770_v40, %s2933_s30  ;;  %811 = vrot.lane.b32.xlu0 %v773_v28, %s2933_s30 }
 0x445   : > { %v775_v21 = vpop.permute.xlu1 %774  ;;  %v778_v27 = vpop.permute.xlu0 %777 }
 0x446   : > { %v776_v41 = vsel %vm248_vm1, %v775_v21, %v3635_v10  ;;  %v779_v43 = vsel %vm248_vm1, %v778_v27, %v3637_v11 }
 0x447   : > { %813 = vrot.lane.b32.xlu1 %v776_v41, %s2933_s30  ;;  %815 = vrot.lane.b32.xlu0 %v779_v43, %s2933_s30 }
 0x449   : > { %v781_v31 = vpop.permute.xlu1 %780  ;;  %v784_v29 = vpop.permute.xlu0 %783 }
 0x44a   : > { %v782_v44 = vsel %vm248_vm1, %v781_v31, %v3643_v12  ;;  %v785_v32 = vsel %vm248_vm1, %v784_v29, %v3645_v13 }
 0x44b   : > { %817 = vrot.lane.b32.xlu1 %v782_v44, %s2933_s30  ;;  %819 = vrot.lane.b32.xlu0 %v785_v32, %s2933_s30 }
 0x44d   : > { %v787_v45 = vpop.permute.xlu1 %786  ;;  %v790_v46 = vpop.permute.xlu0 %789 }
 0x44e   : > { %v788_v47 = vsel %vm248_vm1, %v787_v45, %v3651_v14  ;;  %v791_v48 = vsel %vm248_vm1, %v790_v46, %v3653_v15 }
 0x44f   : > { %821 = vrot.lane.b32.xlu1 %v788_v47, %s2933_s30  ;;  %823 = vrot.lane.b32.xlu0 %v791_v48, %s2933_s30 }
 0x451   : > { %v793_v50 = vpop.permute.xlu1 %792 }
 0x452   : > { %v794_v51 = vsel %vm248_vm1, %v793_v50, %v3659_v36 }
 0x453   : > { %825 = vrot.lane.b32.xlu1 %v794_v51, %s2933_s30  ;;  %843 = vrot.lane.b32.xlu0 %v682_v49, %s2937_s4 }
 0x4a5   : > { %v796_v52 = vpop.permute.xlu0 %795 }
 0x4a6   : > { %v827_v53 = vsel %vm248_vm1, %v796_v52, %v3599_v1 }
 0x4a7   : > { %864 = vrot.lane.b32.xlu1 %v827_v53, %s2939_s6 }
 0x4a9   : > { %v798_v54 = vpop.permute.xlu1 %797  ;;  %v800_v55 = vpop.permute.xlu0 %799 }
 0x4aa   : > { %v828_v33 = vsel %vm248_vm1, %v798_v54, %v3603_v2  ;;  %v829_v56 = vsel %vm248_vm1, %v800_v55, %v3605_v3 }
 0x4ab   : > { %866 = vrot.lane.b32.xlu0 %v828_v33, %s2939_s6  ;;  %868 = vrot.lane.b32.xlu1 %v829_v56, %s2939_s6 }
 0x4ad   : > { %v802_v57 = vpop.permute.xlu1 %801  ;;  %v804_v58 = vpop.permute.xlu0 %803 }
 0x4ae   : > { %v830_v59 = vsel %vm248_vm1, %v802_v57, %v3611_v4  ;;  %v831_v60 = vsel %vm248_vm1, %v804_v58, %v3613_v5 }
 0x4af   : > { %870 = vrot.lane.b32.xlu0 %v830_v59, %s2939_s6  ;;  %872 = vrot.lane.b32.xlu1 %v831_v60, %s2939_s6 }
 0x4b1   : > { %v806_v61 = vpop.permute.xlu1 %805  ;;  %v808_v62 = vpop.permute.xlu0 %807 }
 0x4b2   : > { %v832_v63 = vsel %vm248_vm1, %v806_v61, %v3619_v6  ;;  %v833_v0 = vsel %vm248_vm1, %v808_v62, %v3621_v7 }
 0x4b3   : > { %874 = vrot.lane.b32.xlu0 %v832_v63, %s2939_s6  ;;  %876 = vrot.lane.b32.xlu1 %v833_v0, %s2939_s6 }
 0x4b5   : > { %v810_v1 = vpop.permute.xlu1 %809  ;;  %v812_v2 = vpop.permute.xlu0 %811 }
 0x4b6   : > { %v834_v3 = vsel %vm248_vm1, %v810_v1, %v3627_v8  ;;  %v835_v4 = vsel %vm248_vm1, %v812_v2, %v3629_v9 }
 0x4b7   : > { %878 = vrot.lane.b32.xlu0 %v834_v3, %s2939_s6  ;;  %880 = vrot.lane.b32.xlu1 %v835_v4, %s2939_s6 }
 0x4b9   : > { %v814_v5 = vpop.permute.xlu1 %813  ;;  %v816_v6 = vpop.permute.xlu0 %815 }
 0x4ba   : > { %v836_v7 = vsel %vm248_vm1, %v814_v5, %v3635_v10  ;;  %v837_v16 = vsel %vm248_vm1, %v816_v6, %v3637_v11 }
 0x4bb   : > { %882 = vrot.lane.b32.xlu0 %v836_v7, %s2939_s6  ;;  %884 = vrot.lane.b32.xlu1 %v837_v16, %s2939_s6 }
 0x4bd   : > { %v818_v8 = vpop.permute.xlu1 %817  ;;  %v820_v24 = vpop.permute.xlu0 %819 }
 0x4be   : > { %v838_v9 = vsel %vm248_vm1, %v818_v8, %v3643_v12  ;;  %v839_v17 = vsel %vm248_vm1, %v820_v24, %v3645_v13 }
 0x4bf   : > { %886 = vrot.lane.b32.xlu0 %v838_v9, %s2939_s6  ;;  %888 = vrot.lane.b32.xlu1 %v839_v17, %s2939_s6 }
 0x4c1   : > { %v822_v10 = vpop.permute.xlu1 %821  ;;  %v824_v37 = vpop.permute.xlu0 %823 }
 0x4c2   : > { %v840_v11 = vsel %vm248_vm1, %v822_v10, %v3651_v14  ;;  %v841_v18 = vsel %vm248_vm1, %v824_v37, %v3653_v15 }
 0x4c3   : > { %890 = vrot.lane.b32.xlu0 %v840_v11, %s2939_s6  ;;  %892 = vrot.lane.b32.xlu1 %v841_v18, %s2939_s6 }
 0x4c5   : > { %v826_v12 = vpop.permute.xlu1 %825  ;;  %v844_v23 = vpop.permute.xlu0 %843 }
 0x4c6   : > { %v842_v13 = vsel %vm248_vm1, %v826_v12, %v3659_v36  ;;  %vm3762_vm4 = vcmp.eq.s32.totalorder %v3329_v42, %v844_v23 }
 0x4c7   : > { %894 = vrot.lane.b32.xlu0 %v842_v13, %s2939_s6 }
 0x519   : > { %v865_v14 = vpop.permute.xlu1 %864 }
 0x51a   : > { %v912_v15 = vsel %vm3762_vm4, %v827_v53, %v865_v14 }
 0x51b   : > { %944 = vrot.lane.b32.xlu1 %v912_v15, %s2940_s7 }
 0x51d   : > { %v869_v38 = vpop.permute.xlu1 %868  ;;  %v867_v30 = vpop.permute.xlu0 %866 }
 0x51e   : > { %v914_v36 = vsel %vm3762_vm4, %v829_v56, %v869_v38  ;;  %v913_v26 = vsel %vm3762_vm4, %v828_v33, %v867_v30 }
 0x51f   : > { %948 = vrot.lane.b32.xlu1 %v914_v36, %s2940_s7  ;;  %946 = vrot.lane.b32.xlu0 %v913_v26, %s2940_s7 }
 0x521   : > { %v873_v42 = vpop.permute.xlu1 %872  ;;  %v871_v19 = vpop.permute.xlu0 %870 }
 0x522   : > { %v916_v34 = vsel %vm3762_vm4, %v831_v60, %v873_v42  ;;  %v915_v39 = vsel %vm3762_vm4, %v830_v59, %v871_v19 }
 0x523   : > { %952 = vrot.lane.b32.xlu1 %v916_v34, %s2940_s7  ;;  %950 = vrot.lane.b32.xlu0 %v915_v39, %s2940_s7 }
 0x525   : > { %v877_v25 = vpop.permute.xlu1 %876  ;;  %v875_v22 = vpop.permute.xlu0 %874 }
 0x526   : > { %v918_v35 = vsel %vm3762_vm4, %v833_v0, %v877_v25  ;;  %v917_v40 = vsel %vm3762_vm4, %v832_v63, %v875_v22 }
 0x527   : > { %956 = vrot.lane.b32.xlu1 %v918_v35, %s2940_s7  ;;  %954 = vrot.lane.b32.xlu0 %v917_v40, %s2940_s7 }
 0x529   : > { %v881_v28 = vpop.permute.xlu1 %880  ;;  %v879_v21 = vpop.permute.xlu0 %878 }
 0x52a   : > { %v920_v27 = vsel %vm3762_vm4, %v835_v4, %v881_v28  ;;  %v919_v41 = vsel %vm3762_vm4, %v834_v3, %v879_v21 }
 0x52b   : > { %960 = vrot.lane.b32.xlu1 %v920_v27, %s2940_s7  ;;  %958 = vrot.lane.b32.xlu0 %v919_v41, %s2940_s7 }
 0x52d   : > { %v885_v43 = vpop.permute.xlu1 %884  ;;  %v883_v31 = vpop.permute.xlu0 %882 }
 0x52e   : > { %v922_v29 = vsel %vm3762_vm4, %v837_v16, %v885_v43  ;;  %v921_v44 = vsel %vm3762_vm4, %v836_v7, %v883_v31 }
 0x52f   : > { %964 = vrot.lane.b32.xlu1 %v922_v29, %s2940_s7  ;;  %962 = vrot.lane.b32.xlu0 %v921_v44, %s2940_s7 }
 0x531   : > { %v889_v32 = vpop.permute.xlu1 %888  ;;  %v887_v45 = vpop.permute.xlu0 %886 }
 0x532   : > { %v924_v46 = vsel %vm3762_vm4, %v839_v17, %v889_v32  ;;  %v923_v47 = vsel %vm3762_vm4, %v838_v9, %v887_v45 }
 0x533   : > { %968 = vrot.lane.b32.xlu1 %v924_v46, %s2940_s7  ;;  %966 = vrot.lane.b32.xlu0 %v923_v47, %s2940_s7 }
 0x535   : > { %v893_v48 = vpop.permute.xlu1 %892  ;;  %v891_v49 = vpop.permute.xlu0 %890 }
 0x536   : > { %v926_v50 = vsel %vm3762_vm4, %v841_v18, %v893_v48  ;;  %v925_v51 = vsel %vm3762_vm4, %v840_v11, %v891_v49 }
 0x537   : > { %972 = vrot.lane.b32.xlu1 %v926_v50, %s2940_s7  ;;  %970 = vrot.lane.b32.xlu0 %v925_v51, %s2940_s7 }
 0x539   : > { %v895_v52 = vpop.permute.xlu0 %894 }
 0x53a   : > { %v927_v53 = vsel %vm3762_vm4, %v842_v13, %v895_v52 }
 0x53b   : > { %974 = vrot.lane.b32.xlu0 %v927_v53, %s2940_s7 }
 0x58d   : > { %v3814_v54 = vpop.permute.xlu1 %944 }
 0x58e   : > { %992 = vrot.lane.b32.xlu1 %v3814_v54, %s2933_s30 }
 0x591   : > { %v3818_v55 = vpop.permute.xlu1 %948  ;;  %v3820_v33 = vpop.permute.xlu0 %946 }
 0x592   : > { %998 = vrot.lane.b32.xlu1 %v3818_v55, %s2933_s30  ;;  %995 = vrot.lane.b32.xlu0 %v3820_v33, %s2933_s30 }
 0x595   : > { %v3826_v56 = vpop.permute.xlu1 %952  ;;  %v3828_v57 = vpop.permute.xlu0 %950 }
 0x596   : > { %1004 = vrot.lane.b32.xlu1 %v3826_v56, %s2933_s30  ;;  %1001 = vrot.lane.b32.xlu0 %v3828_v57, %s2933_s30 }
 0x599   : > { %v3834_v58 = vpop.permute.xlu1 %956  ;;  %v3836_v59 = vpop.permute.xlu0 %954 }
 0x59a   : > { %1010 = vrot.lane.b32.xlu1 %v3834_v58, %s2933_s30  ;;  %1007 = vrot.lane.b32.xlu0 %v3836_v59, %s2933_s30 }
 0x59d   : > { %v3842_v60 = vpop.permute.xlu1 %960  ;;  %v3844_v61 = vpop.permute.xlu0 %958 }
 0x59e   : > { %1016 = vrot.lane.b32.xlu1 %v3842_v60, %s2933_s30  ;;  %1013 = vrot.lane.b32.xlu0 %v3844_v61, %s2933_s30 }
 0x5a1   : > { %v3850_v62 = vpop.permute.xlu1 %964  ;;  %v3852_v63 = vpop.permute.xlu0 %962 }
 0x5a2   : > { %1022 = vrot.lane.b32.xlu1 %v3850_v62, %s2933_s30  ;;  %1019 = vrot.lane.b32.xlu0 %v3852_v63, %s2933_s30 }
 0x5a5   : > { %v3858_v0 = vpop.permute.xlu1 %968  ;;  %v3860_v1 = vpop.permute.xlu0 %966 }
 0x5a6   : > { %1028 = vrot.lane.b32.xlu1 %v3858_v0, %s2933_s30  ;;  %1025 = vrot.lane.b32.xlu0 %v3860_v1, %s2933_s30 }
 0x5a9   : > { %v3866_v2 = vpop.permute.xlu1 %972  ;;  %v3868_v3 = vpop.permute.xlu0 %970 }
 0x5aa   : > { %1034 = vrot.lane.b32.xlu1 %v3866_v2, %s2933_s30  ;;  %1031 = vrot.lane.b32.xlu0 %v3868_v3, %s2933_s30 }
 0x5ad   : > { %v3874_v4 = vpop.permute.xlu0 %974 }
 0x5ae   : > { %1037 = vrot.lane.b32.xlu0 %v3874_v4, %s2933_s30 }
 0x600   : > { %v993_v5 = vpop.permute.xlu1 %992 }
 0x601   : > { %v994_v6 = vsel %vm248_vm1, %v993_v5, %v3814_v54 }
 0x602   : > { %1040 = vrot.lane.b32.xlu1 %v994_v6, %s2933_s30 }
 0x604   : > { %v999_v7 = vpop.permute.xlu1 %998  ;;  %v996_v16 = vpop.permute.xlu0 %995 }
 0x605   : > { %v1000_v8 = vsel %vm248_vm1, %v999_v7, %v3818_v55  ;;  %v997_v24 = vsel %vm248_vm1, %v996_v16, %v3820_v33 }
 0x606   : > { %1044 = vrot.lane.b32.xlu1 %v1000_v8, %s2933_s30  ;;  %1042 = vrot.lane.b32.xlu0 %v997_v24, %s2933_s30 }
 0x608   : > { %v1005_v9 = vpop.permute.xlu1 %1004  ;;  %v1002_v17 = vpop.permute.xlu0 %1001 }
 0x609   : > { %v1006_v10 = vsel %vm248_vm1, %v1005_v9, %v3826_v56  ;;  %v1003_v37 = vsel %vm248_vm1, %v1002_v17, %v3828_v57 }
 0x60a   : > { %1048 = vrot.lane.b32.xlu1 %v1006_v10, %s2933_s30  ;;  %1046 = vrot.lane.b32.xlu0 %v1003_v37, %s2933_s30 }
 0x60c   : > { %v1011_v11 = vpop.permute.xlu1 %1010  ;;  %v1008_v18 = vpop.permute.xlu0 %1007 }
 0x60d   : > { %v1012_v12 = vsel %vm248_vm1, %v1011_v11, %v3834_v58  ;;  %v1009_v13 = vsel %vm248_vm1, %v1008_v18, %v3836_v59 }
 0x60e   : > { %1052 = vrot.lane.b32.xlu1 %v1012_v12, %s2933_s30  ;;  %1050 = vrot.lane.b32.xlu0 %v1009_v13, %s2933_s30 }
 0x610   : > { %v1017_v23 = vpop.permute.xlu1 %1016  ;;  %v1014_v20 = vpop.permute.xlu0 %1013 }
 0x611   : > { %v1018_v14 = vsel %vm248_vm1, %v1017_v23, %v3842_v60  ;;  %v1015_v15 = vsel %vm248_vm1, %v1014_v20, %v3844_v61 }
 0x612   : > { %1056 = vrot.lane.b32.xlu1 %v1018_v14, %s2933_s30  ;;  %1054 = vrot.lane.b32.xlu0 %v1015_v15, %s2933_s30 }
 0x614   : > { %v1023_v38 = vpop.permute.xlu1 %1022  ;;  %v1020_v30 = vpop.permute.xlu0 %1019 }
 0x615   : > { %v1024_v36 = vsel %vm248_vm1, %v1023_v38, %v3850_v62  ;;  %v1021_v26 = vsel %vm248_vm1, %v1020_v30, %v3852_v63 }
 0x616   : > { %1060 = vrot.lane.b32.xlu1 %v1024_v36, %s2933_s30  ;;  %1058 = vrot.lane.b32.xlu0 %v1021_v26, %s2933_s30 }
 0x618   : > { %v1029_v42 = vpop.permute.xlu1 %1028  ;;  %v1026_v19 = vpop.permute.xlu0 %1025 }
 0x619   : > { %v1030_v34 = vsel %vm248_vm1, %v1029_v42, %v3858_v0  ;;  %v1027_v39 = vsel %vm248_vm1, %v1026_v19, %v3860_v1 }
 0x61a   : > { %1064 = vrot.lane.b32.xlu1 %v1030_v34, %s2933_s30  ;;  %1062 = vrot.lane.b32.xlu0 %v1027_v39, %s2933_s30 }
 0x61c   : > { %v1035_v25 = vpop.permute.xlu1 %1034  ;;  %v1032_v22 = vpop.permute.xlu0 %1031 }
 0x61d   : > { %v1036_v35 = vsel %vm248_vm1, %v1035_v25, %v3866_v2  ;;  %v1033_v40 = vsel %vm248_vm1, %v1032_v22, %v3868_v3 }
 0x61e   : > { %1068 = vrot.lane.b32.xlu1 %v1036_v35, %s2933_s30  ;;  %1066 = vrot.lane.b32.xlu0 %v1033_v40, %s2933_s30 }
 0x620   : > { %v1038_v28 = vpop.permute.xlu0 %1037 }
 0x621   : > { %v1039_v21 = vsel %vm248_vm1, %v1038_v28, %v3874_v4 }
 0x622   : > { %1070 = vrot.lane.b32.xlu0 %v1039_v21, %s2933_s30 }
 0x674   : > { %v1041_v27 = vpop.permute.xlu1 %1040 }
 0x675   : > { %v1072_v41 = vsel %vm248_vm1, %v1041_v27, %v3814_v54 }
 0x676   : > { %1104 = vrot.lane.b32.xlu1 %v1072_v41, %s2941_s8 }
 0x678   : > { %v1045_v43 = vpop.permute.xlu1 %1044  ;;  %v1043_v31 = vpop.permute.xlu0 %1042 }
 0x679   : > { %v1074_v29 = vsel %vm248_vm1, %v1045_v43, %v3818_v55  ;;  %v1073_v44 = vsel %vm248_vm1, %v1043_v31, %v3820_v33 }
 0x67a   : > { %1108 = vrot.lane.b32.xlu1 %v1074_v29, %s2941_s8  ;;  %1106 = vrot.lane.b32.xlu0 %v1073_v44, %s2941_s8 }
 0x67c   : > { %v1049_v32 = vpop.permute.xlu1 %1048  ;;  %v1047_v45 = vpop.permute.xlu0 %1046 }
 0x67d   : > { %v1076_v46 = vsel %vm248_vm1, %v1049_v32, %v3826_v56  ;;  %v1075_v47 = vsel %vm248_vm1, %v1047_v45, %v3828_v57 }
 0x67e   : > { %1112 = vrot.lane.b32.xlu1 %v1076_v46, %s2941_s8  ;;  %1110 = vrot.lane.b32.xlu0 %v1075_v47, %s2941_s8 }
 0x680   : > { %v1053_v48 = vpop.permute.xlu1 %1052  ;;  %v1051_v49 = vpop.permute.xlu0 %1050 }
 0x681   : > { %v1078_v50 = vsel %vm248_vm1, %v1053_v48, %v3834_v58  ;;  %v1077_v51 = vsel %vm248_vm1, %v1051_v49, %v3836_v59 }
 0x682   : > { %1116 = vrot.lane.b32.xlu1 %v1078_v50, %s2941_s8  ;;  %1114 = vrot.lane.b32.xlu0 %v1077_v51, %s2941_s8 }
 0x684   : > { %v1057_v52 = vpop.permute.xlu1 %1056  ;;  %v1055_v53 = vpop.permute.xlu0 %1054 }
 0x685   : > { %v1080_v54 = vsel %vm248_vm1, %v1057_v52, %v3842_v60  ;;  %v1079_v55 = vsel %vm248_vm1, %v1055_v53, %v3844_v61 }
 0x686   : > { %1120 = vrot.lane.b32.xlu1 %v1080_v54, %s2941_s8  ;;  %1118 = vrot.lane.b32.xlu0 %v1079_v55, %s2941_s8 }
 0x688   : > { %v1061_v33 = vpop.permute.xlu1 %1060  ;;  %v1059_v56 = vpop.permute.xlu0 %1058 }
 0x689   : > { %v1082_v57 = vsel %vm248_vm1, %v1061_v33, %v3850_v62  ;;  %v1081_v58 = vsel %vm248_vm1, %v1059_v56, %v3852_v63 }
 0x68a   : > { %1124 = vrot.lane.b32.xlu1 %v1082_v57, %s2941_s8  ;;  %1122 = vrot.lane.b32.xlu0 %v1081_v58, %s2941_s8 }
 0x68c   : > { %v1065_v59 = vpop.permute.xlu1 %1064  ;;  %v1063_v60 = vpop.permute.xlu0 %1062 }
 0x68d   : > { %v1084_v61 = vsel %vm248_vm1, %v1065_v59, %v3858_v0  ;;  %v1083_v5 = vsel %vm248_vm1, %v1063_v60, %v3860_v1 }
 0x68e   : > { %1128 = vrot.lane.b32.xlu1 %v1084_v61, %s2941_s8  ;;  %1126 = vrot.lane.b32.xlu0 %v1083_v5, %s2941_s8 }
 0x690   : > { %v1069_v62 = vpop.permute.xlu1 %1068  ;;  %v1067_v63 = vpop.permute.xlu0 %1066 }
 0x691   : > { %v1086_v6 = vsel %vm248_vm1, %v1069_v62, %v3866_v2  ;;  %v1085_v7 = vsel %vm248_vm1, %v1067_v63, %v3868_v3 }
 0x692   : > { %1132 = vrot.lane.b32.xlu1 %v1086_v6, %s2941_s8  ;;  %1130 = vrot.lane.b32.xlu0 %v1085_v7, %s2941_s8 }
 0x694   : > { %v1071_v0 = vpop.permute.xlu0 %1070 }
 0x695   : > { %v1087_v1 = vsel %vm248_vm1, %v1071_v0, %v3874_v4 }
 0x696   : > { %1134 = vrot.lane.b32.xlu0 %v1087_v1, %s2941_s8 }
 0x6e8   : > { %v1105_v16 = vpop.permute.xlu1 %1104 }
 0x6e9   : > { %1153 = vst.msk [vmem:[%s3027_s25] sm:$0xff] %vm1152_vm5, %v1105_v16 }
 0x6ec   : > { %v1109_v2 = vpop.permute.xlu1 %1108  ;;  %v1107_v3 = vpop.permute.xlu0 %1106 }
 0x6ed   : > { %1155 = vst.msk [vmem:[%s3027_s25 + $0x10] sm:$0xff] %vm1152_vm5, %v1109_v2  ;;  %1154 = vst.msk [vmem:[%s3027_s25 + $0x8] sm:$0xff] %vm1152_vm5, %v1107_v3 }
 0x6f0   : > { %v1113_v8 = vpop.permute.xlu1 %1112  ;;  %v1111_v24 = vpop.permute.xlu0 %1110 }
 0x6f1   : > { %1157 = vst.msk [vmem:[%s3027_s25 + $0x20] sm:$0xff] %vm1152_vm5, %v1113_v8  ;;  %1156 = vst.msk [vmem:[%s3027_s25 + $0x18] sm:$0xff] %vm1152_vm5, %v1111_v24 }
 0x6f4   : > { %v1117_v4 = vpop.permute.xlu1 %1116  ;;  %v1115_v9 = vpop.permute.xlu0 %1114 }
 0x6f5   : > { %1159 = vst.msk [vmem:[%s3027_s25 + $0x30] sm:$0xff] %vm1152_vm5, %v1117_v4  ;;  %1158 = vst.msk [vmem:[%s3027_s25 + $0x28] sm:$0xff] %vm1152_vm5, %v1115_v9 }
 0x6f8   : > { %v1121_v17 = vpop.permute.xlu1 %1120  ;;  %v1119_v10 = vpop.permute.xlu0 %1118 }
 0x6f9   : > { %1161 = vst.msk [vmem:[%s3027_s25 + $0x40] sm:$0xff] %vm1152_vm5, %v1121_v17  ;;  %1160 = vst.msk [vmem:[%s3027_s25 + $0x38] sm:$0xff] %vm1152_vm5, %v1119_v10 }
 0x6fc   : > { %v1125_v37 = vpop.permute.xlu1 %1124  ;;  %v1123_v11 = vpop.permute.xlu0 %1122 }
 0x6fd   : > { %1163 = vst.msk [vmem:[%s3027_s25 + $0x50] sm:$0xff] %vm1152_vm5, %v1125_v37  ;;  %1162 = vst.msk [vmem:[%s3027_s25 + $0x48] sm:$0xff] %vm1152_vm5, %v1123_v11 }
 0x700   : > { %v1129_v18 = vpop.permute.xlu1 %1128  ;;  %v1127_v12 = vpop.permute.xlu0 %1126 }
 0x701   : > { %1165 = vst.msk [vmem:[%s3027_s25 + $0x60] sm:$0xff] %vm1152_vm5, %v1129_v18  ;;  %1164 = vst.msk [vmem:[%s3027_s25 + $0x58] sm:$0xff] %vm1152_vm5, %v1127_v12 }
 0x704   : > { %v1133_v13 = vpop.permute.xlu1 %1132  ;;  %v1131_v23 = vpop.permute.xlu0 %1130 }
 0x705   : > { %1167 = vst.msk [vmem:[%s3027_s25 + $0x70] sm:$0xff] %vm1152_vm5, %v1133_v13  ;;  %1166 = vst.msk [vmem:[%s3027_s25 + $0x68] sm:$0xff] %vm1152_vm5, %v1131_v23 }
 0x708   : > { %v1135_v20 = vpop.permute.xlu0 %1134 }
 0x709   : > { %1168 = vst.msk [vmem:[%s3027_s25 + $0x78] sm:$0xff] %vm1152_vm5, %v1135_v20 }
 0x70a PF: > { %p2768_p13 = scmp.ne.s32.totalorder %s2923_s12, 2 }
 0x70b   : > { %v4010_v14 = vld [vmem:[%s5710_s0] sm:$0xff] (!%p2768_p13)  ;;  %v4015_v15 = vld [vmem:[%s5710_s0 + $0x10] sm:$0xff] (!%p2768_p13)  ;;  %s2942_s20 = smov (!%p2768_p13), 16   ;;  %v4024_v38 = vld [vmem:[%s5710_s0 + $0x8] sm:$0xff] (!%p2768_p13)  ;;  %v1189_v28 = vlaneseq (!%p2768_p13)  ;;  %vm1192_vm6 = vcmask (!%p2768_p13), 1047680   ;;  %s2943_s16 = smov (!%p2768_p13), 15  }
 0x70c   : > { %1172 = sbr.rel (%p2768_p13) target bundleno = 3602 (0xe12), region = 40  ;;  %1193 = vrot.lane.b32.xlu0 (!%p2768_p13), %v4010_v14, %s2942_s20  ;;  %1199 = vrot.lane.b32.xlu1 (!%p2768_p13), %v4015_v15, %s2942_s20  ;;  %v4029_v30 = vld [vmem:[%s5710_s0 + $0x18] sm:$0xff] (!%p2768_p13)  ;;  %v4038_v36 = vld [vmem:[%s5710_s0 + $0x20] sm:$0xff] (!%p2768_p13)  ;;  %s2944_s18 = smov (!%p2768_p13), 14   ;;  %vm2348_vm5 = vcmask (!%p2768_p13), 130048  }
 0x70d   : > { %v4043_v26 = vld [vmem:[%s5710_s0 + $0x28] sm:$0xff] (!%p2768_p13)  ;;  %v4052_v42 = vld [vmem:[%s5710_s0 + $0x30] sm:$0xff] (!%p2768_p13)  ;;  %v4057_v19 = vld [vmem:[%s5710_s0 + $0x38] sm:$0xff] (!%p2768_p13)  ;;  %v4120_v41 = vand.u32 (!%p2768_p13), 127, %v1189_v28  ;;  %s2945_s24 = smov (!%p2768_p13), 113   ;;  %s2946_s26 = smov (!%p2768_p13), 12  }
 0x70e   : > { %v4066_v34 = vld [vmem:[%s5710_s0 + $0x40] sm:$0xff] (!%p2768_p13)  ;;  %v4071_v39 = vld [vmem:[%s5710_s0 + $0x48] sm:$0xff] (!%p2768_p13)  ;;  %v4080_v25 = vld [vmem:[%s5710_s0 + $0x50] sm:$0xff] (!%p2768_p13)  ;;  %s2947_s27 = smov (!%p2768_p13), 114   ;;  %s2948_s28 = smov (!%p2768_p13), 8  }
 0x70f   : > { %v4085_v22 = vld [vmem:[%s5710_s0 + $0x58] sm:$0xff] (!%p2768_p13)  ;;  %v4094_v35 = vld [vmem:[%s5710_s0 + $0x60] sm:$0xff] (!%p2768_p13)  ;;  %v4099_v40 = vld [vmem:[%s5710_s0 + $0x68] sm:$0xff] (!%p2768_p13)  ;;  %v1191_v24 = vxor.u32 (!%p2768_p13), 1, %v4120_v41  ;;  %s2949_s29 = smov (!%p2768_p13), 116   ;;  %s2950_s3 = smov (!%p2768_p13), 120  }
 0x710   : > { %1196 = vrot.lane.b32.xlu0 (!%p2768_p13), %v4024_v38, %s2942_s20  ;;  %1202 = vrot.lane.b32.xlu1 (!%p2768_p13), %v4029_v30, %s2942_s20  ;;  %v4108_v21 = vld [vmem:[%s5710_s0 + $0x70] sm:$0xff] (!%p2768_p13)  ;;  %v4113_v27 = vld [vmem:[%s5710_s0 + $0x78] sm:$0xff] (!%p2768_p13) }
 0x714   : > { %1205 = vrot.lane.b32.xlu0 %v4038_v36, %s2942_s20  ;;  %1208 = vrot.lane.b32.xlu1 %v4043_v26, %s2942_s20 }
 0x718   : > { %1211 = vrot.lane.b32.xlu0 %v4052_v42, %s2942_s20  ;;  %1214 = vrot.lane.b32.xlu1 %v4057_v19, %s2942_s20 }
 0x71c   : > { %1217 = vrot.lane.b32.xlu0 %v4066_v34, %s2942_s20  ;;  %1220 = vrot.lane.b32.xlu1 %v4071_v39, %s2942_s20 }
 0x720   : > { %1223 = vrot.lane.b32.xlu0 %v4080_v25, %s2942_s20  ;;  %1226 = vrot.lane.b32.xlu1 %v4085_v22, %s2942_s20 }
 0x724   : > { %1229 = vrot.lane.b32.xlu0 %v4094_v35, %s2942_s20  ;;  %1232 = vrot.lane.b32.xlu1 %v4099_v40, %s2942_s20 }
 0x728   : > { %1235 = vrot.lane.b32.xlu0 %v4108_v21, %s2942_s20  ;;  %1238 = vrot.lane.b32.xlu1 %v4113_v27, %s2942_s20 }
 0x72c   : > { %1289 = vrot.lane.b32.xlu0 %v4120_v41, %s2942_s20 }
 0x77e   : > { %v1194_v43 = vpop.permute.xlu0 %1193  ;;  %v1200_v31 = vpop.permute.xlu1 %1199 }
 0x77f   : > { %v1195_v29 = vsel %vm1192_vm6, %v1194_v43, %v4010_v14  ;;  %v1201_v44 = vsel %vm1192_vm6, %v1200_v31, %v4015_v15 }
 0x780   : > { %1241 = vrot.lane.b32.xlu1 %v1195_v29, %s2942_s20 }
 0x782   : > { %v1197_v32 = vpop.permute.xlu0 %1196  ;;  %v1203_v45 = vpop.permute.xlu1 %1202 }
 0x783   : > { %v1198_v46 = vsel %vm1192_vm6, %v1197_v32, %v4024_v38  ;;  %v1204_v47 = vsel %vm1192_vm6, %v1203_v45, %v4029_v30 }
 0x784   : > { %1245 = vrot.lane.b32.xlu1 %v1201_v44, %s2942_s20  ;;  %1243 = vrot.lane.b32.xlu0 %v1198_v46, %s2942_s20 }
 0x786   : > { %v1206_v48 = vpop.permute.xlu0 %1205  ;;  %v1209_v49 = vpop.permute.xlu1 %1208 }
 0x787   : > { %v1207_v50 = vsel %vm1192_vm6, %v1206_v48, %v4038_v36  ;;  %v1210_v51 = vsel %vm1192_vm6, %v1209_v49, %v4043_v26 }
 0x788   : > { %1247 = vrot.lane.b32.xlu0 %v1204_v47, %s2942_s20  ;;  %1249 = vrot.lane.b32.xlu1 %v1207_v50, %s2942_s20 }
 0x78a   : > { %v1212_v52 = vpop.permute.xlu0 %1211  ;;  %v1215_v53 = vpop.permute.xlu1 %1214 }
 0x78b   : > { %v1213_v54 = vsel %vm1192_vm6, %v1212_v52, %v4052_v42  ;;  %v1216_v55 = vsel %vm1192_vm6, %v1215_v53, %v4057_v19 }
 0x78c   : > { %1251 = vrot.lane.b32.xlu0 %v1210_v51, %s2942_s20  ;;  %1253 = vrot.lane.b32.xlu1 %v1213_v54, %s2942_s20 }
 0x78e   : > { %v1218_v33 = vpop.permute.xlu0 %1217  ;;  %v1221_v56 = vpop.permute.xlu1 %1220 }
 0x78f   : > { %v1219_v57 = vsel %vm1192_vm6, %v1218_v33, %v4066_v34  ;;  %v1222_v58 = vsel %vm1192_vm6, %v1221_v56, %v4071_v39 }
 0x790   : > { %1255 = vrot.lane.b32.xlu0 %v1216_v55, %s2942_s20  ;;  %1257 = vrot.lane.b32.xlu1 %v1219_v57, %s2942_s20 }
 0x792   : > { %v1224_v59 = vpop.permute.xlu0 %1223  ;;  %v1227_v60 = vpop.permute.xlu1 %1226 }
 0x793   : > { %v1225_v61 = vsel %vm1192_vm6, %v1224_v59, %v4080_v25  ;;  %v1228_v5 = vsel %vm1192_vm6, %v1227_v60, %v4085_v22 }
 0x794   : > { %1259 = vrot.lane.b32.xlu0 %v1222_v58, %s2942_s20  ;;  %1261 = vrot.lane.b32.xlu1 %v1225_v61, %s2942_s20 }
 0x796   : > { %v1230_v62 = vpop.permute.xlu0 %1229  ;;  %v1233_v63 = vpop.permute.xlu1 %1232 }
 0x797   : > { %v1231_v6 = vsel %vm1192_vm6, %v1230_v62, %v4094_v35  ;;  %v1234_v7 = vsel %vm1192_vm6, %v1233_v63, %v4099_v40 }
 0x798   : > { %1263 = vrot.lane.b32.xlu0 %v1228_v5, %s2942_s20  ;;  %1265 = vrot.lane.b32.xlu1 %v1231_v6, %s2942_s20 }
 0x79a   : > { %v1236_v0 = vpop.permute.xlu0 %1235  ;;  %v1239_v1 = vpop.permute.xlu1 %1238 }
 0x79b   : > { %v1237_v16 = vsel %vm1192_vm6, %v1236_v0, %v4108_v21  ;;  %v1240_v2 = vsel %vm1192_vm6, %v1239_v1, %v4113_v27 }
 0x79c   : > { %1267 = vrot.lane.b32.xlu0 %v1234_v7, %s2942_s20  ;;  %1269 = vrot.lane.b32.xlu1 %v1237_v16, %s2942_s20 }
 0x79e   : > { %v1290_v3 = vpop.permute.xlu0 %1289 }
 0x79f   : > { %v1291_v8 = vsel %vm1192_vm6, %v1290_v3, %v4120_v41 }
 0x7a0   : > { %1271 = vrot.lane.b32.xlu0 %v1240_v2, %s2942_s20  ;;  %1292 = vrot.lane.b32.xlu1 %v1291_v8, %s2942_s20 }
 0x7a4   : > { %1295 = vrot.lane.b32.xlu0 %v1191_v24, %s2943_s16 }
 0x7f2   : > { %v1242_v4 = vpop.permute.xlu1 %1241 }
 0x7f3   : > { %v1273_v9 = vsel %vm1192_vm6, %v1242_v4, %v4010_v14 }
 0x7f4   : > { %1316 = vrot.lane.b32.xlu1 %v1273_v9, %s2944_s18 }
 0x7f6   : > { %v1246_v17 = vpop.permute.xlu1 %1245  ;;  %v1244_v10 = vpop.permute.xlu0 %1243 }
 0x7f7   : > { %v1275_v37 = vsel %vm1192_vm6, %v1246_v17, %v4015_v15  ;;  %v1274_v11 = vsel %vm1192_vm6, %v1244_v10, %v4024_v38 }
 0x7f8   : > { %1320 = vrot.lane.b32.xlu1 %v1275_v37, %s2944_s18  ;;  %1318 = vrot.lane.b32.xlu0 %v1274_v11, %s2944_s18 }
 0x7fa   : > { %v1250_v18 = vpop.permute.xlu1 %1249  ;;  %v1248_v12 = vpop.permute.xlu0 %1247 }
 0x7fb   : > { %v1277_v13 = vsel %vm1192_vm6, %v1250_v18, %v4038_v36  ;;  %v1276_v23 = vsel %vm1192_vm6, %v1248_v12, %v4029_v30 }
 0x7fc   : > { %1324 = vrot.lane.b32.xlu1 %v1277_v13, %s2944_s18  ;;  %1322 = vrot.lane.b32.xlu0 %v1276_v23, %s2944_s18 }
 0x7fe   : > { %v1254_v20 = vpop.permute.xlu1 %1253  ;;  %v1252_v14 = vpop.permute.xlu0 %1251 }
 0x7ff   : > { %v1279_v15 = vsel %vm1192_vm6, %v1254_v20, %v4052_v42  ;;  %v1278_v38 = vsel %vm1192_vm6, %v1252_v14, %v4043_v26 }
 0x800   : > { %1328 = vrot.lane.b32.xlu1 %v1279_v15, %s2944_s18  ;;  %1326 = vrot.lane.b32.xlu0 %v1278_v38, %s2944_s18 }
 0x802   : > { %v1258_v36 = vpop.permute.xlu1 %1257  ;;  %v1256_v43 = vpop.permute.xlu0 %1255 }
 0x803   : > { %v1281_v30 = vsel %vm1192_vm6, %v1258_v36, %v4066_v34  ;;  %v1280_v31 = vsel %vm1192_vm6, %v1256_v43, %v4057_v19 }
 0x804   : > { %1332 = vrot.lane.b32.xlu1 %v1281_v30, %s2944_s18  ;;  %1330 = vrot.lane.b32.xlu0 %v1280_v31, %s2944_s18 }
 0x806   : > { %v1262_v42 = vpop.permute.xlu1 %1261  ;;  %v1260_v29 = vpop.permute.xlu0 %1259 }
 0x807   : > { %v1283_v26 = vsel %vm1192_vm6, %v1262_v42, %v4080_v25  ;;  %v1282_v44 = vsel %vm1192_vm6, %v1260_v29, %v4071_v39 }
 0x808   : > { %1336 = vrot.lane.b32.xlu1 %v1283_v26, %s2944_s18  ;;  %1334 = vrot.lane.b32.xlu0 %v1282_v44, %s2944_s18 }
 0x80a   : > { %v1266_v34 = vpop.permute.xlu1 %1265  ;;  %v1264_v32 = vpop.permute.xlu0 %1263 }
 0x80b   : > { %v1285_v19 = vsel %vm1192_vm6, %v1266_v34, %v4094_v35  ;;  %v1284_v45 = vsel %vm1192_vm6, %v1264_v32, %v4085_v22 }
 0x80c   : > { %1340 = vrot.lane.b32.xlu1 %v1285_v19, %s2944_s18  ;;  %1338 = vrot.lane.b32.xlu0 %v1284_v45, %s2944_s18 }
 0x80e   : > { %v1270_v25 = vpop.permute.xlu1 %1269  ;;  %v1268_v46 = vpop.permute.xlu0 %1267 }
 0x80f   : > { %v1287_v39 = vsel %vm1192_vm6, %v1270_v25, %v4108_v21  ;;  %v1286_v47 = vsel %vm1192_vm6, %v1268_v46, %v4099_v40 }
 0x810   : > { %1344 = vrot.lane.b32.xlu1 %v1287_v39, %s2944_s18  ;;  %1342 = vrot.lane.b32.xlu0 %v1286_v47, %s2944_s18 }
 0x812   : > { %v1272_v35 = vpop.permute.xlu0 %1271  ;;  %v1293_v48 = vpop.permute.xlu1 %1292 }
 0x813   : > { %v1288_v22 = vsel %vm1192_vm6, %v1272_v35, %v4113_v27  ;;  %v4226_v49 = vsel %vm1192_vm6, %v1293_v48, %v4120_v41 }
 0x814   : > { %1346 = vrot.lane.b32.xlu0 %v1288_v22, %s2944_s18 }
 0x816   : > { %v1296_v50 = vpop.permute.xlu0 %1295 }
 0x817   : > { %vm4229_vm7 = vcmp.eq.s32.totalorder %v4226_v49, %v1296_v50 }
 0x866   : > { %v1317_v40 = vpop.permute.xlu1 %1316 }
 0x867   : > { %v1364_v51 = vsel %vm4229_vm7, %v1273_v9, %v1317_v40 }
 0x868   : > { %1397 = vrot.lane.b32.xlu1 %v1364_v51, %s2945_s24 }
 0x86a   : > { %v1321_v27 = vpop.permute.xlu1 %1320  ;;  %v1319_v52 = vpop.permute.xlu0 %1318 }
 0x86b   : > { %v1366_v53 = vsel %vm4229_vm7, %v1275_v37, %v1321_v27  ;;  %v1365_v54 = vsel %vm4229_vm7, %v1274_v11, %v1319_v52 }
 0x86c   : > { %1401 = vrot.lane.b32.xlu1 %v1366_v53, %s2945_s24  ;;  %1399 = vrot.lane.b32.xlu0 %v1365_v54, %s2945_s24 }
 0x86e   : > { %v1325_v55 = vpop.permute.xlu1 %1324  ;;  %v1323_v33 = vpop.permute.xlu0 %1322 }
 0x86f   : > { %v1368_v56 = vsel %vm4229_vm7, %v1277_v13, %v1325_v55  ;;  %v1367_v57 = vsel %vm4229_vm7, %v1276_v23, %v1323_v33 }
 0x870   : > { %1405 = vrot.lane.b32.xlu1 %v1368_v56, %s2945_s24  ;;  %1403 = vrot.lane.b32.xlu0 %v1367_v57, %s2945_s24 }
 0x872   : > { %v1329_v58 = vpop.permute.xlu1 %1328  ;;  %v1327_v59 = vpop.permute.xlu0 %1326 }
 0x873   : > { %v1370_v60 = vsel %vm4229_vm7, %v1279_v15, %v1329_v58  ;;  %v1369_v61 = vsel %vm4229_vm7, %v1278_v38, %v1327_v59 }
 0x874   : > { %1409 = vrot.lane.b32.xlu1 %v1370_v60, %s2945_s24  ;;  %1407 = vrot.lane.b32.xlu0 %v1369_v61, %s2945_s24 }
 0x876   : > { %v1333_v5 = vpop.permute.xlu1 %1332  ;;  %v1331_v62 = vpop.permute.xlu0 %1330 }
 0x877   : > { %v1372_v63 = vsel %vm4229_vm7, %v1281_v30, %v1333_v5  ;;  %v1371_v6 = vsel %vm4229_vm7, %v1280_v31, %v1331_v62 }
 0x878   : > { %1413 = vrot.lane.b32.xlu1 %v1372_v63, %s2945_s24  ;;  %1411 = vrot.lane.b32.xlu0 %v1371_v6, %s2945_s24  ;;  %v1380_v6 = vxor.u32 2, %v4120_v41 }
 0x87a   : > { %v1337_v7 = vpop.permute.xlu1 %1336  ;;  %v1335_v0 = vpop.permute.xlu0 %1334 }
 0x87b   : > { %v1374_v1 = vsel %vm4229_vm7, %v1283_v26, %v1337_v7  ;;  %v1373_v16 = vsel %vm4229_vm7, %v1282_v44, %v1335_v0 }
 0x87c   : > { %1417 = vrot.lane.b32.xlu1 %v1374_v1, %s2945_s24  ;;  %1415 = vrot.lane.b32.xlu0 %v1373_v16, %s2945_s24 }
 0x87e   : > { %v1341_v2 = vpop.permute.xlu1 %1340  ;;  %v1339_v3 = vpop.permute.xlu0 %1338 }
 0x87f   : > { %v1376_v8 = vsel %vm4229_vm7, %v1285_v19, %v1341_v2  ;;  %v1375_v24 = vsel %vm4229_vm7, %v1284_v45, %v1339_v3 }
 0x880   : > { %1421 = vrot.lane.b32.xlu1 %v1376_v8, %s2945_s24  ;;  %1419 = vrot.lane.b32.xlu0 %v1375_v24, %s2945_s24 }
 0x882   : > { %v1345_v4 = vpop.permute.xlu1 %1344  ;;  %v1343_v9 = vpop.permute.xlu0 %1342 }
 0x883   : > { %v1378_v17 = vsel %vm4229_vm7, %v1287_v39, %v1345_v4  ;;  %v1377_v10 = vsel %vm4229_vm7, %v1286_v47, %v1343_v9 }
 0x884   : > { %1425 = vrot.lane.b32.xlu1 %v1378_v17, %s2945_s24  ;;  %1423 = vrot.lane.b32.xlu0 %v1377_v10, %s2945_s24 }
 0x886   : > { %v1347_v37 = vpop.permute.xlu0 %1346 }
 0x887   : > { %v1379_v11 = vsel %vm4229_vm7, %v1288_v22, %v1347_v37 }
 0x888   : > { %1427 = vrot.lane.b32.xlu0 %v1379_v11, %s2945_s24 }
 0x8da   : > { %v4281_v18 = vpop.permute.xlu1 %1397 }
 0x8db   : > { %1445 = vrot.lane.b32.xlu1 %v4281_v18, %s2942_s20 }
 0x8de   : > { %v4285_v12 = vpop.permute.xlu1 %1401  ;;  %v4287_v13 = vpop.permute.xlu0 %1399 }
 0x8df   : > { %1451 = vrot.lane.b32.xlu1 %v4285_v12, %s2942_s20  ;;  %1448 = vrot.lane.b32.xlu0 %v4287_v13, %s2942_s20 }
 0x8e2   : > { %v4293_v23 = vpop.permute.xlu1 %1405  ;;  %v4295_v20 = vpop.permute.xlu0 %1403 }
 0x8e3   : > { %1457 = vrot.lane.b32.xlu1 %v4293_v23, %s2942_s20  ;;  %1454 = vrot.lane.b32.xlu0 %v4295_v20, %s2942_s20 }
 0x8e6   : > { %v4301_v14 = vpop.permute.xlu1 %1409  ;;  %v4303_v15 = vpop.permute.xlu0 %1407 }
 0x8e7   : > { %1463 = vrot.lane.b32.xlu1 %v4301_v14, %s2942_s20  ;;  %1460 = vrot.lane.b32.xlu0 %v4303_v15, %s2942_s20 }
 0x8ea   : > { %v4309_v38 = vpop.permute.xlu1 %1413  ;;  %v4311_v36 = vpop.permute.xlu0 %1411 }
 0x8eb   : > { %1469 = vrot.lane.b32.xlu1 %v4309_v38, %s2942_s20  ;;  %1466 = vrot.lane.b32.xlu0 %v4311_v36, %s2942_s20 }
 0x8ee   : > { %v4317_v43 = vpop.permute.xlu1 %1417  ;;  %v4319_v30 = vpop.permute.xlu0 %1415 }
 0x8ef   : > { %1475 = vrot.lane.b32.xlu1 %v4317_v43, %s2942_s20  ;;  %1472 = vrot.lane.b32.xlu0 %v4319_v30, %s2942_s20 }
 0x8f2   : > { %v4325_v31 = vpop.permute.xlu1 %1421  ;;  %v4327_v42 = vpop.permute.xlu0 %1419 }
 0x8f3   : > { %1481 = vrot.lane.b32.xlu1 %v4325_v31, %s2942_s20  ;;  %1478 = vrot.lane.b32.xlu0 %v4327_v42, %s2942_s20 }
 0x8f6   : > { %v4333_v29 = vpop.permute.xlu1 %1425  ;;  %v4335_v26 = vpop.permute.xlu0 %1423 }
 0x8f7   : > { %1487 = vrot.lane.b32.xlu1 %v4333_v29, %s2942_s20  ;;  %1484 = vrot.lane.b32.xlu0 %v4335_v26, %s2942_s20 }
 0x8fa   : > { %v4341_v44 = vpop.permute.xlu0 %1427 }
 0x8fb   : > { %1490 = vrot.lane.b32.xlu0 %v4341_v44, %s2942_s20 }
 0x94d   : > { %v1446_v34 = vpop.permute.xlu1 %1445 }
 0x94e   : > { %v1447_v32 = vsel %vm1192_vm6, %v1446_v34, %v4281_v18 }
 0x94f   : > { %1493 = vrot.lane.b32.xlu1 %v1447_v32, %s2942_s20 }
 0x951   : > { %v1452_v19 = vpop.permute.xlu1 %1451  ;;  %v1449_v45 = vpop.permute.xlu0 %1448 }
 0x952   : > { %v1453_v25 = vsel %vm1192_vm6, %v1452_v19, %v4285_v12  ;;  %v1450_v46 = vsel %vm1192_vm6, %v1449_v45, %v4287_v13 }
 0x953   : > { %1497 = vrot.lane.b32.xlu1 %v1453_v25, %s2942_s20  ;;  %1495 = vrot.lane.b32.xlu0 %v1450_v46, %s2942_s20 }
 0x955   : > { %v1458_v39 = vpop.permute.xlu1 %1457  ;;  %v1455_v47 = vpop.permute.xlu0 %1454 }
 0x956   : > { %v1459_v35 = vsel %vm1192_vm6, %v1458_v39, %v4293_v23  ;;  %v1456_v22 = vsel %vm1192_vm6, %v1455_v47, %v4295_v20 }
 0x957   : > { %1501 = vrot.lane.b32.xlu1 %v1459_v35, %s2942_s20  ;;  %1499 = vrot.lane.b32.xlu0 %v1456_v22, %s2942_s20 }
 0x959   : > { %v1464_v48 = vpop.permute.xlu1 %1463  ;;  %v1461_v50 = vpop.permute.xlu0 %1460 }
 0x95a   : > { %v1465_v21 = vsel %vm1192_vm6, %v1464_v48, %v4301_v14  ;;  %v1462_v40 = vsel %vm1192_vm6, %v1461_v50, %v4303_v15 }
 0x95b   : > { %1505 = vrot.lane.b32.xlu1 %v1465_v21, %s2942_s20  ;;  %1503 = vrot.lane.b32.xlu0 %v1462_v40, %s2942_s20 }
 0x95d   : > { %v1470_v51 = vpop.permute.xlu1 %1469  ;;  %v1467_v27 = vpop.permute.xlu0 %1466 }
 0x95e   : > { %v1471_v52 = vsel %vm1192_vm6, %v1470_v51, %v4309_v38  ;;  %v1468_v53 = vsel %vm1192_vm6, %v1467_v27, %v4311_v36 }
 0x95f   : > { %1509 = vrot.lane.b32.xlu1 %v1471_v52, %s2942_s20  ;;  %1507 = vrot.lane.b32.xlu0 %v1468_v53, %s2942_s20 }
 0x961   : > { %v1476_v54 = vpop.permute.xlu1 %1475  ;;  %v1473_v55 = vpop.permute.xlu0 %1472 }
 0x962   : > { %v1477_v33 = vsel %vm1192_vm6, %v1476_v54, %v4317_v43  ;;  %v1474_v56 = vsel %vm1192_vm6, %v1473_v55, %v4319_v30 }
 0x963   : > { %1513 = vrot.lane.b32.xlu1 %v1477_v33, %s2942_s20  ;;  %1511 = vrot.lane.b32.xlu0 %v1474_v56, %s2942_s20 }
 0x965   : > { %v1482_v57 = vpop.permute.xlu1 %1481  ;;  %v1479_v58 = vpop.permute.xlu0 %1478 }
 0x966   : > { %v1483_v59 = vsel %vm1192_vm6, %v1482_v57, %v4325_v31  ;;  %v1480_v60 = vsel %vm1192_vm6, %v1479_v58, %v4327_v42 }
 0x967   : > { %1517 = vrot.lane.b32.xlu1 %v1483_v59, %s2942_s20  ;;  %1515 = vrot.lane.b32.xlu0 %v1480_v60, %s2942_s20 }
 0x969   : > { %v1488_v61 = vpop.permute.xlu1 %1487  ;;  %v1485_v5 = vpop.permute.xlu0 %1484 }
 0x96a   : > { %v1489_v62 = vsel %vm1192_vm6, %v1488_v61, %v4333_v29  ;;  %v1486_v63 = vsel %vm1192_vm6, %v1485_v5, %v4335_v26 }
 0x96b   : > { %1521 = vrot.lane.b32.xlu1 %v1489_v62, %s2942_s20  ;;  %1519 = vrot.lane.b32.xlu0 %v1486_v63, %s2942_s20 }
 0x96d   : > { %v1491_v7 = vpop.permute.xlu0 %1490 }
 0x96e   : > { %v1492_v0 = vsel %vm1192_vm6, %v1491_v7, %v4341_v44 }
 0x96f   : > { %1541 = vrot.lane.b32.xlu1 %v1380_v6, %s2944_s18  ;;  %1523 = vrot.lane.b32.xlu0 %v1492_v0, %s2942_s20 }
 0x9c1   : > { %v1494_v1 = vpop.permute.xlu1 %1493 }
 0x9c2   : > { %v1525_v16 = vsel %vm1192_vm6, %v1494_v1, %v4281_v18 }
 0x9c3   : > { %1562 = vrot.lane.b32.xlu0 %v1525_v16, %s2946_s26 }
 0x9c5   : > { %v1498_v2 = vpop.permute.xlu1 %1497  ;;  %v1496_v3 = vpop.permute.xlu0 %1495 }
 0x9c6   : > { %v1527_v8 = vsel %vm1192_vm6, %v1498_v2, %v4285_v12  ;;  %v1526_v24 = vsel %vm1192_vm6, %v1496_v3, %v4287_v13 }
 0x9c7   : > { %1566 = vrot.lane.b32.xlu0 %v1527_v8, %s2946_s26  ;;  %1564 = vrot.lane.b32.xlu1 %v1526_v24, %s2946_s26 }
 0x9c9   : > { %v1502_v4 = vpop.permute.xlu1 %1501  ;;  %v1500_v9 = vpop.permute.xlu0 %1499 }
 0x9ca   : > { %v1529_v17 = vsel %vm1192_vm6, %v1502_v4, %v4293_v23  ;;  %v1528_v10 = vsel %vm1192_vm6, %v1500_v9, %v4295_v20 }
 0x9cb   : > { %1570 = vrot.lane.b32.xlu0 %v1529_v17, %s2946_s26  ;;  %1568 = vrot.lane.b32.xlu1 %v1528_v10, %s2946_s26 }
 0x9cd   : > { %v1506_v37 = vpop.permute.xlu1 %1505  ;;  %v1504_v11 = vpop.permute.xlu0 %1503 }
 0x9ce   : > { %v1531_v18 = vsel %vm1192_vm6, %v1506_v37, %v4301_v14  ;;  %v1530_v12 = vsel %vm1192_vm6, %v1504_v11, %v4303_v15 }
 0x9cf   : > { %1574 = vrot.lane.b32.xlu0 %v1531_v18, %s2946_s26  ;;  %1572 = vrot.lane.b32.xlu1 %v1530_v12, %s2946_s26 }
 0x9d1   : > { %v1510_v13 = vpop.permute.xlu1 %1509  ;;  %v1508_v23 = vpop.permute.xlu0 %1507 }
 0x9d2   : > { %v1533_v20 = vsel %vm1192_vm6, %v1510_v13, %v4309_v38  ;;  %v1532_v34 = vsel %vm1192_vm6, %v1508_v23, %v4311_v36 }
 0x9d3   : > { %1578 = vrot.lane.b32.xlu0 %v1533_v20, %s2946_s26  ;;  %1576 = vrot.lane.b32.xlu1 %v1532_v34, %s2946_s26 }
 0x9d5   : > { %v1514_v14 = vpop.permute.xlu1 %1513  ;;  %v1512_v32 = vpop.permute.xlu0 %1511 }
 0x9d6   : > { %v1535_v15 = vsel %vm1192_vm6, %v1514_v14, %v4317_v43  ;;  %v1534_v19 = vsel %vm1192_vm6, %v1512_v32, %v4319_v30 }
 0x9d7   : > { %1582 = vrot.lane.b32.xlu0 %v1535_v15, %s2946_s26  ;;  %1580 = vrot.lane.b32.xlu1 %v1534_v19, %s2946_s26 }
 0x9d9   : > { %v1518_v38 = vpop.permute.xlu1 %1517  ;;  %v1516_v45 = vpop.permute.xlu0 %1515 }
 0x9da   : > { %v1537_v36 = vsel %vm1192_vm6, %v1518_v38, %v4325_v31  ;;  %v1536_v25 = vsel %vm1192_vm6, %v1516_v45, %v4327_v42 }
 0x9db   : > { %1586 = vrot.lane.b32.xlu0 %v1537_v36, %s2946_s26  ;;  %1584 = vrot.lane.b32.xlu1 %v1536_v25, %s2946_s26 }
 0x9dd   : > { %v1522_v43 = vpop.permute.xlu1 %1521  ;;  %v1520_v46 = vpop.permute.xlu0 %1519 }
 0x9de   : > { %v1539_v30 = vsel %vm1192_vm6, %v1522_v43, %v4333_v29  ;;  %v1538_v39 = vsel %vm1192_vm6, %v1520_v46, %v4335_v26 }
 0x9df   : > { %1590 = vrot.lane.b32.xlu0 %v1539_v30, %s2946_s26  ;;  %1588 = vrot.lane.b32.xlu1 %v1538_v39, %s2946_s26 }
 0x9e1   : > { %v1524_v31 = vpop.permute.xlu0 %1523  ;;  %v1542_v47 = vpop.permute.xlu1 %1541 }
 0x9e2   : > { %v1540_v42 = vsel %vm1192_vm6, %v1524_v31, %v4341_v44  ;;  %vm4444_vm8 = vcmp.eq.s32.totalorder %v4226_v49, %v1542_v47 }
 0x9e3   : > { %1592 = vrot.lane.b32.xlu1 %v1540_v42, %s2946_s26 }
 0xa35   : > { %v1563_v29 = vpop.permute.xlu0 %1562 }
 0xa36   : > { %v1610_v26 = vsel %vm4444_vm8, %v1525_v16, %v1563_v29 }
 0xa37   : > { %1643 = vrot.lane.b32.xlu0 %v1610_v26, %s2947_s27 }
 0xa39   : > { %v1565_v22 = vpop.permute.xlu1 %1564  ;;  %v1567_v48 = vpop.permute.xlu0 %1566 }
 0xa3a   : > { %v1611_v44 = vsel %vm4444_vm8, %v1526_v24, %v1565_v22  ;;  %v1612_v50 = vsel %vm4444_vm8, %v1527_v8, %v1567_v48 }
 0xa3b   : > { %1645 = vrot.lane.b32.xlu1 %v1611_v44, %s2947_s27  ;;  %1647 = vrot.lane.b32.xlu0 %v1612_v50, %s2947_s27 }
 0xa3d   : > { %v1569_v21 = vpop.permute.xlu1 %1568  ;;  %v1571_v40 = vpop.permute.xlu0 %1570 }
 0xa3e   : > { %v1613_v51 = vsel %vm4444_vm8, %v1528_v10, %v1569_v21  ;;  %v1614_v27 = vsel %vm4444_vm8, %v1529_v17, %v1571_v40 }
 0xa3f   : > { %1649 = vrot.lane.b32.xlu1 %v1613_v51, %s2947_s27  ;;  %1651 = vrot.lane.b32.xlu0 %v1614_v27, %s2947_s27 }
 0xa41   : > { %v1573_v52 = vpop.permute.xlu1 %1572  ;;  %v1575_v53 = vpop.permute.xlu0 %1574 }
 0xa42   : > { %v1615_v54 = vsel %vm4444_vm8, %v1530_v12, %v1573_v52  ;;  %v1616_v55 = vsel %vm4444_vm8, %v1531_v18, %v1575_v53 }
 0xa43   : > { %1653 = vrot.lane.b32.xlu1 %v1615_v54, %s2947_s27  ;;  %1655 = vrot.lane.b32.xlu0 %v1616_v55, %s2947_s27 }
 0xa45   : > { %v1577_v33 = vpop.permute.xlu1 %1576  ;;  %v1579_v56 = vpop.permute.xlu0 %1578 }
 0xa46   : > { %v1617_v57 = vsel %vm4444_vm8, %v1532_v34, %v1577_v33  ;;  %v1618_v58 = vsel %vm4444_vm8, %v1533_v20, %v1579_v56 }
 0xa47   : > { %1657 = vrot.lane.b32.xlu1 %v1617_v57, %s2947_s27  ;;  %1659 = vrot.lane.b32.xlu0 %v1618_v58, %s2947_s27  ;;  %v1626_v58 = vxor.u32 4, %v4120_v41 }
 0xa49   : > { %v1581_v59 = vpop.permute.xlu1 %1580  ;;  %v1583_v60 = vpop.permute.xlu0 %1582 }
 0xa4a   : > { %v1619_v61 = vsel %vm4444_vm8, %v1534_v19, %v1581_v59  ;;  %v1620_v5 = vsel %vm4444_vm8, %v1535_v15, %v1583_v60 }
 0xa4b   : > { %1661 = vrot.lane.b32.xlu1 %v1619_v61, %s2947_s27  ;;  %1663 = vrot.lane.b32.xlu0 %v1620_v5, %s2947_s27 }
 0xa4d   : > { %v1585_v62 = vpop.permute.xlu1 %1584  ;;  %v1587_v63 = vpop.permute.xlu0 %1586 }
 0xa4e   : > { %v1621_v6 = vsel %vm4444_vm8, %v1536_v25, %v1585_v62  ;;  %v1622_v7 = vsel %vm4444_vm8, %v1537_v36, %v1587_v63 }
 0xa4f   : > { %1665 = vrot.lane.b32.xlu1 %v1621_v6, %s2947_s27  ;;  %1667 = vrot.lane.b32.xlu0 %v1622_v7, %s2947_s27 }
 0xa51   : > { %v1589_v0 = vpop.permute.xlu1 %1588  ;;  %v1591_v1 = vpop.permute.xlu0 %1590 }
 0xa52   : > { %v1623_v16 = vsel %vm4444_vm8, %v1538_v39, %v1589_v0  ;;  %v1624_v2 = vsel %vm4444_vm8, %v1539_v30, %v1591_v1 }
 0xa53   : > { %1669 = vrot.lane.b32.xlu1 %v1623_v16, %s2947_s27  ;;  %1671 = vrot.lane.b32.xlu0 %v1624_v2, %s2947_s27 }
 0xa55   : > { %v1593_v3 = vpop.permute.xlu1 %1592 }
 0xa56   : > { %v1625_v8 = vsel %vm4444_vm8, %v1540_v42, %v1593_v3 }
 0xa57   : > { %1673 = vrot.lane.b32.xlu1 %v1625_v8, %s2947_s27 }
 0xaa9   : > { %v4496_v24 = vpop.permute.xlu0 %1643 }
 0xaaa   : > { %1691 = vrot.lane.b32.xlu0 %v4496_v24, %s2942_s20 }
 0xaad   : > { %v4500_v4 = vpop.permute.xlu1 %1645  ;;  %v4502_v9 = vpop.permute.xlu0 %1647 }
 0xaae   : > { %1694 = vrot.lane.b32.xlu1 %v4500_v4, %s2942_s20  ;;  %1697 = vrot.lane.b32.xlu0 %v4502_v9, %s2942_s20 }
 0xab1   : > { %v4508_v17 = vpop.permute.xlu1 %1649  ;;  %v4510_v10 = vpop.permute.xlu0 %1651 }
 0xab2   : > { %1700 = vrot.lane.b32.xlu1 %v4508_v17, %s2942_s20  ;;  %1703 = vrot.lane.b32.xlu0 %v4510_v10, %s2942_s20 }
 0xab5   : > { %v4516_v37 = vpop.permute.xlu1 %1653  ;;  %v4518_v11 = vpop.permute.xlu0 %1655 }
 0xab6   : > { %1706 = vrot.lane.b32.xlu1 %v4516_v37, %s2942_s20  ;;  %1709 = vrot.lane.b32.xlu0 %v4518_v11, %s2942_s20 }
 0xab9   : > { %v4524_v18 = vpop.permute.xlu1 %1657  ;;  %v4526_v12 = vpop.permute.xlu0 %1659 }
 0xaba   : > { %1712 = vrot.lane.b32.xlu1 %v4524_v18, %s2942_s20  ;;  %1715 = vrot.lane.b32.xlu0 %v4526_v12, %s2942_s20 }
 0xabd   : > { %v4532_v13 = vpop.permute.xlu1 %1661  ;;  %v4534_v23 = vpop.permute.xlu0 %1663 }
 0xabe   : > { %1718 = vrot.lane.b32.xlu1 %v4532_v13, %s2942_s20  ;;  %1721 = vrot.lane.b32.xlu0 %v4534_v23, %s2942_s20 }
 0xac1   : > { %v4540_v20 = vpop.permute.xlu1 %1665  ;;  %v4542_v34 = vpop.permute.xlu0 %1667 }
 0xac2   : > { %1724 = vrot.lane.b32.xlu1 %v4540_v20, %s2942_s20  ;;  %1727 = vrot.lane.b32.xlu0 %v4542_v34, %s2942_s20 }
 0xac5   : > { %v4548_v14 = vpop.permute.xlu1 %1669  ;;  %v4550_v32 = vpop.permute.xlu0 %1671 }
 0xac6   : > { %1730 = vrot.lane.b32.xlu1 %v4548_v14, %s2942_s20  ;;  %1733 = vrot.lane.b32.xlu0 %v4550_v32, %s2942_s20 }
 0xac9   : > { %v4556_v15 = vpop.permute.xlu1 %1673 }
 0xaca   : > { %1736 = vrot.lane.b32.xlu1 %v4556_v15, %s2942_s20 }
 0xb1c   : > { %v1692_v19 = vpop.permute.xlu0 %1691 }
 0xb1d   : > { %v1693_v38 = vsel %vm1192_vm6, %v1692_v19, %v4496_v24 }
 0xb1e   : > { %1739 = vrot.lane.b32.xlu0 %v1693_v38, %s2942_s20 }
 0xb20   : > { %v1695_v45 = vpop.permute.xlu1 %1694  ;;  %v1698_v36 = vpop.permute.xlu0 %1697 }
 0xb21   : > { %v1696_v25 = vsel %vm1192_vm6, %v1695_v45, %v4500_v4  ;;  %v1699_v43 = vsel %vm1192_vm6, %v1698_v36, %v4502_v9 }
 0xb22   : > { %1741 = vrot.lane.b32.xlu1 %v1696_v25, %s2942_s20  ;;  %1743 = vrot.lane.b32.xlu0 %v1699_v43, %s2942_s20 }
 0xb24   : > { %v1701_v46 = vpop.permute.xlu1 %1700  ;;  %v1704_v30 = vpop.permute.xlu0 %1703 }
 0xb25   : > { %v1702_v39 = vsel %vm1192_vm6, %v1701_v46, %v4508_v17  ;;  %v1705_v31 = vsel %vm1192_vm6, %v1704_v30, %v4510_v10 }
 0xb26   : > { %1745 = vrot.lane.b32.xlu1 %v1702_v39, %s2942_s20  ;;  %1747 = vrot.lane.b32.xlu0 %v1705_v31, %s2942_s20 }
 0xb28   : > { %v1707_v42 = vpop.permute.xlu1 %1706  ;;  %v1710_v47 = vpop.permute.xlu0 %1709 }
 0xb29   : > { %v1708_v35 = vsel %vm1192_vm6, %v1707_v42, %v4516_v37  ;;  %v1711_v29 = vsel %vm1192_vm6, %v1710_v47, %v4518_v11 }
 0xb2a   : > { %1749 = vrot.lane.b32.xlu1 %v1708_v35, %s2942_s20  ;;  %1751 = vrot.lane.b32.xlu0 %v1711_v29, %s2942_s20 }
 0xb2c   : > { %v1713_v26 = vpop.permute.xlu1 %1712  ;;  %v1716_v22 = vpop.permute.xlu0 %1715 }
 0xb2d   : > { %v1714_v48 = vsel %vm1192_vm6, %v1713_v26, %v4524_v18  ;;  %v1717_v44 = vsel %vm1192_vm6, %v1716_v22, %v4526_v12 }
 0xb2e   : > { %1753 = vrot.lane.b32.xlu1 %v1714_v48, %s2942_s20  ;;  %1755 = vrot.lane.b32.xlu0 %v1717_v44, %s2942_s20 }
 0xb30   : > { %v1719_v50 = vpop.permute.xlu1 %1718  ;;  %v1722_v21 = vpop.permute.xlu0 %1721 }
 0xb31   : > { %v1720_v40 = vsel %vm1192_vm6, %v1719_v50, %v4532_v13  ;;  %v1723_v51 = vsel %vm1192_vm6, %v1722_v21, %v4534_v23 }
 0xb32   : > { %1757 = vrot.lane.b32.xlu1 %v1720_v40, %s2942_s20  ;;  %1759 = vrot.lane.b32.xlu0 %v1723_v51, %s2942_s20 }
 0xb34   : > { %v1725_v27 = vpop.permute.xlu1 %1724  ;;  %v1728_v52 = vpop.permute.xlu0 %1727 }
 0xb35   : > { %v1726_v53 = vsel %vm1192_vm6, %v1725_v27, %v4540_v20  ;;  %v1729_v54 = vsel %vm1192_vm6, %v1728_v52, %v4542_v34 }
 0xb36   : > { %1761 = vrot.lane.b32.xlu1 %v1726_v53, %s2942_s20  ;;  %1763 = vrot.lane.b32.xlu0 %v1729_v54, %s2942_s20 }
 0xb38   : > { %v1731_v55 = vpop.permute.xlu1 %1730  ;;  %v1734_v33 = vpop.permute.xlu0 %1733 }
 0xb39   : > { %v1732_v56 = vsel %vm1192_vm6, %v1731_v55, %v4548_v14  ;;  %v1735_v57 = vsel %vm1192_vm6, %v1734_v33, %v4550_v32 }
 0xb3a   : > { %1765 = vrot.lane.b32.xlu1 %v1732_v56, %s2942_s20  ;;  %1767 = vrot.lane.b32.xlu0 %v1735_v57, %s2942_s20 }
 0xb3c   : > { %v1737_v59 = vpop.permute.xlu1 %1736 }
 0xb3d   : > { %v1738_v60 = vsel %vm1192_vm6, %v1737_v59, %v4556_v15 }
 0xb3e   : > { %1769 = vrot.lane.b32.xlu1 %v1738_v60, %s2942_s20  ;;  %1787 = vrot.lane.b32.xlu0 %v1626_v58, %s2946_s26 }
 0xb90   : > { %v1740_v61 = vpop.permute.xlu0 %1739 }
 0xb91   : > { %v1771_v5 = vsel %vm1192_vm6, %v1740_v61, %v4496_v24 }
 0xb92   : > { %1808 = vrot.lane.b32.xlu1 %v1771_v5, %s2948_s28 }
 0xb94   : > { %v1742_v62 = vpop.permute.xlu1 %1741  ;;  %v1744_v63 = vpop.permute.xlu0 %1743 }
 0xb95   : > { %v1772_v41 = vsel %vm1192_vm6, %v1742_v62, %v4500_v4  ;;  %v1773_v6 = vsel %vm1192_vm6, %v1744_v63, %v4502_v9 }
 0xb96   : > { %1810 = vrot.lane.b32.xlu0 %v1772_v41, %s2948_s28  ;;  %1812 = vrot.lane.b32.xlu1 %v1773_v6, %s2948_s28 }
 0xb98   : > { %v1746_v7 = vpop.permute.xlu1 %1745  ;;  %v1748_v0 = vpop.permute.xlu0 %1747 }
 0xb99   : > { %v1774_v1 = vsel %vm1192_vm6, %v1746_v7, %v4508_v17  ;;  %v1775_v16 = vsel %vm1192_vm6, %v1748_v0, %v4510_v10 }
 0xb9a   : > { %1814 = vrot.lane.b32.xlu0 %v1774_v1, %s2948_s28  ;;  %1816 = vrot.lane.b32.xlu1 %v1775_v16, %s2948_s28 }
 0xb9c   : > { %v1750_v2 = vpop.permute.xlu1 %1749  ;;  %v1752_v3 = vpop.permute.xlu0 %1751 }
 0xb9d   : > { %v1776_v8 = vsel %vm1192_vm6, %v1750_v2, %v4516_v37  ;;  %v1777_v24 = vsel %vm1192_vm6, %v1752_v3, %v4518_v11 }
 0xb9e   : > { %1818 = vrot.lane.b32.xlu0 %v1776_v8, %s2948_s28  ;;  %1820 = vrot.lane.b32.xlu1 %v1777_v24, %s2948_s28 }
 0xba0   : > { %v1754_v4 = vpop.permute.xlu1 %1753  ;;  %v1756_v9 = vpop.permute.xlu0 %1755 }
 0xba1   : > { %v1778_v17 = vsel %vm1192_vm6, %v1754_v4, %v4524_v18  ;;  %v1779_v10 = vsel %vm1192_vm6, %v1756_v9, %v4526_v12 }
 0xba2   : > { %1822 = vrot.lane.b32.xlu0 %v1778_v17, %s2948_s28  ;;  %1824 = vrot.lane.b32.xlu1 %v1779_v10, %s2948_s28 }
 0xba4   : > { %v1758_v37 = vpop.permute.xlu1 %1757  ;;  %v1760_v19 = vpop.permute.xlu0 %1759 }
 0xba5   : > { %v1780_v11 = vsel %vm1192_vm6, %v1758_v37, %v4532_v13  ;;  %v1781_v38 = vsel %vm1192_vm6, %v1760_v19, %v4534_v23 }
 0xba6   : > { %1826 = vrot.lane.b32.xlu0 %v1780_v11, %s2948_s28  ;;  %1828 = vrot.lane.b32.xlu1 %v1781_v38, %s2948_s28 }
 0xba8   : > { %v1762_v18 = vpop.permute.xlu1 %1761  ;;  %v1764_v45 = vpop.permute.xlu0 %1763 }
 0xba9   : > { %v1782_v12 = vsel %vm1192_vm6, %v1762_v18, %v4540_v20  ;;  %v1783_v36 = vsel %vm1192_vm6, %v1764_v45, %v4542_v34 }
 0xbaa   : > { %1830 = vrot.lane.b32.xlu0 %v1782_v12, %s2948_s28  ;;  %1832 = vrot.lane.b32.xlu1 %v1783_v36, %s2948_s28 }
 0xbac   : > { %v1766_v13 = vpop.permute.xlu1 %1765  ;;  %v1768_v25 = vpop.permute.xlu0 %1767 }
 0xbad   : > { %v1784_v23 = vsel %vm1192_vm6, %v1766_v13, %v4548_v14  ;;  %v1785_v43 = vsel %vm1192_vm6, %v1768_v25, %v4550_v32 }
 0xbae   : > { %1834 = vrot.lane.b32.xlu0 %v1784_v23, %s2948_s28  ;;  %1836 = vrot.lane.b32.xlu1 %v1785_v43, %s2948_s28 }
 0xbb0   : > { %v1770_v20 = vpop.permute.xlu1 %1769  ;;  %v1788_v46 = vpop.permute.xlu0 %1787 }
 0xbb1   : > { %v1786_v34 = vsel %vm1192_vm6, %v1770_v20, %v4556_v15  ;;  %vm4659_vm9 = vcmp.eq.s32.totalorder %v4226_v49, %v1788_v46 }
 0xbb2   : > { %1838 = vrot.lane.b32.xlu0 %v1786_v34, %s2948_s28 }
 0xc04   : > { %v1809_v14 = vpop.permute.xlu1 %1808 }
 0xc05   : > { %v1856_v32 = vsel %vm4659_vm9, %v1771_v5, %v1809_v14 }
 0xc06   : > { %1888 = vrot.lane.b32.xlu1 %v1856_v32, %s2949_s29 }
 0xc08   : > { %v1813_v39 = vpop.permute.xlu1 %1812  ;;  %v1811_v31 = vpop.permute.xlu0 %1810 }
 0xc09   : > { %v1858_v15 = vsel %vm4659_vm9, %v1773_v6, %v1813_v39  ;;  %v1857_v42 = vsel %vm4659_vm9, %v1772_v41, %v1811_v31 }
 0xc0a   : > { %1892 = vrot.lane.b32.xlu1 %v1858_v15, %s2949_s29  ;;  %1890 = vrot.lane.b32.xlu0 %v1857_v42, %s2949_s29 }
 0xc0c   : > { %v1817_v49 = vpop.permute.xlu1 %1816  ;;  %v1815_v47 = vpop.permute.xlu0 %1814 }
 0xc0d   : > { %v1860_v35 = vsel %vm4659_vm9, %v1775_v16, %v1817_v49  ;;  %v1859_v29 = vsel %vm4659_vm9, %v1774_v1, %v1815_v47 }
 0xc0e   : > { %1896 = vrot.lane.b32.xlu1 %v1860_v35, %s2949_s29  ;;  %1894 = vrot.lane.b32.xlu0 %v1859_v29, %s2949_s29 }
 0xc10   : > { %v1821_v26 = vpop.permute.xlu1 %1820  ;;  %v1819_v22 = vpop.permute.xlu0 %1818 }
 0xc11   : > { %v1862_v48 = vsel %vm4659_vm9, %v1777_v24, %v1821_v26  ;;  %v1861_v44 = vsel %vm4659_vm9, %v1776_v8, %v1819_v22 }
 0xc12   : > { %1900 = vrot.lane.b32.xlu1 %v1862_v48, %s2949_s29  ;;  %1898 = vrot.lane.b32.xlu0 %v1861_v44, %s2949_s29 }
 0xc14   : > { %v1825_v50 = vpop.permute.xlu1 %1824  ;;  %v1823_v21 = vpop.permute.xlu0 %1822 }
 0xc15   : > { %v1864_v40 = vsel %vm4659_vm9, %v1779_v10, %v1825_v50  ;;  %v1863_v51 = vsel %vm4659_vm9, %v1778_v17, %v1823_v21 }
 0xc16   : > { %1904 = vrot.lane.b32.xlu1 %v1864_v40, %s2949_s29  ;;  %1902 = vrot.lane.b32.xlu0 %v1863_v51, %s2949_s29 }
 0xc18   : > { %v1829_v27 = vpop.permute.xlu1 %1828  ;;  %v1827_v52 = vpop.permute.xlu0 %1826 }
 0xc19   : > { %v1866_v53 = vsel %vm4659_vm9, %v1781_v38, %v1829_v27  ;;  %v1865_v54 = vsel %vm4659_vm9, %v1780_v11, %v1827_v52 }
 0xc1a   : > { %1908 = vrot.lane.b32.xlu1 %v1866_v53, %s2949_s29  ;;  %1906 = vrot.lane.b32.xlu0 %v1865_v54, %s2949_s29 }
 0xc1c   : > { %v1833_v55 = vpop.permute.xlu1 %1832  ;;  %v1831_v33 = vpop.permute.xlu0 %1830 }
 0xc1d   : > { %v1868_v56 = vsel %vm4659_vm9, %v1783_v36, %v1833_v55  ;;  %v1867_v57 = vsel %vm4659_vm9, %v1782_v12, %v1831_v33 }
 0xc1e   : > { %1912 = vrot.lane.b32.xlu1 %v1868_v56, %s2949_s29  ;;  %1910 = vrot.lane.b32.xlu0 %v1867_v57, %s2949_s29 }
 0xc20   : > { %v1837_v58 = vpop.permute.xlu1 %1836  ;;  %v1835_v59 = vpop.permute.xlu0 %1834 }
 0xc21   : > { %v1870_v60 = vsel %vm4659_vm9, %v1785_v43, %v1837_v58  ;;  %v1869_v61 = vsel %vm4659_vm9, %v1784_v23, %v1835_v59 }
 0xc22   : > { %1916 = vrot.lane.b32.xlu1 %v1870_v60, %s2949_s29  ;;  %1914 = vrot.lane.b32.xlu0 %v1869_v61, %s2949_s29 }
 0xc24   : > { %v1839_v5 = vpop.permute.xlu0 %1838 }
 0xc25   : > { %v1871_v62 = vsel %vm4659_vm9, %v1786_v34, %v1839_v5 }
 0xc26   : > { %1918 = vrot.lane.b32.xlu0 %v1871_v62, %s2949_s29 }
 0xc78   : > { %v4711_v63 = vpop.permute.xlu1 %1888 }
 0xc79   : > { %1936 = vrot.lane.b32.xlu1 %v4711_v63, %s2942_s20 }
 0xc7c   : > { %v4715_v41 = vpop.permute.xlu1 %1892  ;;  %v4717_v6 = vpop.permute.xlu0 %1890 }
 0xc7d   : > { %1942 = vrot.lane.b32.xlu1 %v4715_v41, %s2942_s20  ;;  %1939 = vrot.lane.b32.xlu0 %v4717_v6, %s2942_s20 }
 0xc80   : > { %v4723_v7 = vpop.permute.xlu1 %1896  ;;  %v4725_v0 = vpop.permute.xlu0 %1894 }
 0xc81   : > { %1948 = vrot.lane.b32.xlu1 %v4723_v7, %s2942_s20  ;;  %1945 = vrot.lane.b32.xlu0 %v4725_v0, %s2942_s20 }
 0xc84   : > { %v4731_v1 = vpop.permute.xlu1 %1900  ;;  %v4733_v16 = vpop.permute.xlu0 %1898 }
 0xc85   : > { %1954 = vrot.lane.b32.xlu1 %v4731_v1, %s2942_s20  ;;  %1951 = vrot.lane.b32.xlu0 %v4733_v16, %s2942_s20 }
 0xc88   : > { %v4739_v2 = vpop.permute.xlu1 %1904  ;;  %v4741_v3 = vpop.permute.xlu0 %1902 }
 0xc89   : > { %1960 = vrot.lane.b32.xlu1 %v4739_v2, %s2942_s20  ;;  %1957 = vrot.lane.b32.xlu0 %v4741_v3, %s2942_s20 }
 0xc8c   : > { %v4747_v8 = vpop.permute.xlu1 %1908  ;;  %v4749_v24 = vpop.permute.xlu0 %1906 }
 0xc8d   : > { %1966 = vrot.lane.b32.xlu1 %v4747_v8, %s2942_s20  ;;  %1963 = vrot.lane.b32.xlu0 %v4749_v24, %s2942_s20 }
 0xc90   : > { %v4755_v4 = vpop.permute.xlu1 %1912  ;;  %v4757_v9 = vpop.permute.xlu0 %1910 }
 0xc91   : > { %1972 = vrot.lane.b32.xlu1 %v4755_v4, %s2942_s20  ;;  %1969 = vrot.lane.b32.xlu0 %v4757_v9, %s2942_s20 }
 0xc94   : > { %v4763_v17 = vpop.permute.xlu1 %1916  ;;  %v4765_v10 = vpop.permute.xlu0 %1914 }
 0xc95   : > { %1978 = vrot.lane.b32.xlu1 %v4763_v17, %s2942_s20  ;;  %1975 = vrot.lane.b32.xlu0 %v4765_v10, %s2942_s20 }
 0xc98   : > { %v4771_v37 = vpop.permute.xlu0 %1918 }
 0xc99   : > { %1981 = vrot.lane.b32.xlu0 %v4771_v37, %s2942_s20 }
 0xceb   : > { %v1937_v19 = vpop.permute.xlu1 %1936 }
 0xcec   : > { %v1938_v11 = vsel %vm1192_vm6, %v1937_v19, %v4711_v63 }
 0xced   : > { %1984 = vrot.lane.b32.xlu1 %v1938_v11, %s2942_s20 }
 0xcef   : > { %v1943_v38 = vpop.permute.xlu1 %1942  ;;  %v1940_v18 = vpop.permute.xlu0 %1939 }
 0xcf0   : > { %v1944_v45 = vsel %vm1192_vm6, %v1943_v38, %v4715_v41  ;;  %v1941_v12 = vsel %vm1192_vm6, %v1940_v18, %v4717_v6 }
 0xcf1   : > { %1988 = vrot.lane.b32.xlu1 %v1944_v45, %s2942_s20  ;;  %1986 = vrot.lane.b32.xlu0 %v1941_v12, %s2942_s20  ;;  %v4872_v45 = vshrl.u32 %v1189_v28, 7 }
 0xcf3   : > { %v1949_v36 = vpop.permute.xlu1 %1948  ;;  %v1946_v13 = vpop.permute.xlu0 %1945  ;;  %v2034_v12 = vadd.s32 8, %v4872_v45  ;;  %vm2117_vm10 = vcmp.lt.s32.totalorder %v4872_v45, 1  ;;  %vm2211_vm11 = vcmp.lt.s32.totalorder %v4872_v45, 2  ;;  %vm2305_vm12 = vcmp.lt.s32.totalorder %v4872_v45, 4 }
 0xcf4   : > { %v1950_v25 = vsel %vm1192_vm6, %v1949_v36, %v4723_v7  ;;  %v1947_v23 = vsel %vm1192_vm6, %v1946_v13, %v4725_v0  ;;  %vm2150_vm13 = vcmp.lt.s32.totalorder %v4872_v45, 7  ;;  %vm2244_vm0 = vcmp.lt.s32.totalorder %v4872_v45, 6 }
 0xcf5   : > { %1992 = vrot.lane.b32.xlu1 %v1950_v25, %s2942_s20  ;;  %1990 = vrot.lane.b32.xlu0 %v1947_v23, %s2942_s20  ;;  %v2168_v36 = vrot.slane %v2034_v12, 7  ;;  %v2262_v13 = vrot.slane %v2034_v12, 6  ;;  %v2322_v25 = vrot.slane %v4872_v45, 4  ;;  %v2323_v23 = vrot.slane %v2034_v12, 4 }
 0xcf7   : > { %v1955_v43 = vpop.permute.xlu1 %1954  ;;  %v1952_v20 = vpop.permute.xlu0 %1951 }
 0xcf8   : > { %v1956_v34 = vsel %vm1192_vm6, %v1955_v43, %v4731_v1  ;;  %v1953_v46 = vsel %vm1192_vm6, %v1952_v20, %v4733_v16  ;;  %v2036_v20 = vxor.u32 1, %v2034_v12 }
 0xcf9   : > { %1996 = vrot.lane.b32.xlu1 %v1956_v34, %s2942_s20  ;;  %1994 = vrot.lane.b32.xlu0 %v1953_v46, %s2942_s20  ;;  %v2193_v46 = vxor.u32 2, %v4872_v45 }
 0xcfb   : > { %v1961_v30 = vpop.permute.xlu1 %1960  ;;  %v1958_v14 = vpop.permute.xlu0 %1957 }
 0xcfc   : > { %v1962_v32 = vsel %vm1192_vm6, %v1961_v30, %v4739_v2  ;;  %v1959_v39 = vsel %vm1192_vm6, %v1958_v14, %v4741_v3  ;;  %v2194_v30 = vxor.u32 2, %v2034_v12  ;;  %v2287_v14 = vxor.u32 4, %v4872_v45 }
 0xcfd   : > { %2000 = vrot.lane.b32.xlu1 %v1962_v32, %s2942_s20  ;;  %1998 = vrot.lane.b32.xlu0 %v1959_v39, %s2942_s20  ;;  %v2288_v32 = vxor.u32 4, %v2034_v12 }
 0xcff   : > { %v1967_v31 = vpop.permute.xlu1 %1966  ;;  %v1964_v15 = vpop.permute.xlu0 %1963 }
 0xd00   : > { %v1968_v42 = vsel %vm1192_vm6, %v1967_v31, %v4747_v8  ;;  %v1965_v49 = vsel %vm1192_vm6, %v1964_v15, %v4749_v24  ;;  %v2324_v15 = vsel %vm2305_vm12, %v2322_v25, %v2323_v23 }
 0xd01   : > { %2004 = vrot.lane.b32.xlu1 %v1968_v42, %s2942_s20  ;;  %2002 = vrot.lane.b32.xlu0 %v1965_v49, %s2942_s20  ;;  %v2325_v42 = vsel %vm2305_vm12, %v2323_v23, %v2322_v25  ;;  %vm4918_vm4 = vcmp.eq.s32.totalorder %v2324_v15, %v2288_v32 }
 0xd02   : > { %vm4914_vm3 = vcmp.eq.s32.totalorder %v2325_v42, %v2287_v14 }
 0xd03   : > { %v1973_v47 = vpop.permute.xlu1 %1972  ;;  %v1970_v35 = vpop.permute.xlu0 %1969 }
 0xd04   : > { %v1974_v29 = vsel %vm1192_vm6, %v1973_v47, %v4755_v4  ;;  %v1971_v26 = vsel %vm1192_vm6, %v1970_v35, %v4757_v9 }
 0xd05   : > { %2008 = vrot.lane.b32.xlu1 %v1974_v29, %s2942_s20  ;;  %2006 = vrot.lane.b32.xlu0 %v1971_v26, %s2942_s20 }
 0xd07   : > { %v1979_v22 = vpop.permute.xlu1 %1978  ;;  %v1976_v48 = vpop.permute.xlu0 %1975 }
 0xd08   : > { %v1980_v44 = vsel %vm1192_vm6, %v1979_v22, %v4763_v17  ;;  %v1977_v50 = vsel %vm1192_vm6, %v1976_v48, %v4765_v10 }
 0xd09   : > { %2012 = vrot.lane.b32.xlu1 %v1980_v44, %s2942_s20  ;;  %2010 = vrot.lane.b32.xlu0 %v1977_v50, %s2942_s20 }
 0xd0b   : > { %v1982_v21 = vpop.permute.xlu0 %1981 }
 0xd0c   : > { %v1983_v40 = vsel %vm1192_vm6, %v1982_v21, %v4771_v37 }
 0xd0d   : > { %2014 = vrot.lane.b32.xlu0 %v1983_v40, %s2942_s20 }
 0xd5f   : > { %v1985_v51 = vpop.permute.xlu1 %1984 }
 0xd60   : > { %v2016_v27 = vsel %vm1192_vm6, %v1985_v51, %v4711_v63 }
 0xd61   : > { %2053 = vrot.lane.b32.xlu1 %v2016_v27, %s2950_s3 }
 0xd63   : > { %v1989_v52 = vpop.permute.xlu1 %1988  ;;  %v1987_v53 = vpop.permute.xlu0 %1986 }
 0xd64   : > { %v2018_v54 = vsel %vm1192_vm6, %v1989_v52, %v4715_v41  ;;  %v2017_v55 = vsel %vm1192_vm6, %v1987_v53, %v4717_v6 }
 0xd65   : > { %2057 = vrot.lane.b32.xlu1 %v2018_v54, %s2950_s3  ;;  %2055 = vrot.lane.b32.xlu0 %v2017_v55, %s2950_s3 }
 0xd67   : > { %v1993_v33 = vpop.permute.xlu1 %1992  ;;  %v1991_v56 = vpop.permute.xlu0 %1990 }
 0xd68   : > { %v2020_v57 = vsel %vm1192_vm6, %v1993_v33, %v4723_v7  ;;  %v2019_v58 = vsel %vm1192_vm6, %v1991_v56, %v4725_v0 }
 0xd69   : > { %2061 = vrot.lane.b32.xlu1 %v2020_v57, %s2950_s3  ;;  %2059 = vrot.lane.b32.xlu0 %v2019_v58, %s2950_s3 }
 0xd6b   : > { %v1997_v59 = vpop.permute.xlu1 %1996  ;;  %v1995_v60 = vpop.permute.xlu0 %1994 }
 0xd6c   : > { %v2022_v61 = vsel %vm1192_vm6, %v1997_v59, %v4731_v1  ;;  %v2021_v5 = vsel %vm1192_vm6, %v1995_v60, %v4733_v16 }
 0xd6d   : > { %2065 = vrot.lane.b32.xlu1 %v2022_v61, %s2950_s3  ;;  %2063 = vrot.lane.b32.xlu0 %v2021_v5, %s2950_s3 }
 0xd6f   : > { %v2001_v62 = vpop.permute.xlu1 %2000  ;;  %v1999_v63 = vpop.permute.xlu0 %1998 }
 0xd70   : > { %v2024_v41 = vsel %vm1192_vm6, %v2001_v62, %v4739_v2  ;;  %v2023_v6 = vsel %vm1192_vm6, %v1999_v63, %v4741_v3 }
 0xd71   : > { %2069 = vrot.lane.b32.xlu1 %v2024_v41, %s2950_s3  ;;  %2067 = vrot.lane.b32.xlu0 %v2023_v6, %s2950_s3 }
 0xd73   : > { %v2005_v7 = vpop.permute.xlu1 %2004  ;;  %v2003_v0 = vpop.permute.xlu0 %2002 }
 0xd74   : > { %v2026_v1 = vsel %vm1192_vm6, %v2005_v7, %v4747_v8  ;;  %v2025_v16 = vsel %vm1192_vm6, %v2003_v0, %v4749_v24 }
 0xd75   : > { %2073 = vrot.lane.b32.xlu1 %v2026_v1, %s2950_s3  ;;  %2071 = vrot.lane.b32.xlu0 %v2025_v16, %s2950_s3 }
 0xd77   : > { %v2009_v2 = vpop.permute.xlu1 %2008  ;;  %v2007_v19 = vpop.permute.xlu0 %2006 }
 0xd78   : > { %v2028_v3 = vsel %vm1192_vm6, %v2009_v2, %v4755_v4  ;;  %v2027_v11 = vsel %vm1192_vm6, %v2007_v19, %v4757_v9 }
 0xd79   : > { %2077 = vrot.lane.b32.xlu1 %v2028_v3, %s2950_s3  ;;  %2075 = vrot.lane.b32.xlu0 %v2027_v11, %s2950_s3 }
 0xd7b   : > { %v2013_v8 = vpop.permute.xlu1 %2012  ;;  %v2011_v38 = vpop.permute.xlu0 %2010 }
 0xd7c   : > { %v2030_v24 = vsel %vm1192_vm6, %v2013_v8, %v4763_v17  ;;  %v2029_v18 = vsel %vm1192_vm6, %v2011_v38, %v4765_v10  ;;  %v2167_v17 = vrot.slane %v4872_v45, 7  ;;  %v2261_v10 = vrot.slane %v4872_v45, 6 }
 0xd7d   : > { %2081 = vrot.lane.b32.xlu1 %v2030_v24, %s2950_s3  ;;  %2079 = vrot.lane.b32.xlu0 %v2029_v18, %s2950_s3 }
 0xd7e   : > { %v2169_v28 = vsel %vm2117_vm10, %v2167_v17, %v2168_v36  ;;  %v2170_v34 = vsel %vm2117_vm10, %v2168_v36, %v2167_v17  ;;  %v2263_v39 = vsel %vm2211_vm11, %v2261_v10, %v2262_v13  ;;  %v2264_v31 = vsel %vm2211_vm11, %v2262_v13, %v2261_v10 }
 0xd7f   : > { %v2015_v4 = vpop.permute.xlu0 %2014  ;;  %vm4901_vm15 = vcmp.eq.s32.totalorder %v2169_v28, %v2036_v20  ;;  %vm4906_vm1 = vcmp.eq.s32.totalorder %v2264_v31, %v2193_v46  ;;  %vm4910_vm2 = vcmp.eq.s32.totalorder %v2263_v39, %v2194_v30 }
 0xd80   : > { %v2031_v9 = vsel %vm1192_vm6, %v2015_v4, %v4771_v37  ;;  %v2035_v37 = vxor.u32 1, %v4872_v45 }
 0xd81   : > { %2083 = vrot.lane.b32.xlu0 %v2031_v9, %s2950_s3 }
 0xd82   : > { %vm4897_vm14 = vcmp.eq.s32.totalorder %v2170_v34, %v2035_v37 }
 0xdd3   : > { %v2054_v43 = vpop.permute.xlu1 %2053 }
 0xdd4   : > { %v2101_v26 = vrot.slane %v2054_v43, 7  ;;  %v2134_v22 = vrot.slane %v2054_v43, 1 }
 0xdd7   : > { %v2058_v49 = vpop.permute.xlu1 %2057  ;;  %v2056_v29 = vpop.permute.xlu0 %2055 }
 0xdd8   : > { %v2109_v48 = vrot.slane %v2056_v29, 7  ;;  %v2142_v44 = vrot.slane %v2056_v29, 1  ;;  %v2102_v55 = vrot.slane %v2058_v49, 7  ;;  %v2135_v33 = vrot.slane %v2058_v49, 1 }
 0xdda   : > { %v2118_v27 = vsel %vm2117_vm10, %v2101_v26, %v2109_v48  ;;  %v2126_v52 = vsel %vm2117_vm10, %v2109_v48, %v2101_v26  ;;  %v2151_v53 = vsel %vm2150_vm13, %v2134_v22, %v2142_v44  ;;  %v2159_v54 = vsel %vm2150_vm13, %v2142_v44, %v2134_v22 }
 0xddb   : > { %v2177_v56 = vsel %vm4897_vm14, %v2126_v52, %v2151_v53  ;;  %v2178_v57 = vsel %vm4901_vm15, %v2118_v27, %v2159_v54  ;;  %v2062_v58 = vpop.permute.xlu1 %2061  ;;  %v2060_v59 = vpop.permute.xlu0 %2059 }
 0xddc   : > { %v2195_v60 = vrot.slane %v2177_v56, 6  ;;  %v2203_v61 = vrot.slane %v2178_v57, 6  ;;  %v2228_v5 = vrot.slane %v2177_v56, 2  ;;  %v2236_v62 = vrot.slane %v2178_v57, 2 }
 0xddd   : > { %v2103_v63 = vrot.slane %v2062_v58, 7  ;;  %v2136_v41 = vrot.slane %v2062_v58, 1  ;;  %v2110_v6 = vrot.slane %v2060_v59, 7  ;;  %v2143_v7 = vrot.slane %v2060_v59, 1 }
 0xdde   : > { %v2212_v0 = vsel %vm2211_vm11, %v2195_v60, %v2203_v61  ;;  %v2220_v1 = vsel %vm2211_vm11, %v2203_v61, %v2195_v60  ;;  %v2245_v16 = vsel %vm2244_vm0, %v2228_v5, %v2236_v62  ;;  %v2253_v2 = vsel %vm2244_vm0, %v2236_v62, %v2228_v5 }
 0xddf   : > { %v2271_v19 = vsel %vm4906_vm1, %v2220_v1, %v2245_v16  ;;  %v2272_v3 = vsel %vm4910_vm2, %v2212_v0, %v2253_v2  ;;  %v2119_v11 = vsel %vm2117_vm10, %v2102_v55, %v2110_v6  ;;  %v2127_v8 = vsel %vm2117_vm10, %v2110_v6, %v2102_v55  ;;  %v2066_v38 = vpop.permute.xlu1 %2065  ;;  %v2064_v24 = vpop.permute.xlu0 %2063 }
 0xde0   : > { %v2289_v18 = vrot.slane %v2271_v19, 4  ;;  %v2297_v4 = vrot.slane %v2272_v3, 4  ;;  %v2152_v9 = vsel %vm2150_vm13, %v2135_v33, %v2143_v7  ;;  %v2160_v12 = vsel %vm2150_vm13, %v2143_v7, %v2135_v33 }
 0xde1   : > { %v2179_v17 = vsel %vm4897_vm14, %v2127_v8, %v2152_v9  ;;  %v2180_v36 = vsel %vm4901_vm15, %v2119_v11, %v2160_v12  ;;  %v2104_v10 = vrot.slane %v2066_v38, 7  ;;  %v2137_v13 = vrot.slane %v2066_v38, 1 }
 0xde2   : > { %v2306_v25 = vsel %vm2305_vm12, %v2289_v18, %v2297_v4  ;;  %v2314_v23 = vsel %vm2305_vm12, %v2297_v4, %v2289_v18  ;;  %v2196_v43 = vrot.slane %v2179_v17, 6  ;;  %v2204_v37 = vrot.slane %v2180_v36, 6 }
 0xde3   : > { %v2332_v20 = vsel %vm4914_vm3, %v2314_v23, %v2306_v25  ;;  %v2333_v28 = vsel %vm4918_vm4, %v2306_v25, %v2314_v23  ;;  %v2229_v34 = vrot.slane %v2179_v17, 2  ;;  %v2237_v46 = vrot.slane %v2180_v36, 2  ;;  %v4966_v30 = vpop.permute.xlu1 %2069  ;;  %v2068_v26 = vpop.permute.xlu0 %2067 }
 0xde4   : > { %2349 = vst.msk [vmem:[%s3027_s25] sm:$0xff] %vm2348_vm5, %v2333_v28  ;;  %2350 = vst.msk [vmem:[%s3027_s25 + $0x8] sm:$0xff] %vm2348_vm5, %v2332_v20  ;;  %v2213_v14 = vsel %vm2211_vm11, %v2196_v43, %v2204_v37  ;;  %v2221_v32 = vsel %vm2211_vm11, %v2204_v37, %v2196_v43  ;;  %v2111_v39 = vrot.slane %v2064_v24, 7  ;;  %v2144_v31 = vrot.slane %v2064_v24, 1 }
 0xde5   : > { %v2246_v15 = vsel %vm2244_vm0, %v2229_v34, %v2237_v46  ;;  %v2254_v42 = vsel %vm2244_vm0, %v2237_v46, %v2229_v34  ;;  %v2105_v49 = vrot.slane %v4966_v30, 7  ;;  %v2138_v29 = vrot.slane %v4966_v30, 1 }
 0xde6   : > { %v2273_v22 = vsel %vm4906_vm1, %v2221_v32, %v2246_v15  ;;  %v2274_v48 = vsel %vm4910_vm2, %v2213_v14, %v2254_v42  ;;  %v2120_v44 = vsel %vm2117_vm10, %v2103_v63, %v2111_v39  ;;  %v2128_v27 = vsel %vm2117_vm10, %v2111_v39, %v2103_v63 }
 0xde7   : > { %v2290_v52 = vrot.slane %v2273_v22, 4  ;;  %v2298_v53 = vrot.slane %v2274_v48, 4  ;;  %v2153_v54 = vsel %vm2150_vm13, %v2136_v41, %v2144_v31  ;;  %v2161_v55 = vsel %vm2150_vm13, %v2144_v31, %v2136_v41  ;;  %v5002_v62 = vpop.permute.xlu1 %2073 }
 0xde8   : > { %v2181_v33 = vsel %vm4897_vm14, %v2128_v27, %v2153_v54  ;;  %v2182_v56 = vsel %vm4901_vm15, %v2120_v44, %v2161_v55  ;;  %v2112_v57 = vrot.slane %v2068_v26, 7  ;;  %v2145_v58 = vrot.slane %v2068_v26, 1 }
 0xde9   : > { %v2307_v59 = vsel %vm2305_vm12, %v2290_v52, %v2298_v53  ;;  %v2315_v60 = vsel %vm2305_vm12, %v2298_v53, %v2290_v52  ;;  %v2197_v61 = vrot.slane %v2181_v33, 6  ;;  %v2205_v5 = vrot.slane %v2182_v56, 6 }
 0xdea   : > { %v2334_v63 = vsel %vm4914_vm3, %v2315_v60, %v2307_v59  ;;  %v2335_v41 = vsel %vm4918_vm4, %v2307_v59, %v2315_v60  ;;  %v2230_v6 = vrot.slane %v2181_v33, 2  ;;  %v2238_v7 = vrot.slane %v2182_v56, 2 }
 0xdeb   : > { %2351 = vst.msk [vmem:[%s3027_s25 + $0x10] sm:$0xff] %vm2348_vm5, %v2335_v41  ;;  %2352 = vst.msk [vmem:[%s3027_s25 + $0x18] sm:$0xff] %vm2348_vm5, %v2334_v63  ;;  %v2214_v0 = vsel %vm2211_vm11, %v2197_v61, %v2205_v5  ;;  %v2222_v1 = vsel %vm2211_vm11, %v2205_v5, %v2197_v61  ;;  %v2121_v16 = vsel %vm2117_vm10, %v2104_v10, %v2112_v57  ;;  %v2106_v23 = vrot.slane %v5002_v62, 7  ;;  %v5038_v37 = vpop.permute.xlu1 %2077 }
 0xdec   : > { %v2129_v2 = vsel %vm2117_vm10, %v2112_v57, %v2104_v10  ;;  %v2247_v19 = vsel %vm2244_vm0, %v2230_v6, %v2238_v7  ;;  %v2255_v3 = vsel %vm2244_vm0, %v2238_v7, %v2230_v6  ;;  %v2154_v11 = vsel %vm2150_vm13, %v2137_v13, %v2145_v58  ;;  %v2072_v10 = vpop.permute.xlu0 %2071 }
 0xded   : > { %v2162_v8 = vsel %vm2150_vm13, %v2145_v58, %v2137_v13  ;;  %v2275_v38 = vsel %vm4906_vm1, %v2222_v1, %v2247_v19  ;;  %v2276_v24 = vsel %vm4910_vm2, %v2214_v0, %v2255_v3  ;;  %v2183_v18 = vsel %vm4897_vm14, %v2129_v2, %v2154_v11 }
 0xdee   : > { %v2184_v4 = vsel %vm4901_vm15, %v2121_v16, %v2162_v8  ;;  %v2291_v9 = vrot.slane %v2275_v38, 4  ;;  %v2299_v12 = vrot.slane %v2276_v24, 4  ;;  %v2198_v17 = vrot.slane %v2183_v18, 6 }
 0xdef   : > { %v2206_v36 = vrot.slane %v2184_v4, 6  ;;  %v2231_v13 = vrot.slane %v2183_v18, 2  ;;  %v2239_v25 = vrot.slane %v2184_v4, 2  ;;  %v2139_v43 = vrot.slane %v5002_v62, 1  ;;  %v5090_v60 = vpop.permute.xlu1 %2081 }
 0xdf0   : > { %v2308_v20 = vsel %vm2305_vm12, %v2291_v9, %v2299_v12  ;;  %v2316_v28 = vsel %vm2305_vm12, %v2299_v12, %v2291_v9  ;;  %v2113_v26 = vrot.slane %v2072_v10, 7  ;;  %v2146_v22 = vrot.slane %v2072_v10, 1  ;;  %v2076_v56 = vpop.permute.xlu0 %2075 }
 0xdf1   : > { %v2215_v34 = vsel %vm2211_vm11, %v2198_v17, %v2206_v36  ;;  %v2223_v46 = vsel %vm2211_vm11, %v2206_v36, %v2198_v17  ;;  %v2336_v14 = vsel %vm4914_vm3, %v2316_v28, %v2308_v20  ;;  %v2337_v32 = vsel %vm4918_vm4, %v2308_v20, %v2316_v28 }
 0xdf2   : > { %v2248_v39 = vsel %vm2244_vm0, %v2231_v13, %v2239_v25  ;;  %v2256_v31 = vsel %vm2244_vm0, %v2239_v25, %v2231_v13  ;;  %2353 = vst.msk [vmem:[%s3027_s25 + $0x20] sm:$0xff] %vm2348_vm5, %v2337_v32  ;;  %2354 = vst.msk [vmem:[%s3027_s25 + $0x28] sm:$0xff] %vm2348_vm5, %v2336_v14  ;;  %v2107_v27 = vrot.slane %v5038_v37, 7  ;;  %v2140_v52 = vrot.slane %v5038_v37, 1 }
 0xdf3   : > { %v2277_v15 = vsel %vm4906_vm1, %v2223_v46, %v2248_v39  ;;  %v2278_v42 = vsel %vm4910_vm2, %v2215_v34, %v2256_v31  ;;  %v2122_v53 = vsel %vm2117_vm10, %v2105_v49, %v2113_v26  ;;  %v2130_v54 = vsel %vm2117_vm10, %v2113_v26, %v2105_v49 }
 0xdf4   : > { %v2292_v48 = vrot.slane %v2277_v15, 4  ;;  %v2300_v44 = vrot.slane %v2278_v42, 4  ;;  %v2155_v55 = vsel %vm2150_vm13, %v2138_v29, %v2146_v22  ;;  %v2163_v33 = vsel %vm2150_vm13, %v2146_v22, %v2138_v29  ;;  %v2080_v4 = vpop.permute.xlu0 %2079 }
 0xdf5   : > { %v2185_v49 = vsel %vm4897_vm14, %v2130_v54, %v2155_v55  ;;  %v2186_v59 = vsel %vm4901_vm15, %v2122_v53, %v2163_v33  ;;  %v2114_v41 = vrot.slane %v2076_v56, 7  ;;  %v2147_v6 = vrot.slane %v2076_v56, 1 }
 0xdf6   : > { %v2309_v57 = vsel %vm2305_vm12, %v2292_v48, %v2300_v44  ;;  %v2317_v58 = vsel %vm2305_vm12, %v2300_v44, %v2292_v48  ;;  %v2199_v61 = vrot.slane %v2185_v49, 6  ;;  %v2207_v5 = vrot.slane %v2186_v59, 6 }
 0xdf7   : > { %v2338_v30 = vsel %vm4914_vm3, %v2317_v58, %v2309_v57  ;;  %v2339_v29 = vsel %vm4918_vm4, %v2309_v57, %v2317_v58  ;;  %v2232_v62 = vrot.slane %v2185_v49, 2  ;;  %v2240_v63 = vrot.slane %v2186_v59, 2 }
 0xdf8   : > { %2355 = vst.msk [vmem:[%s3027_s25 + $0x30] sm:$0xff] %vm2348_vm5, %v2339_v29  ;;  %2356 = vst.msk [vmem:[%s3027_s25 + $0x38] sm:$0xff] %vm2348_vm5, %v2338_v30  ;;  %v2216_v7 = vsel %vm2211_vm11, %v2199_v61, %v2207_v5  ;;  %v2224_v0 = vsel %vm2211_vm11, %v2207_v5, %v2199_v61  ;;  %v2108_v1 = vrot.slane %v5090_v60, 7  ;;  %v2141_v16 = vrot.slane %v5090_v60, 1  ;;  %v2084_v53 = vpop.permute.xlu0 %2083 }
 0xdf9   : > { %v2249_v2 = vsel %vm2244_vm0, %v2232_v62, %v2240_v63  ;;  %v2257_v19 = vsel %vm2244_vm0, %v2240_v63, %v2232_v62  ;;  %v2123_v3 = vsel %vm2117_vm10, %v2106_v23, %v2114_v41  ;;  %v2131_v11 = vsel %vm2117_vm10, %v2114_v41, %v2106_v23 }
 0xdfa   : > { %v2279_v8 = vsel %vm4906_vm1, %v2224_v0, %v2249_v2  ;;  %v2280_v38 = vsel %vm4910_vm2, %v2216_v7, %v2257_v19  ;;  %v2156_v24 = vsel %vm2150_vm13, %v2139_v43, %v2147_v6  ;;  %v2164_v18 = vsel %vm2150_vm13, %v2147_v6, %v2139_v43 }
 0xdfb   : > { %v2293_v9 = vrot.slane %v2279_v8, 4  ;;  %v2301_v12 = vrot.slane %v2280_v38, 4  ;;  %v2187_v17 = vsel %vm4897_vm14, %v2131_v11, %v2156_v24  ;;  %v2188_v36 = vsel %vm4901_vm15, %v2123_v3, %v2164_v18 }
 0xdfc   : > { %v2200_v10 = vrot.slane %v2187_v17, 6  ;;  %v2208_v13 = vrot.slane %v2188_v36, 6  ;;  %v2233_v25 = vrot.slane %v2187_v17, 2  ;;  %v2241_v23 = vrot.slane %v2188_v36, 2 }
 0xdfd   : > { %v2310_v37 = vsel %vm2305_vm12, %v2293_v9, %v2301_v12  ;;  %v2318_v43 = vsel %vm2305_vm12, %v2301_v12, %v2293_v9  ;;  %v2115_v20 = vrot.slane %v2080_v4, 7  ;;  %v2148_v28 = vrot.slane %v2080_v4, 1 }
 0xdfe   : > { %v2340_v34 = vsel %vm4914_vm3, %v2318_v43, %v2310_v37  ;;  %v2341_v46 = vsel %vm4918_vm4, %v2310_v37, %v2318_v43  ;;  %v2217_v14 = vsel %vm2211_vm11, %v2200_v10, %v2208_v13  ;;  %v2225_v32 = vsel %vm2211_vm11, %v2208_v13, %v2200_v10 }
 0xdff   : > { %2357 = vst.msk [vmem:[%s3027_s25 + $0x40] sm:$0xff] %vm2348_vm5, %v2341_v46  ;;  %2358 = vst.msk [vmem:[%s3027_s25 + $0x48] sm:$0xff] %vm2348_vm5, %v2340_v34  ;;  %v2250_v39 = vsel %vm2244_vm0, %v2233_v25, %v2241_v23  ;;  %v2258_v31 = vsel %vm2244_vm0, %v2241_v23, %v2233_v25  ;;  %v2124_v15 = vsel %vm2117_vm10, %v2107_v27, %v2115_v20  ;;  %v2116_v30 = vrot.slane %v2084_v53, 7 }
 0xe00   : > { %v2132_v42 = vsel %vm2117_vm10, %v2115_v20, %v2107_v27  ;;  %v2281_v26 = vsel %vm4906_vm1, %v2225_v32, %v2250_v39  ;;  %v2282_v22 = vsel %vm4910_vm2, %v2217_v14, %v2258_v31  ;;  %v2157_v48 = vsel %vm2150_vm13, %v2140_v52, %v2148_v28 }
 0xe01   : > { %v2165_v44 = vsel %vm2150_vm13, %v2148_v28, %v2140_v52  ;;  %v2294_v54 = vrot.slane %v2281_v26, 4  ;;  %v2302_v55 = vrot.slane %v2282_v22, 4  ;;  %v2189_v27 = vsel %vm4897_vm14, %v2132_v42, %v2157_v48 }
 0xe02   : > { %v2190_v33 = vsel %vm4901_vm15, %v2124_v15, %v2165_v44  ;;  %v2201_v56 = vrot.slane %v2189_v27, 6  ;;  %v2234_v58 = vrot.slane %v2189_v27, 2  ;;  %v2149_v29 = vrot.slane %v2084_v53, 1 }
 0xe03   : > { %v2209_v57 = vrot.slane %v2190_v33, 6  ;;  %v2242_v49 = vrot.slane %v2190_v33, 2  ;;  %v2311_v59 = vsel %vm2305_vm12, %v2294_v54, %v2302_v55  ;;  %v2319_v52 = vsel %vm2305_vm12, %v2302_v55, %v2294_v54 }
 0xe04   : > { %v2342_v61 = vsel %vm4914_vm3, %v2319_v52, %v2311_v59  ;;  %v2343_v5 = vsel %vm4918_vm4, %v2311_v59, %v2319_v52  ;;  %v2125_v7 = vsel %vm2117_vm10, %v2108_v1, %v2116_v30  ;;  %v2133_v0 = vsel %vm2117_vm10, %v2116_v30, %v2108_v1 }
 0xe05   : > { %v2218_v62 = vsel %vm2211_vm11, %v2201_v56, %v2209_v57  ;;  %v2226_v63 = vsel %vm2211_vm11, %v2209_v57, %v2201_v56  ;;  %2359 = vst.msk [vmem:[%s3027_s25 + $0x50] sm:$0xff] %vm2348_vm5, %v2343_v5  ;;  %2360 = vst.msk [vmem:[%s3027_s25 + $0x58] sm:$0xff] %vm2348_vm5, %v2342_v61  ;;  %v2251_v41 = vsel %vm2244_vm0, %v2234_v58, %v2242_v49 }
 0xe06   : > { %v2259_v6 = vsel %vm2244_vm0, %v2242_v49, %v2234_v58  ;;  %v2283_v2 = vsel %vm4906_vm1, %v2226_v63, %v2251_v41  ;;  %v2158_v3 = vsel %vm2150_vm13, %v2141_v16, %v2149_v29  ;;  %v2166_v11 = vsel %vm2150_vm13, %v2149_v29, %v2141_v16 }
 0xe07   : > { %v2284_v19 = vsel %vm4910_vm2, %v2218_v62, %v2259_v6  ;;  %v2295_v8 = vrot.slane %v2283_v2, 4  ;;  %v2191_v38 = vsel %vm4897_vm14, %v2133_v0, %v2158_v3  ;;  %v2192_v24 = vsel %vm4901_vm15, %v2125_v7, %v2166_v11 }
 0xe08   : > { %v2303_v1 = vrot.slane %v2284_v19, 4  ;;  %v2202_v18 = vrot.slane %v2191_v38, 6  ;;  %v2210_v4 = vrot.slane %v2192_v24, 6  ;;  %v2235_v9 = vrot.slane %v2191_v38, 2 }
 0xe09   : > { %v2243_v12 = vrot.slane %v2192_v24, 2 }
 0xe0a   : > { %v2312_v60 = vsel %vm2305_vm12, %v2295_v8, %v2303_v1  ;;  %v2320_v17 = vsel %vm2305_vm12, %v2303_v1, %v2295_v8  ;;  %v2219_v35 = vsel %vm2211_vm11, %v2202_v18, %v2210_v4  ;;  %v2227_v36 = vsel %vm2211_vm11, %v2210_v4, %v2202_v18 }
 0xe0b   : > { %v2344_v16 = vsel %vm4914_vm3, %v2320_v17, %v2312_v60  ;;  %v2345_v47 = vsel %vm4918_vm4, %v2312_v60, %v2320_v17  ;;  %v2252_v10 = vsel %vm2244_vm0, %v2235_v9, %v2243_v12  ;;  %v2260_v13 = vsel %vm2244_vm0, %v2243_v12, %v2235_v9 }
 0xe0c   : > { %2361 = vst.msk [vmem:[%s3027_s25 + $0x60] sm:$0xff] %vm2348_vm5, %v2345_v47  ;;  %2362 = vst.msk [vmem:[%s3027_s25 + $0x68] sm:$0xff] %vm2348_vm5, %v2344_v16  ;;  %v2285_v25 = vsel %vm4906_vm1, %v2227_v36, %v2252_v10  ;;  %v2286_v23 = vsel %vm4910_vm2, %v2219_v35, %v2260_v13 }
 0xe0d   : > { %v2296_v37 = vrot.slane %v2285_v25, 4  ;;  %v2304_v43 = vrot.slane %v2286_v23, 4 }
 0xe0f   : > { %v2313_v20 = vsel %vm2305_vm12, %v2296_v37, %v2304_v43  ;;  %v2321_v28 = vsel %vm2305_vm12, %v2304_v43, %v2296_v37 }
 0xe10   : > { %v2346_v34 = vsel %vm4914_vm3, %v2321_v28, %v2313_v20  ;;  %v2347_v46 = vsel %vm4918_vm4, %v2313_v20, %v2321_v28 }
 0xe11   : > { %2363 = vst.msk [vmem:[%s3027_s25 + $0x70] sm:$0xff] %vm2348_vm5, %v2347_v46  ;;  %2364 = vst.msk [vmem:[%s3027_s25 + $0x78] sm:$0xff] %vm2348_vm5, %v2346_v34 }
 0xe12 PF: > { %p2769_p0 = scmp.ne.s32.totalorder %s2923_s12, 3 }
 0xe13   : > { %v2369_v50 = vld [vmem:[%s5711_s1] sm:$0xff] (!%p2769_p0)  ;;  %v2370_v45 = vld [vmem:[%s5711_s1 + $0x8] sm:$0xff] (!%p2769_p0)  ;;  %v2385_v21 = vlaneseq (!%p2769_p0)  ;;  %v5248_v40 = vld [vmem:[%s5711_s1 + $0x10] sm:$0xff] (!%p2769_p0)  ;;  %vm2637_vm10 = vcmask (!%p2769_p0), 130048  }
 0xe14   : > { %2368 = sbr.rel (%p2769_p0) target bundleno = 3670 (0xe56), region = 44  ;;  %v2390_v51 = vrot.slane (!%p2769_p0), %v2369_v50, 7  ;;  %v2398_v14 = vrot.slane (!%p2769_p0), %v2370_v45, 7  ;;  %v2423_v32 = vrot.slane (!%p2769_p0), %v2369_v50, 1  ;;  %v2431_v39 = vrot.slane (!%p2769_p0), %v2370_v45, 1  ;;  %v5253_v31 = vld [vmem:[%s5711_s1 + $0x18] sm:$0xff] (!%p2769_p0) }
 0xe15   : > { %v5258_v15 = vld [vmem:[%s5711_s1 + $0x20] sm:$0xff] (!%p2769_p0)  ;;  %v5260_v42 = vshrl.u32 (!%p2769_p0), %v2385_v21, 7  ;;  %v2391_v26 = vrot.slane (!%p2769_p0), %v5248_v40, 7  ;;  %v2399_v22 = vrot.slane (!%p2769_p0), %v5253_v31, 7  ;;  %v2424_v48 = vrot.slane (!%p2769_p0), %v5248_v40, 1  ;;  %v5268_v44 = vld [vmem:[%s5711_s1 + $0x28] sm:$0xff] (!%p2769_p0) }
 0xe16   : > { %v2432_v53 = vrot.slane (!%p2769_p0), %v5253_v31, 1  ;;  %v2392_v54 = vrot.slane (!%p2769_p0), %v5258_v15, 7  ;;  %v2400_v55 = vrot.slane (!%p2769_p0), %v5268_v44, 7  ;;  %v2425_v27 = vrot.slane (!%p2769_p0), %v5258_v15, 1  ;;  %v2377_v15 = vld [vmem:[%s5711_s1 + $0x40] sm:$0xff] (!%p2769_p0) }
 0xe17   : > { %v2387_v33 = vadd.s32 (!%p2769_p0), 8, %v5260_v42  ;;  %v2388_v56 = vxor.u32 (!%p2769_p0), 1, %v5260_v42  ;;  %vm2406_vm6 = vcmp.lt.s32.totalorder (!%p2769_p0), %v5260_v42, 1  ;;  %vm2439_vm7 = vcmp.lt.s32.totalorder (!%p2769_p0), %v5260_v42, 7 }
 0xe18   : > { %v2407_v57 = vsel (!%p2769_p0), %vm2406_vm6, %v2390_v51, %v2398_v14  ;;  %v2415_v58 = vsel (!%p2769_p0), %vm2406_vm6, %v2398_v14, %v2390_v51  ;;  %v2440_v49 = vsel (!%p2769_p0), %vm2439_vm7, %v2423_v32, %v2431_v39  ;;  %v2448_v59 = vsel (!%p2769_p0), %vm2439_vm7, %v2431_v39, %v2423_v32  ;;  %v2375_v32 = vld [vmem:[%s5711_s1 + $0x30] sm:$0xff] (!%p2769_p0) }
 0xe19   : > { %v2389_v52 = vxor.u32 (!%p2769_p0), 1, %v2387_v33  ;;  %v2456_v30 = vrot.slane (!%p2769_p0), %v5260_v42, 7  ;;  %v2457_v29 = vrot.slane (!%p2769_p0), %v2387_v33, 7  ;;  %v2482_v61 = vxor.u32 (!%p2769_p0), 2, %v5260_v42 }
 0xe1a   : > { %v2483_v5 = vxor.u32 (!%p2769_p0), 2, %v2387_v33  ;;  %vm2500_vm8 = vcmp.lt.s32.totalorder (!%p2769_p0), %v5260_v42, 2  ;;  %vm2533_vm9 = vcmp.lt.s32.totalorder (!%p2769_p0), %v5260_v42, 6  ;;  %v2550_v62 = vrot.slane (!%p2769_p0), %v5260_v42, 6 }
 0xe1b   : > { %v2458_v63 = vsel %vm2406_vm6, %v2456_v30, %v2457_v29  ;;  %v2459_v41 = vsel %vm2406_vm6, %v2457_v29, %v2456_v30  ;;  %v2551_v6 = vrot.slane %v2387_v33, 6  ;;  %v2577_v7 = vxor.u32 4, %v2387_v33 }
 0xe1c   : > { %vm5295_vm11 = vcmp.eq.s32.totalorder %v2459_v41, %v2388_v56  ;;  %vm5299_vm12 = vcmp.eq.s32.totalorder %v2458_v63, %v2389_v52  ;;  %vm2594_vm13 = vcmp.lt.s32.totalorder %v5260_v42, 4  ;;  %v2611_v19 = vrot.slane %v5260_v42, 4 }
 0xe1d   : > { %v2466_v3 = vsel %vm5295_vm11, %v2415_v58, %v2440_v49  ;;  %v2467_v11 = vsel %vm5299_vm12, %v2407_v57, %v2448_v59  ;;  %v2552_v8 = vsel %vm2500_vm8, %v2550_v62, %v2551_v6  ;;  %v2553_v1 = vsel %vm2500_vm8, %v2551_v6, %v2550_v62 }
 0xe1e   : > { %v2484_v38 = vrot.slane %v2466_v3, 6  ;;  %v2492_v24 = vrot.slane %v2467_v11, 6  ;;  %v2517_v18 = vrot.slane %v2466_v3, 2  ;;  %v2525_v4 = vrot.slane %v2467_v11, 2 }
 0xe1f   : > { %vm5313_vm14 = vcmp.eq.s32.totalorder %v2553_v1, %v2482_v61  ;;  %vm5317_vm15 = vcmp.eq.s32.totalorder %v2552_v8, %v2483_v5  ;;  %v2612_v60 = vrot.slane %v2387_v33, 4  ;;  %v2576_v17 = vxor.u32 4, %v5260_v42 }
 0xe20   : > { %v2501_v16 = vsel %vm2500_vm8, %v2484_v38, %v2492_v24  ;;  %v2509_v47 = vsel %vm2500_vm8, %v2492_v24, %v2484_v38  ;;  %v2534_v35 = vsel %vm2533_vm9, %v2517_v18, %v2525_v4  ;;  %v2542_v36 = vsel %vm2533_vm9, %v2525_v4, %v2517_v18  ;;  %v2378_v18 = vld [vmem:[%s5711_s1 + $0x48] sm:$0xff] }
 0xe21   : > { %v2560_v10 = vsel %vm5313_vm14, %v2509_v47, %v2534_v35  ;;  %v2561_v13 = vsel %vm5317_vm15, %v2501_v16, %v2542_v36  ;;  %v2613_v25 = vsel %vm2594_vm13, %v2611_v19, %v2612_v60  ;;  %v2614_v23 = vsel %vm2594_vm13, %v2612_v60, %v2611_v19 }
 0xe22   : > { %v2578_v37 = vrot.slane %v2560_v10, 4  ;;  %v2586_v43 = vrot.slane %v2561_v13, 4  ;;  %vm5338_vm0 = vcmp.eq.s32.totalorder %v2613_v25, %v2577_v7  ;;  %vm5342_vm1 = vcmp.eq.s32.totalorder %v2614_v23, %v2576_v17 }
 0xe23   : > { %v2408_v34 = vsel %vm2406_vm6, %v2391_v26, %v2399_v22  ;;  %v2416_v46 = vsel %vm2406_vm6, %v2399_v22, %v2391_v26  ;;  %v2441_v50 = vsel %vm2439_vm7, %v2424_v48, %v2432_v53  ;;  %v2449_v45 = vsel %vm2439_vm7, %v2432_v53, %v2424_v48  ;;  %v2376_v48 = vld [vmem:[%s5711_s1 + $0x38] sm:$0xff] }
 0xe24   : > { %v2595_v21 = vsel %vm2594_vm13, %v2578_v37, %v2586_v43  ;;  %v2603_v40 = vsel %vm2594_vm13, %v2586_v43, %v2578_v37  ;;  %v2468_v51 = vsel %vm5295_vm11, %v2416_v46, %v2441_v50  ;;  %v2469_v14 = vsel %vm5299_vm12, %v2408_v34, %v2449_v45 }
 0xe25   : > { %v2622_v39 = vsel %vm5338_vm0, %v2595_v21, %v2603_v40  ;;  %v2621_v31 = vsel %vm5342_vm1, %v2603_v40, %v2595_v21  ;;  %v2485_v26 = vrot.slane %v2468_v51, 6  ;;  %v2493_v22 = vrot.slane %v2469_v14, 6 }
 0xe26   : > { %2638 = vst.msk [vmem:[%s3027_s25] sm:$0xff] %vm2637_vm10, %v2622_v39  ;;  %2639 = vst.msk [vmem:[%s3027_s25 + $0x8] sm:$0xff] %vm2637_vm10, %v2621_v31  ;;  %v2518_v53 = vrot.slane %v2468_v51, 2  ;;  %v2526_v33 = vrot.slane %v2469_v14, 2  ;;  %v2409_v56 = vsel %vm2406_vm6, %v2392_v54, %v2400_v55  ;;  %v2417_v57 = vsel %vm2406_vm6, %v2400_v55, %v2392_v54  ;;  %v2379_v14 = vld [vmem:[%s5711_s1 + $0x50] sm:$0xff] }
 0xe27   : > { %v2502_v58 = vsel %vm2500_vm8, %v2485_v26, %v2493_v22  ;;  %v2510_v49 = vsel %vm2500_vm8, %v2493_v22, %v2485_v26  ;;  %v2433_v59 = vrot.slane %v5268_v44, 1  ;;  %v2393_v52 = vrot.slane %v2375_v32, 7  ;;  %v2380_v22 = vld [vmem:[%s5711_s1 + $0x58] sm:$0xff] }
 0xe28   : > { %v2535_v30 = vsel %vm2533_vm9, %v2518_v53, %v2526_v33  ;;  %v2543_v29 = vsel %vm2533_vm9, %v2526_v33, %v2518_v53  ;;  %v2401_v61 = vrot.slane %v2376_v48, 7  ;;  %v2426_v5 = vrot.slane %v2375_v32, 1 }
 0xe29   : > { %v2562_v54 = vsel %vm5313_vm14, %v2510_v49, %v2535_v30  ;;  %v2563_v55 = vsel %vm5317_vm15, %v2502_v58, %v2543_v29  ;;  %v2442_v44 = vsel %vm2439_vm7, %v2425_v27, %v2433_v59  ;;  %v2450_v62 = vsel %vm2439_vm7, %v2433_v59, %v2425_v27 }
 0xe2a   : > { %v2579_v63 = vrot.slane %v2562_v54, 4  ;;  %v2587_v41 = vrot.slane %v2563_v55, 4  ;;  %v2470_v6 = vsel %vm5295_vm11, %v2417_v57, %v2442_v44  ;;  %v2471_v7 = vsel %vm5299_vm12, %v2409_v56, %v2450_v62 }
 0xe2b   : > { %v2486_v19 = vrot.slane %v2470_v6, 6  ;;  %v2494_v3 = vrot.slane %v2471_v7, 6  ;;  %v2519_v11 = vrot.slane %v2470_v6, 2  ;;  %v2527_v8 = vrot.slane %v2471_v7, 2 }
 0xe2c   : > { %v2596_v27 = vsel %vm2594_vm13, %v2579_v63, %v2587_v41  ;;  %v2604_v1 = vsel %vm2594_vm13, %v2587_v41, %v2579_v63  ;;  %v2410_v38 = vsel %vm2406_vm6, %v2393_v52, %v2401_v61  ;;  %v2418_v24 = vsel %vm2406_vm6, %v2401_v61, %v2393_v52 }
 0xe2d   : > { %v2624_v4 = vsel %vm5338_vm0, %v2596_v27, %v2604_v1  ;;  %v2623_v60 = vsel %vm5342_vm1, %v2604_v1, %v2596_v27  ;;  %v2503_v17 = vsel %vm2500_vm8, %v2486_v19, %v2494_v3  ;;  %v2511_v16 = vsel %vm2500_vm8, %v2494_v3, %v2486_v19 }
 0xe2e   : > { %2640 = vst.msk [vmem:[%s3027_s25 + $0x10] sm:$0xff] %vm2637_vm10, %v2624_v4  ;;  %2641 = vst.msk [vmem:[%s3027_s25 + $0x18] sm:$0xff] %vm2637_vm10, %v2623_v60  ;;  %v2536_v47 = vsel %vm2533_vm9, %v2519_v11, %v2527_v8  ;;  %v2544_v35 = vsel %vm2533_vm9, %v2527_v8, %v2519_v11  ;;  %v2434_v36 = vrot.slane %v2376_v48, 1  ;;  %v2394_v10 = vrot.slane %v2377_v15, 7  ;;  %v2381_v8 = vld [vmem:[%s5711_s1 + $0x60] sm:$0xff] }
 0xe2f   : > { %v2564_v13 = vsel %vm5313_vm14, %v2511_v16, %v2536_v47  ;;  %v2565_v25 = vsel %vm5317_vm15, %v2503_v17, %v2544_v35  ;;  %v2402_v23 = vrot.slane %v2378_v18, 7  ;;  %v2427_v37 = vrot.slane %v2377_v15, 1 }
 0xe30   : > { %v2580_v43 = vrot.slane %v2564_v13, 4  ;;  %v2588_v34 = vrot.slane %v2565_v25, 4  ;;  %v2443_v46 = vsel %vm2439_vm7, %v2426_v5, %v2434_v36  ;;  %v2451_v50 = vsel %vm2439_vm7, %v2434_v36, %v2426_v5 }
 0xe31   : > { %v2472_v45 = vsel %vm5295_vm11, %v2418_v24, %v2443_v46  ;;  %v2473_v21 = vsel %vm5299_vm12, %v2410_v38, %v2451_v50  ;;  %v2411_v40 = vsel %vm2406_vm6, %v2394_v10, %v2402_v23  ;;  %v2419_v51 = vsel %vm2406_vm6, %v2402_v23, %v2394_v10  ;;  %v2382_v24 = vld [vmem:[%s5711_s1 + $0x68] sm:$0xff] }
 0xe32   : > { %v2597_v32 = vsel %vm2594_vm13, %v2580_v43, %v2588_v34  ;;  %v2605_v39 = vsel %vm2594_vm13, %v2588_v34, %v2580_v43  ;;  %v2487_v31 = vrot.slane %v2472_v45, 6  ;;  %v2495_v26 = vrot.slane %v2473_v21, 6 }
 0xe33   : > { %v2626_v48 = vsel %vm5338_vm0, %v2597_v32, %v2605_v39  ;;  %v2625_v53 = vsel %vm5342_vm1, %v2605_v39, %v2597_v32  ;;  %v2520_v33 = vrot.slane %v2472_v45, 2  ;;  %v2528_v56 = vrot.slane %v2473_v21, 2  ;;  %v2383_v39 = vld [vmem:[%s5711_s1 + $0x70] sm:$0xff] }
 0xe34   : > { %2642 = vst.msk [vmem:[%s3027_s25 + $0x20] sm:$0xff] %vm2637_vm10, %v2626_v48  ;;  %2643 = vst.msk [vmem:[%s3027_s25 + $0x28] sm:$0xff] %vm2637_vm10, %v2625_v53  ;;  %v2504_v57 = vsel %vm2500_vm8, %v2487_v31, %v2495_v26  ;;  %v2512_v58 = vsel %vm2500_vm8, %v2495_v26, %v2487_v31  ;;  %v2435_v49 = vrot.slane %v2378_v18, 1  ;;  %v2395_v59 = vrot.slane %v2379_v14, 7  ;;  %v2384_v31 = vld [vmem:[%s5711_s1 + $0x78] sm:$0xff] }
 0xe35   : > { %v2537_v52 = vsel %vm2533_vm9, %v2520_v33, %v2528_v56  ;;  %v2545_v30 = vsel %vm2533_vm9, %v2528_v56, %v2520_v33  ;;  %v2403_v29 = vrot.slane %v2380_v22, 7  ;;  %v2428_v61 = vrot.slane %v2379_v14, 1 }
 0xe36   : > { %v2566_v5 = vsel %vm5313_vm14, %v2512_v58, %v2537_v52  ;;  %v2567_v54 = vsel %vm5317_vm15, %v2504_v57, %v2545_v30  ;;  %v2444_v55 = vsel %vm2439_vm7, %v2427_v37, %v2435_v49  ;;  %v2452_v44 = vsel %vm2439_vm7, %v2435_v49, %v2427_v37 }
 0xe37   : > { %v2581_v62 = vrot.slane %v2566_v5, 4  ;;  %v2589_v63 = vrot.slane %v2567_v54, 4  ;;  %v2474_v41 = vsel %vm5295_vm11, %v2419_v51, %v2444_v55  ;;  %v2475_v6 = vsel %vm5299_vm12, %v2411_v40, %v2452_v44 }
 0xe38   : > { %v2488_v7 = vrot.slane %v2474_v41, 6  ;;  %v2496_v19 = vrot.slane %v2475_v6, 6  ;;  %v2521_v3 = vrot.slane %v2474_v41, 2  ;;  %v2529_v11 = vrot.slane %v2475_v6, 2 }
 0xe39   : > { %v2598_v15 = vsel %vm2594_vm13, %v2581_v62, %v2589_v63  ;;  %v2606_v27 = vsel %vm2594_vm13, %v2589_v63, %v2581_v62  ;;  %v2412_v1 = vsel %vm2406_vm6, %v2395_v59, %v2403_v29  ;;  %v2420_v38 = vsel %vm2406_vm6, %v2403_v29, %v2395_v59 }
 0xe3a   : > { %v2628_v18 = vsel %vm5338_vm0, %v2598_v15, %v2606_v27  ;;  %v2627_v4 = vsel %vm5342_vm1, %v2606_v27, %v2598_v15  ;;  %v2505_v60 = vsel %vm2500_vm8, %v2488_v7, %v2496_v19  ;;  %v2513_v17 = vsel %vm2500_vm8, %v2496_v19, %v2488_v7 }
 0xe3b   : > { %2644 = vst.msk [vmem:[%s3027_s25 + $0x30] sm:$0xff] %vm2637_vm10, %v2628_v18  ;;  %2645 = vst.msk [vmem:[%s3027_s25 + $0x38] sm:$0xff] %vm2637_vm10, %v2627_v4  ;;  %v2538_v16 = vsel %vm2533_vm9, %v2521_v3, %v2529_v11  ;;  %v2546_v47 = vsel %vm2533_vm9, %v2529_v11, %v2521_v3  ;;  %v2436_v35 = vrot.slane %v2380_v22, 1  ;;  %v2396_v36 = vrot.slane %v2381_v8, 7 }
 0xe3c   : > { %v2568_v10 = vsel %vm5313_vm14, %v2513_v17, %v2538_v16  ;;  %v2569_v13 = vsel %vm5317_vm15, %v2505_v60, %v2546_v47  ;;  %v2404_v25 = vrot.slane %v2382_v24, 7  ;;  %v2429_v21 = vrot.slane %v2381_v8, 1 }
 0xe3d   : > { %v2582_v23 = vrot.slane %v2568_v10, 4  ;;  %v2590_v37 = vrot.slane %v2569_v13, 4  ;;  %v2445_v43 = vsel %vm2439_vm7, %v2428_v61, %v2436_v35  ;;  %v2453_v34 = vsel %vm2439_vm7, %v2436_v35, %v2428_v61 }
 0xe3e   : > { %v2476_v46 = vsel %vm5295_vm11, %v2420_v38, %v2445_v43  ;;  %v2477_v50 = vsel %vm5299_vm12, %v2412_v1, %v2453_v34  ;;  %v2413_v45 = vsel %vm2406_vm6, %v2396_v36, %v2404_v25  ;;  %v2421_v57 = vsel %vm2406_vm6, %v2404_v25, %v2396_v36 }
 0xe3f   : > { %v2599_v40 = vsel %vm2594_vm13, %v2582_v23, %v2590_v37  ;;  %v2607_v51 = vsel %vm2594_vm13, %v2590_v37, %v2582_v23  ;;  %v2489_v14 = vrot.slane %v2476_v46, 6  ;;  %v2497_v32 = vrot.slane %v2477_v50, 6 }
 0xe40   : > { %v2630_v26 = vsel %vm5338_vm0, %v2599_v40, %v2607_v51  ;;  %v2629_v22 = vsel %vm5342_vm1, %v2607_v51, %v2599_v40  ;;  %v2522_v48 = vrot.slane %v2476_v46, 2  ;;  %v2530_v53 = vrot.slane %v2477_v50, 2 }
 0xe41   : > { %2646 = vst.msk [vmem:[%s3027_s25 + $0x40] sm:$0xff] %vm2637_vm10, %v2630_v26  ;;  %2647 = vst.msk [vmem:[%s3027_s25 + $0x48] sm:$0xff] %vm2637_vm10, %v2629_v22  ;;  %v2506_v33 = vsel %vm2500_vm8, %v2489_v14, %v2497_v32  ;;  %v2514_v56 = vsel %vm2500_vm8, %v2497_v32, %v2489_v14  ;;  %v2437_v58 = vrot.slane %v2382_v24, 1  ;;  %v2397_v52 = vrot.slane %v2383_v39, 7 }
 0xe42   : > { %v2539_v49 = vsel %vm2533_vm9, %v2522_v48, %v2530_v53  ;;  %v2547_v59 = vsel %vm2533_vm9, %v2530_v53, %v2522_v48  ;;  %v2405_v30 = vrot.slane %v2384_v31, 7  ;;  %v2430_v15 = vrot.slane %v2383_v39, 1 }
 0xe43   : > { %v2570_v29 = vsel %vm5313_vm14, %v2514_v56, %v2539_v49  ;;  %v2571_v61 = vsel %vm5317_vm15, %v2506_v33, %v2547_v59  ;;  %v2446_v5 = vsel %vm2439_vm7, %v2429_v21, %v2437_v58  ;;  %v2454_v54 = vsel %vm2439_vm7, %v2437_v58, %v2429_v21 }
 0xe44   : > { %v2583_v55 = vrot.slane %v2570_v29, 4  ;;  %v2591_v44 = vrot.slane %v2571_v61, 4  ;;  %v2478_v62 = vsel %vm5295_vm11, %v2421_v57, %v2446_v5  ;;  %v2479_v63 = vsel %vm5299_vm12, %v2413_v45, %v2454_v54 }
 0xe45   : > { %v2490_v41 = vrot.slane %v2478_v62, 6  ;;  %v2498_v6 = vrot.slane %v2479_v63, 6  ;;  %v2523_v7 = vrot.slane %v2478_v62, 2  ;;  %v2531_v19 = vrot.slane %v2479_v63, 2 }
 0xe46   : > { %v2600_v3 = vsel %vm2594_vm13, %v2583_v55, %v2591_v44  ;;  %v2608_v11 = vsel %vm2594_vm13, %v2591_v44, %v2583_v55  ;;  %v2414_v8 = vsel %vm2406_vm6, %v2397_v52, %v2405_v30  ;;  %v2422_v60 = vsel %vm2406_vm6, %v2405_v30, %v2397_v52 }
 0xe47   : > { %v2632_v27 = vsel %vm5338_vm0, %v2600_v3, %v2608_v11  ;;  %v2631_v1 = vsel %vm5342_vm1, %v2608_v11, %v2600_v3  ;;  %v2507_v38 = vsel %vm2500_vm8, %v2490_v41, %v2498_v6  ;;  %v2515_v24 = vsel %vm2500_vm8, %v2498_v6, %v2490_v41 }
 0xe48   : > { %2648 = vst.msk [vmem:[%s3027_s25 + $0x50] sm:$0xff] %vm2637_vm10, %v2632_v27  ;;  %2649 = vst.msk [vmem:[%s3027_s25 + $0x58] sm:$0xff] %vm2637_vm10, %v2631_v1  ;;  %v2540_v18 = vsel %vm2533_vm9, %v2523_v7, %v2531_v19  ;;  %v2548_v4 = vsel %vm2533_vm9, %v2531_v19, %v2523_v7  ;;  %v2438_v17 = vrot.slane %v2384_v31, 1 }
 0xe49   : > { %v2572_v16 = vsel %vm5313_vm14, %v2515_v24, %v2540_v18  ;;  %v2573_v47 = vsel %vm5317_vm15, %v2507_v38, %v2548_v4 }
 0xe4a   : > { %v2584_v35 = vrot.slane %v2572_v16, 4  ;;  %v2592_v36 = vrot.slane %v2573_v47, 4  ;;  %v2447_v10 = vsel %vm2439_vm7, %v2430_v15, %v2438_v17  ;;  %v2455_v13 = vsel %vm2439_vm7, %v2438_v17, %v2430_v15 }
 0xe4b   : > { %v2480_v25 = vsel %vm5295_vm11, %v2422_v60, %v2447_v10  ;;  %v2481_v23 = vsel %vm5299_vm12, %v2414_v8, %v2455_v13 }
 0xe4c   : > { %v2601_v37 = vsel %vm2594_vm13, %v2584_v35, %v2592_v36  ;;  %v2609_v43 = vsel %vm2594_vm13, %v2592_v36, %v2584_v35  ;;  %v2491_v34 = vrot.slane %v2480_v25, 6  ;;  %v2499_v46 = vrot.slane %v2481_v23, 6 }
 0xe4d   : > { %v2634_v50 = vsel %vm5338_vm0, %v2601_v37, %v2609_v43  ;;  %v2633_v45 = vsel %vm5342_vm1, %v2609_v43, %v2601_v37  ;;  %v2524_v21 = vrot.slane %v2480_v25, 2  ;;  %v2532_v0 = vrot.slane %v2481_v23, 2 }
 0xe4e   : > { %2650 = vst.msk [vmem:[%s3027_s25 + $0x60] sm:$0xff] %vm2637_vm10, %v2634_v50  ;;  %2651 = vst.msk [vmem:[%s3027_s25 + $0x68] sm:$0xff] %vm2637_vm10, %v2633_v45  ;;  %v2508_v2 = vsel %vm2500_vm8, %v2491_v34, %v2499_v46  ;;  %v2516_v40 = vsel %vm2500_vm8, %v2499_v46, %v2491_v34 }
 0xe4f   : > { %v2541_v51 = vsel %vm2533_vm9, %v2524_v21, %v2532_v0  ;;  %v2549_v14 = vsel %vm2533_vm9, %v2532_v0, %v2524_v21 }
 0xe50   : > { %v2574_v32 = vsel %vm5313_vm14, %v2516_v40, %v2541_v51  ;;  %v2575_v39 = vsel %vm5317_vm15, %v2508_v2, %v2549_v14 }
 0xe51   : > { %v2585_v31 = vrot.slane %v2574_v32, 4  ;;  %v2593_v26 = vrot.slane %v2575_v39, 4 }
 0xe53   : > { %v2602_v22 = vsel %vm2594_vm13, %v2585_v31, %v2593_v26  ;;  %v2610_v48 = vsel %vm2594_vm13, %v2593_v26, %v2585_v31 }
 0xe54   : > { %v2636_v53 = vsel %vm5338_vm0, %v2602_v22, %v2610_v48  ;;  %v2635_v33 = vsel %vm5342_vm1, %v2610_v48, %v2602_v22 }
 0xe55   : > { %2652 = vst.msk [vmem:[%s3027_s25 + $0x70] sm:$0xff] %vm2637_vm10, %v2636_v53  ;;  %2653 = vst.msk [vmem:[%s3027_s25 + $0x78] sm:$0xff] %vm2637_vm10, %v2635_v33 }
 0xe56 PF: > { %s2777_s20 = sshll.u32 %s2923_s12, 11  ;;  %s2670_s7 = sshll.u32 %s3027_s25, 4  ;;  %s5660_s7 = int_to_ptr.vmem [resolvable:$true] %s2670_s7 }
 0xe57   : > { %s5657_s6 = scalar_lea.hbm %s5712_s2, %s2777_s20  ;;  %s5664_s8 = scalar_lea.sflag [#allocation3], %s169_s23 }
 0xe58   : > { %s2853_s30 = scalar_lea.vmem %s5660_s7, 2048  ;;  %s2951_s12 = smov [#allocation2]  }
 0xe59   : > { %p2854_p1 = scmp.ne.s32.totalorder %s5660_s7, %s2853_s30  ;;  %s2857_s15 = sshll.u32 %s2951_s12, 4  ;;  %s2858_s15 = int_to_ptr.vmem [resolvable:$false] %s2857_s15 }
 0xe5a   : > { %s2859_s16 = scalar_lea.vmem %s2858_s15, 4096  ;;  %p2860_p5 = scmp.lt.s32.totalorder %s5660_s7, %s2858_s15 }
 0xe5b   : > { %p2855_p2 = pnand %p2854_p1, %p3009_p4  ;;  %p2861_p6 = scmp.lt.s32.totalorder %s2859_s16, %s2853_s30 }
 0xe5d   : > { %p2856_p3 = pneg %p2855_p2  ;;  %p2862_p7 = por %p2861_p6, %p2860_p5 }
 0xe5f   : > { %p2863_p9 = pnand %p2862_p7, %p2856_p3 }
 0xe61   : > { %2866 = shalt.err (!%p2863_p9)
}
 0xe62   : > { %s2867_s23 = scalar_lea.hbm %s5657_s6, 2048  ;;  %s2871_s24 = scalar_lea.hbm %s5712_s2, 8192 }
 0xe63   : > { %p2868_p10 = scmp.ne.s32.totalorder %s5657_s6, %s2867_s23  ;;  %p2872_p13 = scmp.lt.u32.totalorder %s5657_s6, %s5712_s2 }
 0xe64   : > { %p2873_p0 = scmp.lt.u32.totalorder %s2871_s24, %s2867_s23  ;;  %p2875_p2 = scmp.lt.u32.totalorder %s2867_s23, %s5657_s6 }
 0xe65   : > { %p2869_p11 = pnand %p2868_p10, %p3009_p4 }
 0xe66   : > { %p2874_p1 = por %p2873_p0, %p2872_p13 }
 0xe67   : > { %p2870_p12 = pneg %p2869_p11 }
 0xe68   : > { %p2876_p3 = por %p2875_p2, %p2874_p1 }
 0xe6a   : > { %p2877_p5 = pnand %p2876_p3, %p2870_p12 }
 0xe6c   : > { %2880 = shalt.err (!%p2877_p5)
}
 0xe6d   : > { %s2952_s28 = smov 128   ;;  %s2953_s29 = smov 8  }
 0xe6e   : > { %2778 = dma.vmem_to_hbm [thread:$0]  (%p3009_p4), %s5660_s7, 2048, %s5657_s6, %s5664_s8, %s2952_s28, %s2952_s28, %s2953_s29  }
 0xe6f PF: > { %p2784_p6 = scmp.ge.s32.totalorder %s2931_s14, 2  ;;  %s2685_s3 = sand.u32 1, %s2911_s9  }
 0xe70   : > { %s2686_s20 = scalar_lea.sflag [#allocation3], %s2685_s3 }
 0xe71   : > { %p2781_p7 = pnand %p2784_p6, %p3016_p8 }
 0xe73   : > { %2906 = dma.done.wait (!%p2781_p7), %s2686_s20, 2048  }
 0xe74   : > { %2908 = vsyncadd (!%p2781_p7), %s2686_s20, 4294965248  ;;  %s15_s14 = sadd.s32 1, %s2931_s14   ;;  %s5751_s9 = smov %s2915_s10 }
 0xe75   : > { %p12_p9 = scmp.ge.s32.totalorder %s15_s14, 6   ;;  %s5752_s10 = smov %s2919_s11 }
 0xe76   : > { %s5753_s11 = smov %s3022_s22  ;;  %s5754_s12 = smov %s2927_s13 }
 0xe77   : > { %s5755_s13 = smov %s5757_s17  ;;  %14 = sbr.rel (!%p12_p9) target bundleno = 4 (0x4), region = 82 }
 0xe7e   :  { %2691 = vsyncpa [#allocation3], 1 }
 0xe7f   :  { %2693 = vsyncpa [#allocation3 + $0x1], 1 }

</bundles_post_ra>
